<compile_context>
chip_gen: v5e
topology: v5e:2x2
jax: 0.10.0
libtpu: 0.0.40
codegen_flags: <defaults>
</compile_context>

<pallas_src>
import jax
import jax.numpy as jnp
from jax.experimental import pallas as pl
from jax.experimental.pallas import tpu as pltpu


KERNEL_SIZES = (2, 3, 4, 5)   # self.cnn_kernel_sizes
NUM_FILTERS = 150             # self.cnn_kernel_number


# -----------------------------------------------------------------------------
# Pallas kernel: 4 full-width convs + tanh + max-pool over time + local concat + FC head
# -----------------------------------------------------------------------------
def cnn_forward_kernel(x_ref, loc_ref, *refs):
    n_conv = 2 * len(KERNEL_SIZES)
    conv_refs = refs[:n_conv]
    fc1w_ref, fc1b_ref, fc2w_ref, fc2b_ref, out_ref = refs[n_conv:]

    x = x_ref[...]                               # (BT, L, D)  bf16
    BT, L, D = x.shape
    x2d = x.reshape(BT * L, D)                   # aligned reshape (L % 8 == 0)

    pooled = []
    for idx, Kc in enumerate(KERNEL_SIZES):
        w = conv_refs[2 * idx][...]              # (Kc*D, F)  bf16
        b = conv_refs[2 * idx + 1][...]          # (1, F)     f32
        F = b.shape[-1]
        Lc = L - Kc + 1                          # valid conv positions
        # Conv2d(1, F, (Kc, D)) over (BT, 1, L, D) == sum over the Kc row
        # offsets of shifted MXU matmuls: z[:, t, :] = sum_k x[:, t+k, :] @ W_k.
        z = jnp.zeros((BT, Lc, F), jnp.float32)
        for k in range(Kc):
            pk = jnp.dot(x2d, w[k * D:(k + 1) * D, :],
                         preferred_element_type=jnp.float32)    # (BT*L, F) f32 acc
            z = z + pk.reshape(BT, L, F)[:, k:k + Lc, :]
        z = jnp.tanh(z + b)                      # torch.tanh(conv(...))  (EUP, f32)
        pooled.append(jnp.max(z, axis=1))        # fused F.max_pool1d over time -> (BT, F)

    # introduceLocalEmbedding: cat(pooled_2..5, local_rep); nn.Dropout == identity at eval.
    rep = jnp.concatenate(pooled + [loc_ref[...]], axis=-1)      # (BT, 4F + (2w+1)*D)
    h = jnp.dot(rep, fc1w_ref[...], preferred_element_type=jnp.float32) + fc1b_ref[...]
    h = jnp.dot(h, fc2w_ref[...], preferred_element_type=jnp.float32) + fc2b_ref[...]
    out_ref[...] = h.astype(out_ref.dtype)


def cnn_pallas_forward(x, local_rep, params):
    """x: (BNK, L, D) f32, local_rep: (BNK, (2w+1)*D) f32  ->  (BNK, H) f32."""
    BNK, L, D = x.shape
    locD = local_rep.shape[-1]
    H = params['fc2_w'].shape[-1]

    # Tile the flattened batch axis; pad to a multiple of the tile (sublane-aligned).
    BT = 8
    Bp = ((BNK + BT - 1) // BT) * BT
    if Bp != BNK:
        x = jnp.concatenate([x, jnp.zeros((Bp - BNK, L, D), x.dtype)], axis=0)
        local_rep = jnp.concatenate(
            [local_rep, jnp.zeros((Bp - BNK, locD), local_rep.dtype)], axis=0)

    # bf16 matmul operands (halves HBM traffic / VMEM for x and the conv weights).
    x_bf16 = x.astype(jnp.bfloat16)

    conv_args, conv_specs = [], []
    for w, b in zip(params['conv_w'], params['conv_b']):
        conv_args += [w.astype(jnp.bfloat16), b]
        conv_specs += [pl.BlockSpec(w.shape, lambda i: (0, 0)),
                       pl.BlockSpec(b.shape, lambda i: (0, 0))]

    fc_args = [params['fc1_w'], params['fc1_b'], params['fc2_w'], params['fc2_b']]
    fc_specs = [pl.BlockSpec(a.shape, lambda i: (0, 0)) for a in fc_args]

    out = pl.pallas_call(
        cnn_forward_kernel,
        out_shape=jax.ShapeDtypeStruct((Bp, H), jnp.float32),
        grid=(Bp // BT,),
        in_specs=[pl.BlockSpec((BT, L, D), lambda i: (i, 0, 0)),
                  pl.BlockSpec((BT, locD), lambda i: (i, 0))] + conv_specs + fc_specs,
        out_specs=pl.BlockSpec((BT, H), lambda i: (i, 0)),
        compiler_params=pltpu.CompilerParams(
            dimension_semantics=("parallel",),           # shard batch tiles across TCs
            vmem_limit_bytes=32 * 1024 * 1024),
    )(x_bf16, local_rep, *conv_args, *fc_args)
    return out[:BNK]


# -----------------------------------------------------------------------------
# Plain-JAX glue (parameter init, local embedding gather, reshapes)
# -----------------------------------------------------------------------------
def init_cnn_params(key, D, H, window, filters=NUM_FILTERS, ksizes=KERNEL_SIZES):
    keys = jax.random.split(key, 2 * len(ksizes) + 4)
    conv_w, conv_b = [], []
    for i, Kc in enumerate(ksizes):
        k = 1.0 / float(Kc * D) ** 0.5       # torch Conv2d default init scale
        # stored pre-transposed: (Kc*D, F) vs torch's (F, 1, Kc, D)
        conv_w.append(jax.random.uniform(keys[2 * i], (Kc * D, filters), jnp.float32, -k, k))
        conv_b.append(jax.random.uniform(keys[2 * i + 1], (1, filters), jnp.float32, -k, k))
    dim_rep = filters * len(ksizes) + (2 * window + 1) * D
    k1 = 1.0 / float(dim_rep) ** 0.5
    k2 = 1.0 / float(H) ** 0.5
    return dict(
        conv_w=conv_w, conv_b=conv_b,
        fc1_w=jax.random.uniform(keys[-4], (dim_rep, H), jnp.float32, -k1, k1),
        fc1_b=jax.random.uniform(keys[-3], (1, H), jnp.float32, -k1, k1),
        fc2_w=jax.random.uniform(keys[-2], (H, H), jnp.float32, -k2, k2),
        fc2_b=jax.random.uniform(keys[-1], (1, H), jnp.float32, -k2, k2),
    )


def retrieve_local_embeddings(embed, anchors, window):
    # Mirrors retrieveLocalEmbeddings: gather a (2*window+1)-wide window of
    # embeddings around each anchor, zero-padded at the sequence edges.
    B, L, D = embed.shape
    zeros = jnp.zeros((B, window, D), embed.dtype)
    padded = jnp.concatenate([zeros, embed, zeros], axis=1)              # (B, L+2w, D)
    offs = jnp.arange(2 * window + 1, dtype=jnp.int32)
    ids = anchors[:, None].astype(jnp.int32) + offs[None, :]             # (B, 2w+1)
    res = jnp.take_along_axis(padded, ids[:, :, None], axis=1)           # (B, 2w+1, D)
    return res.reshape(B, -1)


def cnn_net_forward(params, inRep, anchors, window):
    # TODO(synk): the Embedding module (args.vectors / tune_embedding) is not
    # defined in the source; inputs are treated as already-embedded (B,N,K,L,D).
    B, N, K, L, D = inRep.shape
    x = inRep.reshape(B * N * K, L, D)
    local_rep = retrieve_local_embeddings(x, anchors, window)            # window > 0 branch
    out = cnn_pallas_forward(x, local_rep, params)                       # (BNK, H)
    return out.reshape(B, N, K, -1)


# -----------------------------------------------------------------------------
# Pure-JAX reference (f32) for a tolerance check
# -----------------------------------------------------------------------------
def cnn_forward_reference(params, inRep, anchors, window):
    B, N, K, L, D = inRep.shape
    x = inRep.reshape(B * N * K, L, D)
    pooled = []
    for Kc, w, b in zip(KERNEL_SIZES, params['conv_w'], params['conv_b']):
        Lc = L - Kc + 1
        z = jnp.zeros((x.shape[0], Lc, b.shape[-1]), jnp.float32)
        for k in range(Kc):
            z = z + jnp.einsum('bld,df->blf', x[:, k:k + Lc, :], w[k * D:(k + 1) * D, :])
        pooled.append(jnp.max(jnp.tanh(z + b), axis=1))
    loc = retrieve_local_embeddings(x, anchors, window)
    rep = jnp.concatenate(pooled + [loc], axis=-1)
    h = rep @ params['fc1_w'] + params['fc1_b']
    h = h @ params['fc2_w'] + params['fc2_b']
    return h.reshape(B, N, K, -1)


if __name__ == "__main__":
    B, N, K, L, D = 2, 2, 1, 16, 32
    H, window = 32, 2
    BNK = B * N * K

    key = jax.random.PRNGKey(0)
    k_x, k_a, k_p = jax.random.split(key, 3)

    inRep = jax.random.normal(k_x, (B, N, K, L, D), jnp.float32)
    anchors = jax.random.randint(k_a, (BNK,), 0, L, jnp.int32)
    params = init_cnn_params(k_p, D, H, window)

    frep = cnn_net_forward(params, inRep, anchors, window)
    jax.block_until_ready(frep)

    assert frep.shape == (B, N, K, H), frep.shape
    assert bool(jnp.all(jnp.isfinite(frep)))

    ref = cnn_forward_reference(params, inRep, anchors, window)
    assert bool(jnp.allclose(frep, ref, atol=5e-2, rtol=5e-2)), (
        float(jnp.max(jnp.abs(frep - ref))))

    print("KERNEL_OK")
</pallas_src>

<mosaic_0001>
module attributes {stable_mosaic.version = 11 : i64} {
  func.func @cnn_forward_kernel(%arg0: i32, %arg1: memref<8x16x32xbf16, #tpu.memory_space<vmem>>, %arg2: memref<8x160xf32, #tpu.memory_space<vmem>>, %arg3: memref<64x150xbf16, #tpu.memory_space<vmem>>, %arg4: memref<1x150xf32, #tpu.memory_space<vmem>>, %arg5: memref<96x150xbf16, #tpu.memory_space<vmem>>, %arg6: memref<1x150xf32, #tpu.memory_space<vmem>>, %arg7: memref<128x150xbf16, #tpu.memory_space<vmem>>, %arg8: memref<1x150xf32, #tpu.memory_space<vmem>>, %arg9: memref<160x150xbf16, #tpu.memory_space<vmem>>, %arg10: memref<1x150xf32, #tpu.memory_space<vmem>>, %arg11: memref<760x32xf32, #tpu.memory_space<vmem>>, %arg12: memref<1x32xf32, #tpu.memory_space<vmem>>, %arg13: memref<32x32xf32, #tpu.memory_space<vmem>>, %arg14: memref<1x32xf32, #tpu.memory_space<vmem>>, %arg15: memref<8x32xf32, #tpu.memory_space<vmem>>) attributes {dimension_semantics = [#tpu.dimension_semantics<parallel>], iteration_bounds = array<i64: 1>, scalar_prefetch = 0 : i64, scratch_operands = 0 : i64, tpu.core_type = #tpu.core_type<tc>, window_params = [{transform_indices = @transform_0, window_bounds = array<i64: 8, 16, 32>}, {transform_indices = @transform_1, window_bounds = array<i64: 8, 160>}, {pipeline_mode = #tpu.pipeline_mode<synchronous>, transform_indices = @transform_2, window_bounds = array<i64: 64, 150>}, {pipeline_mode = #tpu.pipeline_mode<synchronous>, transform_indices = @transform_3, window_bounds = array<i64: 1, 150>}, {pipeline_mode = #tpu.pipeline_mode<synchronous>, transform_indices = @transform_4, window_bounds = array<i64: 96, 150>}, {pipeline_mode = #tpu.pipeline_mode<synchronous>, transform_indices = @transform_5, window_bounds = array<i64: 1, 150>}, {pipeline_mode = #tpu.pipeline_mode<synchronous>, transform_indices = @transform_6, window_bounds = array<i64: 128, 150>}, {pipeline_mode = #tpu.pipeline_mode<synchronous>, transform_indices = @transform_7, window_bounds = array<i64: 1, 150>}, {pipeline_mode = #tpu.pipeline_mode<synchronous>, transform_indices = @transform_8, window_bounds = array<i64: 160, 150>}, {pipeline_mode = #tpu.pipeline_mode<synchronous>, transform_indices = @transform_9, window_bounds = array<i64: 1, 150>}, {pipeline_mode = #tpu.pipeline_mode<synchronous>, transform_indices = @transform_10, window_bounds = array<i64: 760, 32>}, {pipeline_mode = #tpu.pipeline_mode<synchronous>, transform_indices = @transform_11, window_bounds = array<i64: 1, 32>}, {pipeline_mode = #tpu.pipeline_mode<synchronous>, transform_indices = @transform_12, window_bounds = array<i64: 32, 32>}, {pipeline_mode = #tpu.pipeline_mode<synchronous>, transform_indices = @transform_13, window_bounds = array<i64: 1, 32>}, {transform_indices = @transform_14, window_bounds = array<i64: 8, 32>}]} {
    %c0 = arith.constant 0 : index
    %c0_0 = arith.constant 0 : index
    %c0_1 = arith.constant 0 : index
    %0 = vector.load %arg1[%c0, %c0_0, %c0_1] : memref<8x16x32xbf16, #tpu.memory_space<vmem>>, vector<8x16x32xbf16>
    %1 = vector.shape_cast %0 : vector<8x16x32xbf16> to vector<128x32xbf16>
    %c0_2 = arith.constant 0 : index
    %c0_3 = arith.constant 0 : index
    %2 = vector.load %arg3[%c0_2, %c0_3] : memref<64x150xbf16, #tpu.memory_space<vmem>>, vector<64x150xbf16>
    %c0_4 = arith.constant 0 : index
    %c0_5 = arith.constant 0 : index
    %3 = vector.load %arg4[%c0_4, %c0_5] : memref<1x150xf32, #tpu.memory_space<vmem>>, vector<1x150xf32>
    %cst = arith.constant 0.000000e+00 : f32
    %4 = vector.broadcast %cst : f32 to vector<8x15x150xf32>
    %5 = vector.extract_strided_slice %2 {offsets = [0, 0], sizes = [32, 150], strides = [1, 1]} : vector<64x150xbf16> to vector<32x150xbf16>
    %cst_6 = arith.constant dense<0.000000e+00> : vector<128x150xf32>
    %6 = tpu.matmul %1, %5, %cst_6 {dimension_numbers = #tpu.dot_dimension_numbers<[1], [0], [0], [1], [0, 0, 1, 1], [], []>} : vector<128x32xbf16>, vector<32x150xbf16>, vector<128x150xf32> -> vector<128x150xf32>
    %7 = vector.shape_cast %6 : vector<128x150xf32> to vector<8x16x150xf32>
    %8 = vector.extract_strided_slice %7 {offsets = [0, 0, 0], sizes = [8, 15, 150], strides = [1, 1, 1]} : vector<8x16x150xf32> to vector<8x15x150xf32>
    %9 = arith.addf %4, %8 : vector<8x15x150xf32>
    %10 = vector.extract_strided_slice %2 {offsets = [32, 0], sizes = [32, 150], strides = [1, 1]} : vector<64x150xbf16> to vector<32x150xbf16>
    %cst_7 = arith.constant dense<0.000000e+00> : vector<128x150xf32>
    %11 = tpu.matmul %1, %10, %cst_7 {dimension_numbers = #tpu.dot_dimension_numbers<[1], [0], [0], [1], [0, 0, 1, 1], [], []>} : vector<128x32xbf16>, vector<32x150xbf16>, vector<128x150xf32> -> vector<128x150xf32>
    %12 = vector.shape_cast %11 : vector<128x150xf32> to vector<8x16x150xf32>
    %13 = vector.extract_strided_slice %12 {offsets = [0, 1, 0], sizes = [8, 15, 150], strides = [1, 1, 1]} : vector<8x16x150xf32> to vector<8x15x150xf32>
    %14 = arith.addf %9, %13 : vector<8x15x150xf32>
    %15 = vector.shape_cast %3 : vector<1x150xf32> to vector<1x1x150xf32>
    %16 = vector.broadcast %15 : vector<1x1x150xf32> to vector<8x15x150xf32>
    %17 = arith.addf %14, %16 : vector<8x15x150xf32>
    %18 = math.tanh %17 : vector<8x15x150xf32>
    %cst_8 = arith.constant dense<0xFF800000> : vector<8x150xf32>
    %19 = vector.multi_reduction <maximumf>, %18, %cst_8 [1] : vector<8x15x150xf32> to vector<8x150xf32>
    %c0_9 = arith.constant 0 : index
    %c0_10 = arith.constant 0 : index
    %20 = vector.load %arg5[%c0_9, %c0_10] : memref<96x150xbf16, #tpu.memory_space<vmem>>, vector<96x150xbf16>
    %c0_11 = arith.constant 0 : index
    %c0_12 = arith.constant 0 : index
    %21 = vector.load %arg6[%c0_11, %c0_12] : memref<1x150xf32, #tpu.memory_space<vmem>>, vector<1x150xf32>
    %cst_13 = arith.constant 0.000000e+00 : f32
    %22 = vector.broadcast %cst_13 : f32 to vector<8x14x150xf32>
    %23 = vector.extract_strided_slice %20 {offsets = [0, 0], sizes = [32, 150], strides = [1, 1]} : vector<96x150xbf16> to vector<32x150xbf16>
    %cst_14 = arith.constant dense<0.000000e+00> : vector<128x150xf32>
    %24 = tpu.matmul %1, %23, %cst_14 {dimension_numbers = #tpu.dot_dimension_numbers<[1], [0], [0], [1], [0, 0, 1, 1], [], []>} : vector<128x32xbf16>, vector<32x150xbf16>, vector<128x150xf32> -> vector<128x150xf32>
    %25 = vector.shape_cast %24 : vector<128x150xf32> to vector<8x16x150xf32>
    %26 = vector.extract_strided_slice %25 {offsets = [0, 0, 0], sizes = [8, 14, 150], strides = [1, 1, 1]} : vector<8x16x150xf32> to vector<8x14x150xf32>
    %27 = arith.addf %22, %26 : vector<8x14x150xf32>
    %28 = vector.extract_strided_slice %20 {offsets = [32, 0], sizes = [32, 150], strides = [1, 1]} : vector<96x150xbf16> to vector<32x150xbf16>
    %cst_15 = arith.constant dense<0.000000e+00> : vector<128x150xf32>
    %29 = tpu.matmul %1, %28, %cst_15 {dimension_numbers = #tpu.dot_dimension_numbers<[1], [0], [0], [1], [0, 0, 1, 1], [], []>} : vector<128x32xbf16>, vector<32x150xbf16>, vector<128x150xf32> -> vector<128x150xf32>
    %30 = vector.shape_cast %29 : vector<128x150xf32> to vector<8x16x150xf32>
    %31 = vector.extract_strided_slice %30 {offsets = [0, 1, 0], sizes = [8, 14, 150], strides = [1, 1, 1]} : vector<8x16x150xf32> to vector<8x14x150xf32>
    %32 = arith.addf %27, %31 : vector<8x14x150xf32>
    %33 = vector.extract_strided_slice %20 {offsets = [64, 0], sizes = [32, 150], strides = [1, 1]} : vector<96x150xbf16> to vector<32x150xbf16>
    %cst_16 = arith.constant dense<0.000000e+00> : vector<128x150xf32>
    %34 = tpu.matmul %1, %33, %cst_16 {dimension_numbers = #tpu.dot_dimension_numbers<[1], [0], [0], [1], [0, 0, 1, 1], [], []>} : vector<128x32xbf16>, vector<32x150xbf16>, vector<128x150xf32> -> vector<128x150xf32>
    %35 = vector.shape_cast %34 : vector<128x150xf32> to vector<8x16x150xf32>
    %36 = vector.extract_strided_slice %35 {offsets = [0, 2, 0], sizes = [8, 14, 150], strides = [1, 1, 1]} : vector<8x16x150xf32> to vector<8x14x150xf32>
    %37 = arith.addf %32, %36 : vector<8x14x150xf32>
    %38 = vector.shape_cast %21 : vector<1x150xf32> to vector<1x1x150xf32>
    %39 = vector.broadcast %38 : vector<1x1x150xf32> to vector<8x14x150xf32>
    %40 = arith.addf %37, %39 : vector<8x14x150xf32>
    %41 = math.tanh %40 : vector<8x14x150xf32>
    %cst_17 = arith.constant dense<0xFF800000> : vector<8x150xf32>
    %42 = vector.multi_reduction <maximumf>, %41, %cst_17 [1] : vector<8x14x150xf32> to vector<8x150xf32>
    %c0_18 = arith.constant 0 : index
    %c0_19 = arith.constant 0 : index
    %43 = vector.load %arg7[%c0_18, %c0_19] : memref<128x150xbf16, #tpu.memory_space<vmem>>, vector<128x150xbf16>
    %c0_20 = arith.constant 0 : index
    %c0_21 = arith.constant 0 : index
    %44 = vector.load %arg8[%c0_20, %c0_21] : memref<1x150xf32, #tpu.memory_space<vmem>>, vector<1x150xf32>
    %cst_22 = arith.constant 0.000000e+00 : f32
    %45 = vector.broadcast %cst_22 : f32 to vector<8x13x150xf32>
    %46 = vector.extract_strided_slice %43 {offsets = [0, 0], sizes = [32, 150], strides = [1, 1]} : vector<128x150xbf16> to vector<32x150xbf16>
    %cst_23 = arith.constant dense<0.000000e+00> : vector<128x150xf32>
    %47 = tpu.matmul %1, %46, %cst_23 {dimension_numbers = #tpu.dot_dimension_numbers<[1], [0], [0], [1], [0, 0, 1, 1], [], []>} : vector<128x32xbf16>, vector<32x150xbf16>, vector<128x150xf32> -> vector<128x150xf32>
    %48 = vector.shape_cast %47 : vector<128x150xf32> to vector<8x16x150xf32>
    %49 = vector.extract_strided_slice %48 {offsets = [0, 0, 0], sizes = [8, 13, 150], strides = [1, 1, 1]} : vector<8x16x150xf32> to vector<8x13x150xf32>
    %50 = arith.addf %45, %49 : vector<8x13x150xf32>
    %51 = vector.extract_strided_slice %43 {offsets = [32, 0], sizes = [32, 150], strides = [1, 1]} : vector<128x150xbf16> to vector<32x150xbf16>
    %cst_24 = arith.constant dense<0.000000e+00> : vector<128x150xf32>
    %52 = tpu.matmul %1, %51, %cst_24 {dimension_numbers = #tpu.dot_dimension_numbers<[1], [0], [0], [1], [0, 0, 1, 1], [], []>} : vector<128x32xbf16>, vector<32x150xbf16>, vector<128x150xf32> -> vector<128x150xf32>
    %53 = vector.shape_cast %52 : vector<128x150xf32> to vector<8x16x150xf32>
    %54 = vector.extract_strided_slice %53 {offsets = [0, 1, 0], sizes = [8, 13, 150], strides = [1, 1, 1]} : vector<8x16x150xf32> to vector<8x13x150xf32>
    %55 = arith.addf %50, %54 : vector<8x13x150xf32>
    %56 = vector.extract_strided_slice %43 {offsets = [64, 0], sizes = [32, 150], strides = [1, 1]} : vector<128x150xbf16> to vector<32x150xbf16>
    %cst_25 = arith.constant dense<0.000000e+00> : vector<128x150xf32>
    %57 = tpu.matmul %1, %56, %cst_25 {dimension_numbers = #tpu.dot_dimension_numbers<[1], [0], [0], [1], [0, 0, 1, 1], [], []>} : vector<128x32xbf16>, vector<32x150xbf16>, vector<128x150xf32> -> vector<128x150xf32>
    %58 = vector.shape_cast %57 : vector<128x150xf32> to vector<8x16x150xf32>
    %59 = vector.extract_strided_slice %58 {offsets = [0, 2, 0], sizes = [8, 13, 150], strides = [1, 1, 1]} : vector<8x16x150xf32> to vector<8x13x150xf32>
    %60 = arith.addf %55, %59 : vector<8x13x150xf32>
    %61 = vector.extract_strided_slice %43 {offsets = [96, 0], sizes = [32, 150], strides = [1, 1]} : vector<128x150xbf16> to vector<32x150xbf16>
    %cst_26 = arith.constant dense<0.000000e+00> : vector<128x150xf32>
    %62 = tpu.matmul %1, %61, %cst_26 {dimension_numbers = #tpu.dot_dimension_numbers<[1], [0], [0], [1], [0, 0, 1, 1], [], []>} : vector<128x32xbf16>, vector<32x150xbf16>, vector<128x150xf32> -> vector<128x150xf32>
    %63 = vector.shape_cast %62 : vector<128x150xf32> to vector<8x16x150xf32>
    %64 = vector.extract_strided_slice %63 {offsets = [0, 3, 0], sizes = [8, 13, 150], strides = [1, 1, 1]} : vector<8x16x150xf32> to vector<8x13x150xf32>
    %65 = arith.addf %60, %64 : vector<8x13x150xf32>
    %66 = vector.shape_cast %44 : vector<1x150xf32> to vector<1x1x150xf32>
    %67 = vector.broadcast %66 : vector<1x1x150xf32> to vector<8x13x150xf32>
    %68 = arith.addf %65, %67 : vector<8x13x150xf32>
    %69 = math.tanh %68 : vector<8x13x150xf32>
    %cst_27 = arith.constant dense<0xFF800000> : vector<8x150xf32>
    %70 = vector.multi_reduction <maximumf>, %69, %cst_27 [1] : vector<8x13x150xf32> to vector<8x150xf32>
    %c0_28 = arith.constant 0 : index
    %c0_29 = arith.constant 0 : index
    %71 = vector.load %arg9[%c0_28, %c0_29] : memref<160x150xbf16, #tpu.memory_space<vmem>>, vector<160x150xbf16>
    %c0_30 = arith.constant 0 : index
    %c0_31 = arith.constant 0 : index
    %72 = vector.load %arg10[%c0_30, %c0_31] : memref<1x150xf32, #tpu.memory_space<vmem>>, vector<1x150xf32>
    %cst_32 = arith.constant 0.000000e+00 : f32
    %73 = vector.broadcast %cst_32 : f32 to vector<8x12x150xf32>
    %74 = vector.extract_strided_slice %71 {offsets = [0, 0], sizes = [32, 150], strides = [1, 1]} : vector<160x150xbf16> to vector<32x150xbf16>
    %cst_33 = arith.constant dense<0.000000e+00> : vector<128x150xf32>
    %75 = tpu.matmul %1, %74, %cst_33 {dimension_numbers = #tpu.dot_dimension_numbers<[1], [0], [0], [1], [0, 0, 1, 1], [], []>} : vector<128x32xbf16>, vector<32x150xbf16>, vector<128x150xf32> -> vector<128x150xf32>
    %76 = vector.shape_cast %75 : vector<128x150xf32> to vector<8x16x150xf32>
    %77 = vector.extract_strided_slice %76 {offsets = [0, 0, 0], sizes = [8, 12, 150], strides = [1, 1, 1]} : vector<8x16x150xf32> to vector<8x12x150xf32>
    %78 = arith.addf %73, %77 : vector<8x12x150xf32>
    %79 = vector.extract_strided_slice %71 {offsets = [32, 0], sizes = [32, 150], strides = [1, 1]} : vector<160x150xbf16> to vector<32x150xbf16>
    %cst_34 = arith.constant dense<0.000000e+00> : vector<128x150xf32>
    %80 = tpu.matmul %1, %79, %cst_34 {dimension_numbers = #tpu.dot_dimension_numbers<[1], [0], [0], [1], [0, 0, 1, 1], [], []>} : vector<128x32xbf16>, vector<32x150xbf16>, vector<128x150xf32> -> vector<128x150xf32>
    %81 = vector.shape_cast %80 : vector<128x150xf32> to vector<8x16x150xf32>
    %82 = vector.extract_strided_slice %81 {offsets = [0, 1, 0], sizes = [8, 12, 150], strides = [1, 1, 1]} : vector<8x16x150xf32> to vector<8x12x150xf32>
    %83 = arith.addf %78, %82 : vector<8x12x150xf32>
    %84 = vector.extract_strided_slice %71 {offsets = [64, 0], sizes = [32, 150], strides = [1, 1]} : vector<160x150xbf16> to vector<32x150xbf16>
    %cst_35 = arith.constant dense<0.000000e+00> : vector<128x150xf32>
    %85 = tpu.matmul %1, %84, %cst_35 {dimension_numbers = #tpu.dot_dimension_numbers<[1], [0], [0], [1], [0, 0, 1, 1], [], []>} : vector<128x32xbf16>, vector<32x150xbf16>, vector<128x150xf32> -> vector<128x150xf32>
    %86 = vector.shape_cast %85 : vector<128x150xf32> to vector<8x16x150xf32>
    %87 = vector.extract_strided_slice %86 {offsets = [0, 2, 0], sizes = [8, 12, 150], strides = [1, 1, 1]} : vector<8x16x150xf32> to vector<8x12x150xf32>
    %88 = arith.addf %83, %87 : vector<8x12x150xf32>
    %89 = vector.extract_strided_slice %71 {offsets = [96, 0], sizes = [32, 150], strides = [1, 1]} : vector<160x150xbf16> to vector<32x150xbf16>
    %cst_36 = arith.constant dense<0.000000e+00> : vector<128x150xf32>
    %90 = tpu.matmul %1, %89, %cst_36 {dimension_numbers = #tpu.dot_dimension_numbers<[1], [0], [0], [1], [0, 0, 1, 1], [], []>} : vector<128x32xbf16>, vector<32x150xbf16>, vector<128x150xf32> -> vector<128x150xf32>
    %91 = vector.shape_cast %90 : vector<128x150xf32> to vector<8x16x150xf32>
    %92 = vector.extract_strided_slice %91 {offsets = [0, 3, 0], sizes = [8, 12, 150], strides = [1, 1, 1]} : vector<8x16x150xf32> to vector<8x12x150xf32>
    %93 = arith.addf %88, %92 : vector<8x12x150xf32>
    %94 = vector.extract_strided_slice %71 {offsets = [128, 0], sizes = [32, 150], strides = [1, 1]} : vector<160x150xbf16> to vector<32x150xbf16>
    %cst_37 = arith.constant dense<0.000000e+00> : vector<128x150xf32>
    %95 = tpu.matmul %1, %94, %cst_37 {dimension_numbers = #tpu.dot_dimension_numbers<[1], [0], [0], [1], [0, 0, 1, 1], [], []>} : vector<128x32xbf16>, vector<32x150xbf16>, vector<128x150xf32> -> vector<128x150xf32>
    %96 = vector.shape_cast %95 : vector<128x150xf32> to vector<8x16x150xf32>
    %97 = vector.extract_strided_slice %96 {offsets = [0, 4, 0], sizes = [8, 12, 150], strides = [1, 1, 1]} : vector<8x16x150xf32> to vector<8x12x150xf32>
    %98 = arith.addf %93, %97 : vector<8x12x150xf32>
    %99 = vector.shape_cast %72 : vector<1x150xf32> to vector<1x1x150xf32>
    %100 = vector.broadcast %99 : vector<1x1x150xf32> to vector<8x12x150xf32>
    %101 = arith.addf %98, %100 : vector<8x12x150xf32>
    %102 = math.tanh %101 : vector<8x12x150xf32>
    %cst_38 = arith.constant dense<0xFF800000> : vector<8x150xf32>
    %103 = vector.multi_reduction <maximumf>, %102, %cst_38 [1] : vector<8x12x150xf32> to vector<8x150xf32>
    %c0_39 = arith.constant 0 : index
    %c0_40 = arith.constant 0 : index
    %104 = vector.load %arg2[%c0_39, %c0_40] : memref<8x160xf32, #tpu.memory_space<vmem>>, vector<8x160xf32>
    %105 = tpu.concatenate %19, %42, %70, %103, %104 in 1 : vector<8x150xf32>, vector<8x150xf32>, vector<8x150xf32>, vector<8x150xf32>, vector<8x160xf32> -> vector<8x760xf32>
    %c0_41 = arith.constant 0 : index
    %c0_42 = arith.constant 0 : index
    %106 = vector.load %arg11[%c0_41, %c0_42] : memref<760x32xf32, #tpu.memory_space<vmem>>, vector<760x32xf32>
    %cst_43 = arith.constant dense<0.000000e+00> : vector<8x32xf32>
    %107 = tpu.matmul %105, %106, %cst_43 {dimension_numbers = #tpu.dot_dimension_numbers<[1], [0], [0], [1], [0, 0, 1, 1], [], []>} : vector<8x760xf32>, vector<760x32xf32>, vector<8x32xf32> -> vector<8x32xf32>
    %c0_44 = arith.constant 0 : index
    %c0_45 = arith.constant 0 : index
    %108 = vector.load %arg12[%c0_44, %c0_45] : memref<1x32xf32, #tpu.memory_space<vmem>>, vector<1x32xf32>
    %109 = vector.broadcast %108 : vector<1x32xf32> to vector<8x32xf32>
    %110 = arith.addf %107, %109 : vector<8x32xf32>
    %c0_46 = arith.constant 0 : index
    %c0_47 = arith.constant 0 : index
    %111 = vector.load %arg13[%c0_46, %c0_47] : memref<32x32xf32, #tpu.memory_space<vmem>>, vector<32x32xf32>
    %cst_48 = arith.constant dense<0.000000e+00> : vector<8x32xf32>
    %112 = tpu.matmul %110, %111, %cst_48 {dimension_numbers = #tpu.dot_dimension_numbers<[1], [0], [0], [1], [0, 0, 1, 1], [], []>} : vector<8x32xf32>, vector<32x32xf32>, vector<8x32xf32> -> vector<8x32xf32>
    %c0_49 = arith.constant 0 : index
    %c0_50 = arith.constant 0 : index
    %113 = vector.load %arg14[%c0_49, %c0_50] : memref<1x32xf32, #tpu.memory_space<vmem>>, vector<1x32xf32>
    %114 = vector.broadcast %113 : vector<1x32xf32> to vector<8x32xf32>
    %115 = arith.addf %112, %114 : vector<8x32xf32>
    %c0_51 = arith.constant 0 : index
    %c0_52 = arith.constant 0 : index
    %116 = vector.load %arg15[%c0_51, %c0_52] : memref<8x32xf32, #tpu.memory_space<vmem>>, vector<8x32xf32>
    tpu.vector_store %arg15[%c0_51, %c0_52], %115 {strides = array<i32>} : memref<8x32xf32, #tpu.memory_space<vmem>>, vector<8x32xf32>,
    return
  }
  func.func @transform_0(%arg0: i32) -> (i32, i32, i32) {
    %c0_i32 = arith.constant 0 : i32
    %c0_i32_0 = arith.constant 0 : i32
    %c0_i32_1 = arith.constant 0 : i32
    return %arg0, %c0_i32, %c0_i32_0 : i32, i32, i32
  }
  func.func @transform_1(%arg0: i32) -> (i32, i32) {
    %c0_i32 = arith.constant 0 : i32
    %c0_i32_0 = arith.constant 0 : i32
    return %arg0, %c0_i32 : i32, i32
  }
  func.func @transform_2(%arg0: i32) -> (i32, i32) {
    %c0_i32 = arith.constant 0 : i32
    %c0_i32_0 = arith.constant 0 : i32
    %c0_i32_1 = arith.constant 0 : i32
    return %c0_i32, %c0_i32_0 : i32, i32
  }
  func.func @transform_3(%arg0: i32) -> (i32, i32) {
    %c0_i32 = arith.constant 0 : i32
    %c0_i32_0 = arith.constant 0 : i32
    %c0_i32_1 = arith.constant 0 : i32
    return %c0_i32, %c0_i32_0 : i32, i32
  }
  func.func @transform_4(%arg0: i32) -> (i32, i32) {
    %c0_i32 = arith.constant 0 : i32
    %c0_i32_0 = arith.constant 0 : i32
    %c0_i32_1 = arith.constant 0 : i32
    return %c0_i32, %c0_i32_0 : i32, i32
  }
  func.func @transform_5(%arg0: i32) -> (i32, i32) {
    %c0_i32 = arith.constant 0 : i32
    %c0_i32_0 = arith.constant 0 : i32
    %c0_i32_1 = arith.constant 0 : i32
    return %c0_i32, %c0_i32_0 : i32, i32
  }
  func.func @transform_6(%arg0: i32) -> (i32, i32) {
    %c0_i32 = arith.constant 0 : i32
    %c0_i32_0 = arith.constant 0 : i32
    %c0_i32_1 = arith.constant 0 : i32
    return %c0_i32, %c0_i32_0 : i32, i32
  }
  func.func @transform_7(%arg0: i32) -> (i32, i32) {
    %c0_i32 = arith.constant 0 : i32
    %c0_i32_0 = arith.constant 0 : i32
    %c0_i32_1 = arith.constant 0 : i32
    return %c0_i32, %c0_i32_0 : i32, i32
  }
  func.func @transform_8(%arg0: i32) -> (i32, i32) {
    %c0_i32 = arith.constant 0 : i32
    %c0_i32_0 = arith.constant 0 : i32
    %c0_i32_1 = arith.constant 0 : i32
    return %c0_i32, %c0_i32_0 : i32, i32
  }
  func.func @transform_9(%arg0: i32) -> (i32, i32) {
    %c0_i32 = arith.constant 0 : i32
    %c0_i32_0 = arith.constant 0 : i32
    %c0_i32_1 = arith.constant 0 : i32
    return %c0_i32, %c0_i32_0 : i32, i32
  }
  func.func @transform_10(%arg0: i32) -> (i32, i32) {
    %c0_i32 = arith.constant 0 : i32
    %c0_i32_0 = arith.constant 0 : i32
    %c0_i32_1 = arith.constant 0 : i32
    return %c0_i32, %c0_i32_0 : i32, i32
  }
  func.func @transform_11(%arg0: i32) -> (i32, i32) {
    %c0_i32 = arith.constant 0 : i32
    %c0_i32_0 = arith.constant 0 : i32
    %c0_i32_1 = arith.constant 0 : i32
    return %c0_i32, %c0_i32_0 : i32, i32
  }
  func.func @transform_12(%arg0: i32) -> (i32, i32) {
    %c0_i32 = arith.constant 0 : i32
    %c0_i32_0 = arith.constant 0 : i32
    %c0_i32_1 = arith.constant 0 : i32
    return %c0_i32, %c0_i32_0 : i32, i32
  }
  func.func @transform_13(%arg0: i32) -> (i32, i32) {
    %c0_i32 = arith.constant 0 : i32
    %c0_i32_0 = arith.constant 0 : i32
    %c0_i32_1 = arith.constant 0 : i32
    return %c0_i32, %c0_i32_0 : i32, i32
  }
  func.func @transform_14(%arg0: i32) -> (i32, i32) {
    %c0_i32 = arith.constant 0 : i32
    %c0_i32_0 = arith.constant 0 : i32
    return %arg0, %c0_i32 : i32, i32
  }
}

</mosaic_0001>

<bundles_post_ra>
// kernel: tpu_custom_call.1
= control target key start
LH: loop header
LB: loop body
LE: loop exit
PB: predicated region body
PF: predicated region fallthrough
CT: control target
= control target key end

     0   :  { %vm134_vm0 = vcmask 261120   ;;  %s7891_s0 = inlined_call_operand.vmem [shape: bf16[8,16,32], index: 0, kind: input, shape index: {}]   ;;  %s7892_s1 = inlined_call_operand.vmem [shape: f32[8,160], index: 1, kind: input, shape index: {}]   ;;  %s7893_s2 = inlined_call_operand.vmem [shape: bf16[64,150], index: 2, kind: input, shape index: {}]   ;;  %s7894_s3 = inlined_call_operand.vmem [shape: f32[1,150], index: 3, kind: input, shape index: {}]   ;;  %s7895_s4 = inlined_call_operand.vmem [shape: bf16[96,150], index: 4, kind: input, shape index: {}]   ;;  %s7896_s5 = inlined_call_operand.vmem [shape: f32[1,150], index: 5, kind: input, shape index: {}]   ;;  %s7897_s6 = inlined_call_operand.vmem [shape: bf16[128,150], index: 6, kind: input, shape index: {}]   ;;  %s7898_s7 = inlined_call_operand.vmem [shape: f32[1,150], index: 7, kind: input, shape index: {}]   ;;  %s7899_s8 = inlined_call_operand.vmem [shape: bf16[160,150], index: 8, kind: input, shape index: {}]   ;;  %s7900_s9 = inlined_call_operand.vmem [shape: f32[1,150], index: 9, kind: input, shape index: {}]   ;;  %s7901_s10 = inlined_call_operand.vmem [shape: f32[760,32], index: 10, kind: input, shape index: {}]   ;;  %s7902_s11 = inlined_call_operand.vmem [shape: f32[1,32], index: 11, kind: input, shape index: {}]   ;;  %s7903_s12 = inlined_call_operand.vmem [shape: f32[32,32], index: 12, kind: input, shape index: {}]   ;;  %s7904_s13 = inlined_call_operand.vmem [shape: f32[1,32], index: 13, kind: input, shape index: {}]   ;;  %s7905_s14 = inlined_call_operand.hbm [shape: f32[8,32], index: 14, kind: output, shape index: {}]  }
   0x1   :  { %v4718_v0 = vld [vmem:[%s7893_s2 + $0x10] sm:$0xf]  ;;  %v5169_v1 = vld [vmem:[%s7893_s2 + $0x14] sm:$0xf0]  ;;  %v5168_v2 = vld [vmem:[%s7893_s2 + $0x14] sm:$0xf] }
   0x2   :  { %v4719_v3 = vor.u32 %v5169_v1, %v4718_v0  ;;  %v4720_v4 = vld [vmem:[%s7893_s2 + $0x18] sm:$0xf0]  ;;  %v4750_v5 = vld [vmem:[%s7893_s2 + $0x30] sm:$0xf]  ;;  %v5173_v6 = vld [vmem:[%s7893_s2 + $0x34] sm:$0xf0] }
   0x3   :  { %v4723_v7 = vor.u32 %v5168_v2, %v4720_v4  ;;  %v4751_v8 = vor.u32 %v5173_v6, %v4750_v5  ;;  %v5172_v9 = vld [vmem:[%s7893_s2 + $0x34] sm:$0xf]  ;;  %v4752_v10 = vld [vmem:[%s7893_s2 + $0x38] sm:$0xf0]  ;;  %v4710_v11 = vld [vmem:[%s7893_s2] sm:$0xf] }
   0x4   :  { %165 = vmatpush.bf16.msra.mxu0 %v4719_v3  ;;  %v4755_v12 = vor.u32 %v5172_v9, %v4752_v10  ;;  %v5167_v13 = vld [vmem:[%s7893_s2 + $0x4] sm:$0xf0]  ;;  %v5166_v14 = vld [vmem:[%s7893_s2 + $0x4] sm:$0xf]  ;;  %v4712_v15 = vld [vmem:[%s7893_s2 + $0x8] sm:$0xf0] }
   0x5   :  { %214 = vmatpush.bf16.msra.mxu1 %v4723_v7  ;;  %315 = vmatpush.bf16.msra.mxu2 %v4751_v8  ;;  %v4711_v16 = vor.u32 %v5167_v13, %v4710_v11  ;;  %v4715_v17 = vor.u32 %v5166_v14, %v4712_v15  ;;  %v4742_v18 = vld [vmem:[%s7893_s2 + $0x20] sm:$0xf]  ;;  %v5171_v19 = vld [vmem:[%s7893_s2 + $0x24] sm:$0xf0]  ;;  %v5170_v20 = vld [vmem:[%s7893_s2 + $0x24] sm:$0xf] }
   0x6   :  { %364 = vmatpush.bf16.msra.mxu3 %v4755_v12  ;;  %v4743_v21 = vor.u32 %v5171_v19, %v4742_v18  ;;  %v4744_v22 = vld [vmem:[%s7893_s2 + $0x28] sm:$0xf0]  ;;  %v5676_v23 = vld [vmem:[%s7891_s0] sm:$0xff]  ;;  %v4814_v24 = vld [vmem:[%s7895_s4 + $0x30] sm:$0xf] }
   0x7   :  { %v4747_v25 = vor.u32 %v5170_v20, %v4744_v22  ;;  %v5181_v26 = vld [vmem:[%s7895_s4 + $0x34] sm:$0xf0]  ;;  %v4782_v27 = vld [vmem:[%s7895_s4 + $0x10] sm:$0xf]  ;;  %v5180_v30 = vld [vmem:[%s7895_s4 + $0x34] sm:$0xf] }
   0x8   :  { %v5177_v28 = vld [vmem:[%s7895_s4 + $0x14] sm:$0xf0]  ;;  %166 = vmatpush.bf16.msra.mxu0 %v4711_v16  ;;  %v4815_v29 = vor.u32 %v5181_v26, %v4814_v24  ;;  %v4816_v31 = vld [vmem:[%s7895_s4 + $0x38] sm:$0xf0]  ;;  %v5176_v32 = vld [vmem:[%s7895_s4 + $0x14] sm:$0xf] }
   0x9   :  { %215 = vmatpush.bf16.msra.mxu1 %v4715_v17  ;;  %316 = vmatpush.bf16.msra.mxu2 %v4743_v21  ;;  %v4783_v33 = vor.u32 %v5177_v28, %v4782_v27  ;;  %v4819_v34 = vor.u32 %v5180_v30, %v4816_v31  ;;  %v4784_v35 = vld [vmem:[%s7895_s4 + $0x18] sm:$0xf0] }
   0xa   :  { %365 = vmatpush.bf16.msra.mxu3 %v4747_v25  ;;  %v4787_v36 = vor.u32 %v5176_v32, %v4784_v35 }
   0xd   :  { %948 = vmatpush.bf16.msrb.mxu2 %v4815_v29 }
   0xe   :  { %19 = vsyncpa [#allocation3], 0  ;;  %4724 = vmatmul.msk.bf16.vlgmr.msra.gmra.mxu0 %vm134_vm0, %v5676_v23  ;;  %997 = vmatpush.bf16.msrb.mxu3 %v4819_v34  ;;  %v5713_v37 = vld [vmem:[%s7891_s0 + $0x8] sm:$0xff]  ;;  %v5726_v38 = vld [vmem:[%s7891_s0 + $0x10] sm:$0xff]  ;;  %vm439_vm1 = vcmask 1046528   ;;  %vm629_vm2 = vcmask 179200  }
   0xf   :  { %4732 = vmatmul.msk.bf16.vlgmr.msra.gmra.mxu1 %vm134_vm0, %v5676_v23  ;;  %4756 = vmatmul.msk.bf16.vlgmr.msra.gmra.mxu2 %vm134_vm0, %v5676_v23  ;;  %v4806_v39 = vld [vmem:[%s7895_s4 + $0x20] sm:$0xf]  ;;  %v5179_v40 = vld [vmem:[%s7895_s4 + $0x24] sm:$0xf0]  ;;  %v5178_v44 = vld [vmem:[%s7895_s4 + $0x24] sm:$0xf] }
  0x10   :  { %4764 = vmatmul.msk.bf16.vlgmr.msra.gmra.mxu3 %vm134_vm0, %v5676_v23  ;;  %798 = vmatpush.bf16.msrb.mxu0 %v4783_v33  ;;  %v4774_v41 = vld [vmem:[%s7895_s4] sm:$0xf]  ;;  %v4807_v42 = vor.u32 %v5179_v40, %v4806_v39  ;;  %v5175_v43 = vld [vmem:[%s7895_s4 + $0x4] sm:$0xf0]  ;;  %v4808_v45 = vld [vmem:[%s7895_s4 + $0x28] sm:$0xf0] }
  0x11   :  { %847 = vmatpush.bf16.msrb.mxu1 %v4787_v36  ;;  %v4775_v46 = vor.u32 %v5175_v43, %v4774_v41  ;;  %v4811_v47 = vor.u32 %v5178_v44, %v4808_v45  ;;  %v5174_v48 = vld [vmem:[%s7895_s4 + $0x4] sm:$0xf]  ;;  %v4776_v49 = vld [vmem:[%s7895_s4 + $0x8] sm:$0xf0]  ;;  %v5763_v51 = vld [vmem:[%s7891_s0 + $0x18] sm:$0xff]  ;;  %vm631_vm3 = vcmask 178176  }
  0x12   :  { %949 = vmatpush.bf16.msrb.mxu2 %v4807_v42  ;;  %v4779_v50 = vor.u32 %v5174_v48, %v4776_v49  ;;  %v5776_v52 = vld [vmem:[%s7891_s0 + $0x20] sm:$0xff]  ;;  %v5789_v53 = vld [vmem:[%s7891_s0 + $0x28] sm:$0xff]  ;;  %v5802_v54 = vld [vmem:[%s7891_s0 + $0x30] sm:$0xff]  ;;  %vm4257_vm4 = vcmask 1041409   ;;  %vm4259_vm5 = vcmask 1042434   ;;  %vm4261_vm6 = vcmask 1043459  }
  0x13   :  { %998 = vmatpush.bf16.msrb.mxu3 %v4811_v47  ;;  %v4878_v55 = vld [vmem:[%s7897_s6 + $0x10] sm:$0xf]  ;;  %v5189_v56 = vld [vmem:[%s7897_s6 + $0x14] sm:$0xf0]  ;;  %v5188_v60 = vld [vmem:[%s7897_s6 + $0x14] sm:$0xf] }
  0x14   :  { %799 = vmatpush.bf16.msrb.mxu0 %v4775_v46  ;;  %v4879_v57 = vor.u32 %v5189_v56, %v4878_v55  ;;  %v4846_v58 = vld [vmem:[%s7895_s4 + $0x50] sm:$0xf]  ;;  %v5185_v59 = vld [vmem:[%s7895_s4 + $0x54] sm:$0xf0]  ;;  %v4880_v62 = vld [vmem:[%s7897_s6 + $0x18] sm:$0xf0] }
  0x15   :  { %848 = vmatpush.bf16.msrb.mxu1 %v4779_v50  ;;  %v4847_v61 = vor.u32 %v5185_v59, %v4846_v58  ;;  %v4883_v63 = vor.u32 %v5188_v60, %v4880_v62  ;;  %v5833_v0 = vld [vmem:[%s7891_s0 + $0x38] sm:$0xff]  ;;  %v73_v7 = vld [vmem:[%s7894_s3] sm:$0x3]  ;;  %v5184_v8 = vld [vmem:[%s7895_s4 + $0x54] sm:$0xf]  ;;  %vm4263_vm7 = vcmask 1044484  }
  0x16   :  { %1696 = vmatpush.bf16.msra.mxu2 %v4879_v57  ;;  %v4848_v9 = vld [vmem:[%s7895_s4 + $0x58] sm:$0xf0]  ;;  %v5860_v15 = vperm.slane %v73_v7, 0  ;;  %v5862_v19 = vperm.slane %v73_v7, 1  ;;  %vm4265_vm8 = vcmask 1045509   ;;  %vm4267_vm9 = vcmask 1046534  }
  0x17   :  { %1745 = vmatpush.bf16.msra.mxu3 %v4883_v63  ;;  %v4851_v10 = vor.u32 %v5184_v8, %v4848_v9  ;;  %vm4269_vm10 = vcmask 1047559   ;;  %vm1334_vm11 = vcmask 1045504   ;;  %vm1525_vm12 = vcmask 177152   ;;  %s5545_s27 = smov 22   ;;  %s5546_s28 = smov 44  }
  0x18   :  { %1210 = vmatpush.bf16.msra.mxu0 %v4847_v61  ;;  %vm2494_vm13 = vcmask 1044480   ;;  %vm2685_vm14 = vcmask 176128   ;;  %vm4351_vm15 = vcmask 359424   ;;  %s5547_s16 = smov 88   ;;  %s5548_s22 = smov 66  }
  0x19   :  { %1259 = vmatpush.bf16.msra.mxu1 %v4851_v10  ;;  %s5549_s29 = smov [#allocation2]  }
  0x1e   :  { %4725 = vmatmul.msk.bf16.gmra.mxu0 %vm134_vm0, %v5713_v37 }
  0x1f   :  { %4733 = vmatmul.msk.bf16.gmra.mxu1 %vm134_vm0, %v5713_v37  ;;  %4757 = vmatmul.msk.bf16.gmra.mxu2 %vm134_vm0, %v5713_v37 }
  0x20   :  { %4765 = vmatmul.msk.bf16.gmra.mxu3 %vm134_vm0, %v5713_v37 }
  0x2e   :  { %4726 = vmatmul.msk.bf16.gmra.mxu0 %vm134_vm0, %v5726_v38 }
  0x2f   :  { %4734 = vmatmul.msk.bf16.gmra.mxu1 %vm134_vm0, %v5726_v38  ;;  %4758 = vmatmul.msk.bf16.gmra.mxu2 %vm134_vm0, %v5726_v38 }
  0x30   :  { %4766 = vmatmul.msk.bf16.gmra.mxu3 %vm134_vm0, %v5726_v38 }
  0x3e   :  { %4727 = vmatmul.msk.bf16.gmra.mxu0 %vm134_vm0, %v5763_v51 }
  0x3f   :  { %4735 = vmatmul.msk.bf16.gmra.mxu1 %vm134_vm0, %v5763_v51  ;;  %4759 = vmatmul.msk.bf16.gmra.mxu2 %vm134_vm0, %v5763_v51 }
  0x40   :  { %4767 = vmatmul.msk.bf16.gmra.mxu3 %vm134_vm0, %v5763_v51 }
  0x4e   :  { %4728 = vmatmul.msk.bf16.gmra.mxu0 %vm134_vm0, %v5776_v52 }
  0x4f   :  { %4736 = vmatmul.msk.bf16.gmra.mxu1 %vm134_vm0, %v5776_v52  ;;  %4760 = vmatmul.msk.bf16.gmra.mxu2 %vm134_vm0, %v5776_v52 }
  0x50   :  { %4768 = vmatmul.msk.bf16.gmra.mxu3 %vm134_vm0, %v5776_v52 }
  0x5e   :  { %4729 = vmatmul.msk.bf16.gmra.mxu0 %vm134_vm0, %v5789_v53 }
  0x5f   :  { %4737 = vmatmul.msk.bf16.gmra.mxu1 %vm134_vm0, %v5789_v53  ;;  %4761 = vmatmul.msk.bf16.gmra.mxu2 %vm134_vm0, %v5789_v53 }
  0x60   :  { %4769 = vmatmul.msk.bf16.gmra.mxu3 %vm134_vm0, %v5789_v53 }
  0x6e   :  { %4730 = vmatmul.msk.bf16.gmra.mxu0 %vm134_vm0, %v5802_v54 }
  0x6f   :  { %4738 = vmatmul.msk.bf16.gmra.mxu1 %vm134_vm0, %v5802_v54  ;;  %4762 = vmatmul.msk.bf16.gmra.mxu2 %vm134_vm0, %v5802_v54 }
  0x70   :  { %4770 = vmatmul.msk.bf16.gmra.mxu3 %vm134_vm0, %v5802_v54 }
  0x7e   :  { %4731 = vmatmul.msk.bf16.gmra.mxu0 %vm134_vm0, %v5833_v0 }
  0x7f   :  { %4739 = vmatmul.msk.bf16.gmra.mxu1 %vm134_vm0, %v5833_v0  ;;  %4763 = vmatmul.msk.bf16.gmra.mxu2 %vm134_vm0, %v5833_v0 }
  0x80   :  { %4771 = vmatmul.msk.bf16.gmra.mxu3 %vm134_vm0, %v5833_v0 }
  0x8b   :  { %v168_v1 = vpop.f32.mrf.mxu0 }
  0x8c   :  { %v217_v2 = vpop.f32.mrf.mxu1 }
  0x8e   :  { %4788 = vmatmul.msk.bf16.vlgmr.msrb.gmra.mxu0 %vm134_vm0, %v5676_v23 }
  0x8f   :  { %4796 = vmatmul.msk.bf16.vlgmr.msrb.gmra.mxu1 %vm134_vm0, %v5676_v23  ;;  %4820 = vmatmul.msk.bf16.vlgmr.msrb.gmra.mxu2 %vm134_vm0, %v5676_v23 }
  0x90   :  { %4828 = vmatmul.msk.bf16.vlgmr.msrb.gmra.mxu3 %vm134_vm0, %v5676_v23 }
  0x92   :  { %v318_v3 = vpop.f32.mrf.mxu2 }
  0x93   :  { %v367_v4 = vpop.f32.mrf.mxu3  ;;  %v170_v5 = vpop.f32.mrf.mxu0  ;;  %v440_v13 = vrot.slane %v318_v3, 1 }
  0x94   :  { %v219_v6 = vpop.f32.mrf.mxu1  ;;  %v443_v11 = vrot.slane %v367_v4, 1 }
  0x9a   :  { %v320_v12 = vpop.f32.mrf.mxu2 }
  0x9b   :  { %v441_v14 = vrot.slane %v320_v12, 1  ;;  %v369_v16 = vpop.f32.mrf.mxu3  ;;  %v173_v17 = vpop.f32.mrf.mxu0 }
  0x9c   :  { %v444_v18 = vrot.slane %v369_v16, 1  ;;  %v222_v20 = vpop.f32.mrf.mxu1 }
  0x9d   :  { %v442_v21 = vsel %vm439_vm1, %v440_v13, %v441_v14  ;;  %v522_v22 = vadd.f32 %v441_v14, %v170_v5 }
  0x9e   :  { %v520_v23 = vadd.f32 %v442_v21, %v168_v1  ;;  %v445_v24 = vsel %vm439_vm1, %v443_v11, %v444_v18  ;;  %v523_v25 = vadd.f32 %v444_v18, %v219_v6  ;;  %4789 = vmatmul.msk.bf16.gmra.mxu0 %vm134_vm0, %v5713_v37 }
  0x9f   :  { %v559_v26 = vadd.f32 %v5860_v15, %v522_v22  ;;  %v521_v27 = vadd.f32 %v445_v24, %v217_v2  ;;  %4797 = vmatmul.msk.bf16.gmra.mxu1 %vm134_vm0, %v5713_v37  ;;  %4821 = vmatmul.msk.bf16.gmra.mxu2 %vm134_vm0, %v5713_v37 }
  0xa0   :  { %v557_v28 = vadd.f32 %v5860_v15, %v520_v23  ;;  %v560_v29 = vadd.f32 %v5862_v19, %v523_v25  ;;  %4829 = vmatmul.msk.bf16.gmra.mxu3 %vm134_vm0, %v5713_v37 }
  0xa1   :  { %5239 = vtanh.f32 %v559_v26  ;;  %v558_v30 = vadd.f32 %v5862_v19, %v521_v27 }
  0xa2   :  { %5241 = vtanh.f32 %v557_v28  ;;  %v323_v31 = vpop.f32.mrf.mxu2 }
  0xa3   :  { %5243 = vtanh.f32 %v558_v30  ;;  %v372_v32 = vpop.f32.mrf.mxu3  ;;  %v175_v33 = vpop.f32.mrf.mxu0  ;;  %v446_v46 = vrot.slane %v323_v31, 1 }
  0xa4   :  { %5245 = vtanh.f32 %v560_v29  ;;  %v224_v34 = vpop.f32.mrf.mxu1  ;;  %v449_v43 = vrot.slane %v372_v32, 1 }
  0xa7   :  { %v5240_v35 = vpop.eup %5239 }
  0xa8   :  { %v5242_v36 = vpop.eup %5241  ;;  %v621_v39 = vsel %vm439_vm1, %v5240_v35, -inf }
  0xa9   :  { %v5244_v40 = vpop.eup %5243  ;;  %v622_v41 = vmax.f32 %v5242_v36, %v621_v39 }
  0xaa   :  { %v5246_v42 = vpop.eup %5245  ;;  %v630_v37 = vsel %vm629_vm2, %v5244_v40, -inf  ;;  %v325_v44 = vpop.f32.mrf.mxu2 }
  0xab   :  { %v632_v45 = vsel %vm631_vm3, %v5246_v42, -inf  ;;  %v447_v47 = vrot.slane %v325_v44, 1  ;;  %v374_v48 = vpop.f32.mrf.mxu3  ;;  %v178_v49 = vpop.f32.mrf.mxu0  ;;  %v623_v3 = vrot.slane %v622_v41, 4 }
  0xac   :  { %v633_v50 = vmax.f32 %v630_v37, %v632_v45  ;;  %v450_v55 = vrot.slane %v374_v48, 1  ;;  %v227_v56 = vpop.f32.mrf.mxu1 }
  0xad   :  { %v448_v57 = vsel %vm439_vm1, %v446_v46, %v447_v47  ;;  %v526_v58 = vadd.f32 %v447_v47, %v175_v33  ;;  %v624_v10 = vmax.f32 %v622_v41, %v623_v3 }
  0xae   :  { %v524_v59 = vadd.f32 %v448_v57, %v173_v17  ;;  %v451_v60 = vsel %vm439_vm1, %v449_v43, %v450_v55  ;;  %v527_v61 = vadd.f32 %v450_v55, %v224_v34  ;;  %4790 = vmatmul.msk.bf16.gmra.mxu0 %vm134_vm0, %v5726_v38  ;;  %v634_v8 = vrot.slane %v633_v50, 4 }
  0xaf   :  { %v563_v62 = vadd.f32 %v5860_v15, %v526_v58  ;;  %v525_v63 = vadd.f32 %v451_v60, %v222_v20  ;;  %4798 = vmatmul.msk.bf16.gmra.mxu1 %vm134_vm0, %v5726_v38  ;;  %4822 = vmatmul.msk.bf16.gmra.mxu2 %vm134_vm0, %v5726_v38 }
  0xb0   :  { %v561_v1 = vadd.f32 %v5860_v15, %v524_v59  ;;  %v564_v2 = vadd.f32 %v5862_v19, %v527_v61  ;;  %4830 = vmatmul.msk.bf16.gmra.mxu3 %vm134_vm0, %v5726_v38  ;;  %v635_v13 = vmax.f32 %v633_v50, %v634_v8  ;;  %v625_v38 = vrot.slane %v624_v10, 2 }
  0xb1   :  { %5247 = vtanh.f32 %v563_v62  ;;  %v562_v4 = vadd.f32 %v5862_v19, %v525_v63 }
  0xb2   :  { %5249 = vtanh.f32 %v561_v1  ;;  %v328_v5 = vpop.f32.mrf.mxu2  ;;  %v636_v29 = vrot.slane %v635_v13, 2  ;;  %v626_v33 = vmax.f32 %v624_v10, %v625_v38  ;;  %v4870_v10 = vld [vmem:[%s7897_s6] sm:$0xf]  ;;  %v5183_v38 = vld [vmem:[%s7895_s4 + $0x44] sm:$0xf0] }
  0xb3   :  { %5251 = vtanh.f32 %v562_v4  ;;  %v377_v6 = vpop.f32.mrf.mxu3  ;;  %v180_v7 = vpop.f32.mrf.mxu0  ;;  %v452_v25 = vrot.slane %v328_v5, 1 }
  0xb4   :  { %5253 = vtanh.f32 %v564_v2  ;;  %v229_v9 = vpop.f32.mrf.mxu1  ;;  %v455_v21 = vrot.slane %v377_v6, 1  ;;  %v637_v45 = vmax.f32 %v635_v13, %v636_v29 }
  0xb6   :  { %v638_v61 = vrot.slane %v637_v45, 1 }
  0xb7   :  { %v5248_v11 = vpop.eup %5247 }
  0xb8   :  { %v5250_v12 = vpop.eup %5249  ;;  %v640_v14 = vsel %vm439_vm1, %v5248_v11, -inf  ;;  %v639_v6 = vmax.f32 %v637_v45, %v638_v61  ;;  %v5187_v11 = vld [vmem:[%s7897_s6 + $0x4] sm:$0xf0] }
  0xb9   :  { %v5252_v16 = vpop.eup %5251  ;;  %v641_v17 = vmax.f32 %v5250_v12, %v640_v14  ;;  %v4871_v14 = vor.u32 %v5187_v11, %v4870_v10 }
  0xba   :  { %v5254_v18 = vpop.eup %5253  ;;  %v648_v20 = vsel %vm629_vm2, %v5252_v16, -inf  ;;  %v330_v22 = vpop.f32.mrf.mxu2  ;;  %v4838_v16 = vld [vmem:[%s7895_s4 + $0x40] sm:$0xf] }
  0xbb   :  { %v642_v23 = vrot.slane %v641_v17, 4  ;;  %v649_v24 = vsel %vm631_vm3, %v5254_v18, -inf  ;;  %v453_v26 = vrot.slane %v330_v22, 1  ;;  %v379_v27 = vpop.f32.mrf.mxu3  ;;  %v5898_v28 = vpop.f32.mrf.mxu0  ;;  %1697 = vmatpush.bf16.msra.mxu2 %v4871_v14 }
  0xbc   :  { %v650_v30 = vmax.f32 %v648_v20, %v649_v24  ;;  %v456_v31 = vrot.slane %v379_v27, 1  ;;  %v5900_v32 = vpop.f32.mrf.mxu1  ;;  %v4872_v24 = vld [vmem:[%s7897_s6 + $0x8] sm:$0xf0] }
  0xbd   :  { %v643_v34 = vmax.f32 %v641_v17, %v642_v23  ;;  %v454_v35 = vsel %vm439_vm1, %v452_v25, %v453_v26  ;;  %v530_v36 = vadd.f32 %v453_v26, %v180_v7  ;;  %v5186_v17 = vld [vmem:[%s7897_s6 + $0x4] sm:$0xf]  ;;  %v4839_v23 = vor.u32 %v5183_v38, %v4838_v16 }
  0xbe   :  { %v651_v39 = vrot.slane %v650_v30, 4  ;;  %v528_v40 = vadd.f32 %v454_v35, %v178_v49  ;;  %v457_v41 = vsel %vm439_vm1, %v455_v21, %v456_v31  ;;  %v531_v42 = vadd.f32 %v456_v31, %v229_v9  ;;  %4791 = vmatmul.msk.bf16.gmra.mxu0 %vm134_vm0, %v5763_v51 }
  0xbf   :  { %v644_v37 = vrot.slane %v643_v34, 2  ;;  %v567_v43 = vadd.f32 %v5860_v15, %v530_v36  ;;  %v529_v44 = vadd.f32 %v457_v41, %v227_v56  ;;  %4799 = vmatmul.msk.bf16.gmra.mxu1 %vm134_vm0, %v5763_v51  ;;  %4823 = vmatmul.msk.bf16.gmra.mxu2 %vm134_vm0, %v5763_v51  ;;  %v627_v49 = vrot.slane %v626_v33, 1 }
  0xc0   :  { %v652_v46 = vmax.f32 %v650_v30, %v651_v39  ;;  %v565_v47 = vadd.f32 %v5860_v15, %v528_v40  ;;  %v568_v48 = vadd.f32 %v5862_v19, %v531_v42  ;;  %4831 = vmatmul.msk.bf16.gmra.mxu3 %vm134_vm0, %v5763_v51  ;;  %1211 = vmatpush.bf16.msra.mxu0 %v4839_v23 }
  0xc1   :  { %v645_v50 = vmax.f32 %v643_v34, %v644_v37  ;;  %5255 = vtanh.f32 %v567_v43  ;;  %v566_v55 = vadd.f32 %v5862_v19, %v529_v44  ;;  %v628_v1 = vmax.f32 %v626_v33, %v627_v49 }
  0xc2   :  { %v653_v56 = vrot.slane %v652_v46, 2  ;;  %5257 = vtanh.f32 %v565_v47  ;;  %v333_v57 = vpop.f32.mrf.mxu2  ;;  %v4875_v33 = vor.u32 %v5186_v17, %v4872_v24 }
  0xc3   :  { %v646_v58 = vrot.slane %v645_v50, 1  ;;  %5259 = vtanh.f32 %v566_v55  ;;  %v382_v59 = vpop.f32.mrf.mxu3  ;;  %v185_v60 = vpop.f32.mrf.mxu0  ;;  %v458_v9 = vrot.slane %v333_v57, 1 }
  0xc4   :  { %v654_v62 = vmax.f32 %v652_v46, %v653_v56  ;;  %5261 = vtanh.f32 %v568_v48  ;;  %v234_v63 = vpop.f32.mrf.mxu1  ;;  %v461_v21 = vrot.slane %v382_v59, 1  ;;  %1746 = vmatpush.bf16.msra.mxu3 %v4875_v33 }
  0xc5   :  { %v647_v2 = vmax.f32 %v645_v50, %v646_v58 }
  0xc6   :  { %v655_v51 = vrot.slane %v654_v62, 1 }
  0xc7   :  { %v5256_v3 = vpop.eup %5255  ;;  %v5917_v4 = vsel %vm4257_vm4, %v647_v2, %v628_v1  ;;  %v4840_v1 = vld [vmem:[%s7895_s4 + $0x48] sm:$0xf0] }
  0xc8   :  { %v5258_v5 = vpop.eup %5257  ;;  %v656_v7 = vmax.f32 %v654_v62, %v655_v51  ;;  %v657_v8 = vsel %vm439_vm1, %v5256_v3, -inf }
  0xc9   :  { %v5260_v12 = vpop.eup %5259  ;;  %v658_v13 = vmax.f32 %v5258_v5, %v657_v8 }
  0xca   :  { %v5262_v18 = vpop.eup %5261  ;;  %v665_v20 = vsel %vm629_vm2, %v5260_v12, -inf  ;;  %v335_v22 = vpop.f32.mrf.mxu2  ;;  %v4271_v25 = vsel %vm4257_vm4, %v656_v7, %v639_v6 }
  0xcb   :  { %v659_v26 = vrot.slane %v658_v13, 4  ;;  %v666_v27 = vsel %vm631_vm3, %v5262_v18, -inf  ;;  %v459_v29 = vrot.slane %v335_v22, 1  ;;  %v384_v30 = vpop.f32.mrf.mxu3  ;;  %v5941_v31 = vpop.f32.mrf.mxu0 }
  0xcc   :  { %v667_v34 = vmax.f32 %v665_v20, %v666_v27  ;;  %v462_v35 = vrot.slane %v384_v30, 1  ;;  %v5943_v36 = vpop.f32.mrf.mxu1 }
  0xcd   :  { %v660_v39 = vmax.f32 %v658_v13, %v659_v26  ;;  %v460_v40 = vsel %vm439_vm1, %v458_v9, %v459_v29  ;;  %v534_v41 = vadd.f32 %v459_v29, %v185_v60 }
  0xce   :  { %v668_v42 = vrot.slane %v667_v34, 4  ;;  %v532_v37 = vadd.f32 %v460_v40, %v5898_v28  ;;  %v463_v43 = vsel %vm439_vm1, %v461_v21, %v462_v35  ;;  %v535_v44 = vadd.f32 %v462_v35, %v234_v63  ;;  %4792 = vmatmul.msk.bf16.gmra.mxu0 %vm134_vm0, %v5776_v52 }
  0xcf   :  { %v661_v45 = vrot.slane %v660_v39, 2  ;;  %v571_v46 = vadd.f32 %v5860_v15, %v534_v41  ;;  %v533_v47 = vadd.f32 %v463_v43, %v5900_v32  ;;  %4800 = vmatmul.msk.bf16.gmra.mxu1 %vm134_vm0, %v5776_v52  ;;  %4824 = vmatmul.msk.bf16.gmra.mxu2 %vm134_vm0, %v5776_v52 }
  0xd0   :  { %v669_v48 = vmax.f32 %v667_v34, %v668_v42  ;;  %v569_v28 = vadd.f32 %v5860_v15, %v532_v37  ;;  %v572_v49 = vadd.f32 %v5862_v19, %v535_v44  ;;  %4832 = vmatmul.msk.bf16.gmra.mxu3 %vm134_vm0, %v5776_v52  ;;  %v5182_v52 = vld [vmem:[%s7895_s4 + $0x44] sm:$0xf] }
  0xd1   :  { %v662_v50 = vmax.f32 %v660_v39, %v661_v45  ;;  %5263 = vtanh.f32 %v571_v46  ;;  %v570_v55 = vadd.f32 %v5862_v19, %v533_v47  ;;  %v4843_v51 = vor.u32 %v5182_v52, %v4840_v1 }
  0xd2   :  { %v670_v56 = vrot.slane %v669_v48, 2  ;;  %5265 = vtanh.f32 %v569_v28  ;;  %v338_v32 = vpop.f32.mrf.mxu2 }
  0xd3   :  { %v663_v57 = vrot.slane %v662_v50, 1  ;;  %5267 = vtanh.f32 %v570_v55  ;;  %v387_v58 = vpop.f32.mrf.mxu3  ;;  %v190_v59 = vpop.f32.mrf.mxu0  ;;  %1260 = vmatpush.bf16.msra.mxu1 %v4843_v51  ;;  %v464_v17 = vrot.slane %v338_v32, 1 }
  0xd4   :  { %v671_v60 = vmax.f32 %v669_v48, %v670_v56  ;;  %5269 = vtanh.f32 %v572_v49  ;;  %v239_v61 = vpop.f32.mrf.mxu1  ;;  %v467_v12 = vrot.slane %v387_v58, 1 }
  0xd5   :  { %v664_v62 = vmax.f32 %v662_v50, %v663_v57 }
  0xd6   :  { %v672_v63 = vrot.slane %v671_v60, 1 }
  0xd7   :  { %v5264_v2 = vpop.eup %5263  ;;  %v4260_v3 = vsel %vm4259_vm5, %v664_v62, %v5917_v4 }
  0xd8   :  { %v5266_v5 = vpop.eup %5265  ;;  %v673_v6 = vmax.f32 %v671_v60, %v672_v63  ;;  %v674_v7 = vsel %vm439_vm1, %v5264_v2, -inf }
  0xd9   :  { %v5268_v8 = vpop.eup %5267  ;;  %v675_v9 = vmax.f32 %v5266_v5, %v674_v7 }
  0xda   :  { %v5270_v10 = vpop.eup %5269  ;;  %v682_v11 = vsel %vm629_vm2, %v5268_v8, -inf  ;;  %v340_v13 = vpop.f32.mrf.mxu2  ;;  %v4272_v14 = vsel %vm4259_vm5, %v673_v6, %v4271_v25 }
  0xdb   :  { %v676_v16 = vrot.slane %v675_v9, 4  ;;  %v683_v38 = vsel %vm631_vm3, %v5270_v10, -inf  ;;  %v465_v18 = vrot.slane %v340_v13, 1  ;;  %v389_v4 = vpop.f32.mrf.mxu3  ;;  %v193_v20 = vpop.f32.mrf.mxu0 }
  0xdc   :  { %v684_v21 = vmax.f32 %v682_v11, %v683_v38  ;;  %v468_v22 = vrot.slane %v389_v4, 1  ;;  %v5973_v23 = vpop.f32.mrf.mxu1 }
  0xdd   :  { %v677_v24 = vmax.f32 %v675_v9, %v676_v16  ;;  %v466_v26 = vsel %vm439_vm1, %v464_v17, %v465_v18  ;;  %v538_v27 = vadd.f32 %v465_v18, %v190_v59 }
  0xde   :  { %v685_v29 = vrot.slane %v684_v21, 4  ;;  %v536_v30 = vadd.f32 %v466_v26, %v5941_v31  ;;  %v469_v25 = vsel %vm439_vm1, %v467_v12, %v468_v22  ;;  %v539_v33 = vadd.f32 %v468_v22, %v239_v61  ;;  %4793 = vmatmul.msk.bf16.gmra.mxu0 %vm134_vm0, %v5789_v53 }
  0xdf   :  { %v678_v34 = vrot.slane %v677_v24, 2  ;;  %v575_v35 = vadd.f32 %v5860_v15, %v538_v27  ;;  %v537_v39 = vadd.f32 %v469_v25, %v5943_v36  ;;  %4801 = vmatmul.msk.bf16.gmra.mxu1 %vm134_vm0, %v5789_v53  ;;  %4825 = vmatmul.msk.bf16.gmra.mxu2 %vm134_vm0, %v5789_v53 }
  0xe0   :  { %v686_v40 = vmax.f32 %v684_v21, %v685_v29  ;;  %v573_v31 = vadd.f32 %v5860_v15, %v536_v30  ;;  %v576_v41 = vadd.f32 %v5862_v19, %v539_v33  ;;  %4833 = vmatmul.msk.bf16.gmra.mxu3 %vm134_vm0, %v5789_v53 }
  0xe1   :  { %v679_v42 = vmax.f32 %v677_v24, %v678_v34  ;;  %5271 = vtanh.f32 %v575_v35  ;;  %v574_v37 = vadd.f32 %v5862_v19, %v537_v39 }
  0xe2   :  { %v687_v43 = vrot.slane %v686_v40, 2  ;;  %5273 = vtanh.f32 %v573_v31  ;;  %v343_v36 = vpop.f32.mrf.mxu2 }
  0xe3   :  { %v680_v44 = vrot.slane %v679_v42, 1  ;;  %5275 = vtanh.f32 %v574_v37  ;;  %v392_v45 = vpop.f32.mrf.mxu3  ;;  %v195_v46 = vpop.f32.mrf.mxu0  ;;  %v470_v2 = vrot.slane %v343_v36, 1 }
  0xe4   :  { %v688_v47 = vmax.f32 %v686_v40, %v687_v43  ;;  %5277 = vtanh.f32 %v576_v41  ;;  %v244_v48 = vpop.f32.mrf.mxu1  ;;  %v473_v61 = vrot.slane %v392_v45, 1 }
  0xe5   :  { %v681_v28 = vmax.f32 %v679_v42, %v680_v44 }
  0xe6   :  { %v689_v49 = vrot.slane %v688_v47, 1 }
  0xe7   :  { %v5272_v50 = vpop.eup %5271  ;;  %v4262_v53 = vsel %vm4261_vm6, %v681_v28, %v4260_v3 }
  0xe8   :  { %v5274_v55 = vpop.eup %5273  ;;  %v690_v56 = vmax.f32 %v688_v47, %v689_v49  ;;  %v691_v32 = vsel %vm439_vm1, %v5272_v50, -inf }
  0xe9   :  { %v5276_v57 = vpop.eup %5275  ;;  %v692_v58 = vmax.f32 %v5274_v55, %v691_v32 }
  0xea   :  { %v5278_v59 = vpop.eup %5277  ;;  %v699_v60 = vsel %vm629_vm2, %v5276_v57, -inf  ;;  %v345_v62 = vpop.f32.mrf.mxu2  ;;  %v4273_v63 = vsel %vm4261_vm6, %v690_v56, %v4272_v14 }
  0xeb   :  { %v693_v52 = vrot.slane %v692_v58, 4  ;;  %v700_v1 = vsel %vm631_vm3, %v5278_v59, -inf  ;;  %v471_v51 = vrot.slane %v345_v62, 1  ;;  %v394_v5 = vpop.f32.mrf.mxu3  ;;  %v198_v3 = vpop.f32.mrf.mxu0 }
  0xec   :  { %v701_v6 = vmax.f32 %v699_v60, %v700_v1  ;;  %v474_v7 = vrot.slane %v394_v5, 1  ;;  %v5996_v8 = vpop.f32.mrf.mxu1 }
  0xed   :  { %v694_v9 = vmax.f32 %v692_v58, %v693_v52  ;;  %v472_v10 = vsel %vm439_vm1, %v470_v2, %v471_v51  ;;  %v542_v11 = vadd.f32 %v471_v51, %v195_v46 }
  0xee   :  { %v702_v12 = vrot.slane %v701_v6, 4  ;;  %v540_v13 = vadd.f32 %v472_v10, %v193_v20  ;;  %v475_v16 = vsel %vm439_vm1, %v473_v61, %v474_v7  ;;  %v543_v14 = vadd.f32 %v474_v7, %v244_v48  ;;  %4794 = vmatmul.msk.bf16.gmra.mxu0 %vm134_vm0, %v5802_v54  ;;  %v5197_v7 = vld [vmem:[%s7897_s6 + $0x54] sm:$0xf0] }
  0xef   :  { %v695_v38 = vrot.slane %v694_v9, 2  ;;  %v579_v17 = vadd.f32 %v5860_v15, %v542_v11  ;;  %v541_v18 = vadd.f32 %v475_v16, %v5973_v23  ;;  %4802 = vmatmul.msk.bf16.gmra.mxu1 %vm134_vm0, %v5802_v54  ;;  %4826 = vmatmul.msk.bf16.gmra.mxu2 %vm134_vm0, %v5802_v54  ;;  %v5196_v11 = vld [vmem:[%s7897_s6 + $0x54] sm:$0xf] }
  0xf0   :  { %v703_v4 = vmax.f32 %v701_v6, %v702_v12  ;;  %v577_v20 = vadd.f32 %v5860_v15, %v540_v13  ;;  %v580_v21 = vadd.f32 %v5862_v19, %v543_v14  ;;  %4834 = vmatmul.msk.bf16.gmra.mxu3 %vm134_vm0, %v5802_v54  ;;  %v4942_v6 = vld [vmem:[%s7897_s6 + $0x50] sm:$0xf]  ;;  %v4944_v12 = vld [vmem:[%s7897_s6 + $0x58] sm:$0xf0] }
  0xf1   :  { %v696_v22 = vmax.f32 %v694_v9, %v695_v38  ;;  %5279 = vtanh.f32 %v579_v17  ;;  %v578_v24 = vadd.f32 %v5862_v19, %v541_v18  ;;  %v4943_v10 = vor.u32 %v5197_v7, %v4942_v6  ;;  %v5192_v18 = vld [vmem:[%s7897_s6 + $0x34] sm:$0xf] }
  0xf2   :  { %v704_v26 = vrot.slane %v703_v4, 2  ;;  %5281 = vtanh.f32 %v577_v20  ;;  %v348_v23 = vpop.f32.mrf.mxu2  ;;  %v4947_v17 = vor.u32 %v5196_v11, %v4944_v12 }
  0xf3   :  { %5283 = vtanh.f32 %v578_v24  ;;  %v397_v27 = vpop.f32.mrf.mxu3  ;;  %v200_v29 = vpop.f32.mrf.mxu0  ;;  %v697_v30 = vrot.slane %v696_v22, 1  ;;  %v476_v28 = vrot.slane %v348_v23, 1  ;;  %2108 = vmatpush.bf16.msrb.mxu2 %v4943_v10 }
  0xf4   :  { %v705_v25 = vmax.f32 %v703_v4, %v704_v26  ;;  %5285 = vtanh.f32 %v580_v21  ;;  %v249_v33 = vpop.f32.mrf.mxu1  ;;  %v479_v44 = vrot.slane %v397_v27, 1  ;;  %v4912_v4 = vld [vmem:[%s7897_s6 + $0x38] sm:$0xf0]  ;;  %2157 = vmatpush.bf16.msrb.mxu3 %v4947_v17 }
  0xf5   :  { %v698_v34 = vmax.f32 %v696_v22, %v697_v30  ;;  %v4915_v22 = vor.u32 %v5192_v18, %v4912_v4 }
  0xf6   :  { %v706_v35 = vrot.slane %v705_v25, 1 }
  0xf7   :  { %v5280_v39 = vpop.eup %5279  ;;  %v6014_v54 = vsel %vm4263_vm7, %v698_v34, %v4262_v53  ;;  %1895 = vmatpush.bf16.msrb.mxu1 %v4915_v22 }
  0xf8   :  { %v5282_v40 = vpop.eup %5281  ;;  %v708_v31 = vsel %vm439_vm1, %v5280_v39, -inf  ;;  %v707_v41 = vmax.f32 %v705_v25, %v706_v35 }
  0xf9   :  { %v5284_v42 = vpop.eup %5283  ;;  %v709_v37 = vmax.f32 %v5282_v40, %v708_v31 }
  0xfa   :  { %v5286_v43 = vpop.eup %5285  ;;  %v716_v36 = vsel %vm629_vm2, %v5284_v42, -inf  ;;  %v350_v45 = vpop.f32.mrf.mxu2  ;;  %v6019_v46 = vsel %vm4263_vm7, %v707_v41, %v4273_v63 }
  0xfb   :  { %v710_v47 = vrot.slane %v709_v37, 4  ;;  %v717_v48 = vsel %vm631_vm3, %v5286_v43, -inf  ;;  %v477_v49 = vrot.slane %v350_v45, 1  ;;  %v399_v50 = vpop.f32.mrf.mxu3  ;;  %v6022_v53 = vpop.f32.mrf.mxu0 }
  0xfc   :  { %v718_v55 = vmax.f32 %v716_v36, %v717_v48  ;;  %v480_v56 = vrot.slane %v399_v50, 1  ;;  %v6024_v32 = vpop.f32.mrf.mxu1 }
  0xfd   :  { %v711_v57 = vmax.f32 %v709_v37, %v710_v47  ;;  %v478_v58 = vsel %vm439_vm1, %v476_v28, %v477_v49  ;;  %v546_v59 = vadd.f32 %v477_v49, %v200_v29 }
  0xfe   :  { %v719_v60 = vrot.slane %v718_v55, 4  ;;  %v544_v61 = vadd.f32 %v478_v58, %v198_v3  ;;  %v481_v62 = vsel %vm439_vm1, %v479_v44, %v480_v56  ;;  %v547_v63 = vadd.f32 %v480_v56, %v249_v33  ;;  %4795 = vmatmul.msk.bf16.gmra.mxu0 %vm134_vm0, %v5833_v0 }
  0xff   :  { %v712_v52 = vrot.slane %v711_v57, 2  ;;  %v583_v1 = vadd.f32 %v5860_v15, %v546_v59  ;;  %v545_v2 = vadd.f32 %v481_v62, %v5996_v8  ;;  %4803 = vmatmul.msk.bf16.gmra.mxu1 %vm134_vm0, %v5833_v0  ;;  %4827 = vmatmul.msk.bf16.gmra.mxu2 %vm134_vm0, %v5833_v0  ;;  %v4910_v8 = vld [vmem:[%s7897_s6 + $0x30] sm:$0xf] }
 0x100   :  { %v720_v51 = vmax.f32 %v718_v55, %v719_v60  ;;  %v581_v5 = vadd.f32 %v5860_v15, %v544_v61  ;;  %v584_v3 = vadd.f32 %v5862_v19, %v547_v63  ;;  %4835 = vmatmul.msk.bf16.gmra.mxu3 %vm134_vm0, %v5833_v0  ;;  %v5193_v0 = vld [vmem:[%s7897_s6 + $0x34] sm:$0xf0]  ;;  %v6082_v61 = vld [vmem:[%s7891_s0] sm:$0xff] }
 0x101   :  { %5287 = vtanh.f32 %v583_v1  ;;  %v582_v9 = vadd.f32 %v5862_v19, %v545_v2  ;;  %v713_v13 = vmax.f32 %v711_v57, %v712_v52  ;;  %v4911_v38 = vor.u32 %v5193_v0, %v4910_v8 }
 0x102   :  { %v721_v16 = vrot.slane %v720_v51, 2  ;;  %5289 = vtanh.f32 %v581_v5  ;;  %v353_v14 = vpop.f32.mrf.mxu2 }
 0x103   :  { %5291 = vtanh.f32 %v582_v9  ;;  %v402_v20 = vpop.f32.mrf.mxu3  ;;  %v205_v21 = vpop.f32.mrf.mxu0  ;;  %v714_v24 = vrot.slane %v713_v13, 1  ;;  %1846 = vmatpush.bf16.msrb.mxu0 %v4911_v38  ;;  %v482_v45 = vrot.slane %v353_v14, 1 }
 0x104   :  { %v722_v26 = vmax.f32 %v720_v51, %v721_v16  ;;  %5293 = vtanh.f32 %v584_v3  ;;  %v254_v23 = vpop.f32.mrf.mxu1  ;;  %v485_v42 = vrot.slane %v402_v20, 1 }
 0x105   :  { %v715_v27 = vmax.f32 %v713_v13, %v714_v24 }
 0x106   :  { %v723_v29 = vrot.slane %v722_v26, 1 }
 0x107   :  { %v5288_v30 = vpop.eup %5287  ;;  %v4266_v25 = vsel %vm4265_vm8, %v715_v27, %v6014_v54 }
 0x108   :  { %v5290_v33 = vpop.eup %5289  ;;  %v725_v34 = vsel %vm439_vm1, %v5288_v30, -inf  ;;  %v724_v35 = vmax.f32 %v722_v26, %v723_v29 }
 0x109   :  { %v5292_v39 = vpop.eup %5291  ;;  %v726_v40 = vmax.f32 %v5290_v33, %v725_v34 }
 0x10a   :  { %v5294_v31 = vpop.eup %5293  ;;  %v733_v41 = vsel %vm629_vm2, %v5292_v39, -inf  ;;  %v355_v37 = vpop.f32.mrf.mxu2  ;;  %v4275_v43 = vsel %vm4265_vm8, %v724_v35, %v6019_v46 }
 0x10b   :  { %v727_v36 = vrot.slane %v726_v40, 4  ;;  %v734_v44 = vsel %vm631_vm3, %v5294_v31, -inf  ;;  %v483_v47 = vrot.slane %v355_v37, 1  ;;  %v404_v54 = vpop.f32.mrf.mxu3  ;;  %v6072_v48 = vpop.f32.mrf.mxu0  ;;  %v6114_v37 = vld [vmem:[%s7891_s0 + $0x8] sm:$0xff] }
 0x10c   :  { %v735_v28 = vmax.f32 %v733_v41, %v734_v44  ;;  %v486_v49 = vrot.slane %v404_v54, 1  ;;  %v6074_v50 = vpop.f32.mrf.mxu1 }
 0x10d   :  { %v728_v55 = vmax.f32 %v726_v40, %v727_v36  ;;  %v484_v56 = vsel %vm439_vm1, %v482_v45, %v483_v47  ;;  %v550_v57 = vadd.f32 %v483_v47, %v205_v21 }
 0x10e   :  { %v736_v58 = vrot.slane %v735_v28, 4  ;;  %v548_v59 = vadd.f32 %v484_v56, %v6022_v53  ;;  %v487_v46 = vsel %vm439_vm1, %v485_v42, %v486_v49  ;;  %v551_v60 = vadd.f32 %v486_v49, %v254_v23  ;;  %4852 = vmatmul.msk.bf16.vlgmr.msra.gmra.mxu0 %vm134_vm0, %v6082_v61 }
 0x10f   :  { %v587_v62 = vadd.f32 %v5860_v15, %v550_v57  ;;  %v549_v63 = vadd.f32 %v487_v46, %v6024_v32  ;;  %4860 = vmatmul.msk.bf16.vlgmr.msra.gmra.mxu1 %vm134_vm0, %v6082_v61  ;;  %4884 = vmatmul.msk.bf16.vlgmr.msra.gmra.mxu2 %vm134_vm0, %v6082_v61  ;;  %v729_v53 = vrot.slane %v728_v55, 2 }
 0x110   :  { %v737_v52 = vmax.f32 %v735_v28, %v736_v58  ;;  %v585_v1 = vadd.f32 %v5860_v15, %v548_v59  ;;  %v588_v2 = vadd.f32 %v5862_v19, %v551_v60  ;;  %4892 = vmatmul.msk.bf16.vlgmr.msra.gmra.mxu3 %vm134_vm0, %v6082_v61 }
 0x111   :  { %5295 = vtanh.f32 %v587_v62  ;;  %v586_v51 = vadd.f32 %v5862_v19, %v549_v63  ;;  %v730_v5 = vmax.f32 %v728_v55, %v729_v53 }
 0x112   :  { %v738_v32 = vrot.slane %v737_v52, 2  ;;  %5297 = vtanh.f32 %v585_v1  ;;  %v951_v3 = vpop.f32.mrf.mxu2 }
 0x113   :  { %5299 = vtanh.f32 %v586_v51  ;;  %v1000_v6 = vpop.f32.mrf.mxu3  ;;  %v803_v7 = vpop.f32.mrf.mxu0  ;;  %v731_v8 = vrot.slane %v730_v5, 1  ;;  %v1072_v24 = vrot.slane %v951_v3, 1 }
 0x114   :  { %5301 = vtanh.f32 %v588_v2  ;;  %v852_v9 = vpop.f32.mrf.mxu1  ;;  %v739_v15 = vmax.f32 %v737_v52, %v738_v32  ;;  %v1075_v4 = vrot.slane %v1000_v6, 1 }
 0x115   :  { %v732_v10 = vmax.f32 %v730_v5, %v731_v8  ;;  %v6144_v8 = vld [vmem:[%s7891_s0 + $0x10] sm:$0xff] }
 0x116   :  { %v740_v0 = vrot.slane %v739_v15, 1 }
 0x117   :  { %v5296_v11 = vpop.eup %5295  ;;  %v4268_v12 = vsel %vm4267_vm9, %v732_v10, %v4266_v25  ;;  %v5195_v10 = vld [vmem:[%s7897_s6 + $0x44] sm:$0xf0] }
 0x118   :  { %v5298_v13 = vpop.eup %5297  ;;  %v742_v19 = vsel %vm439_vm1, %v5296_v11, -inf  ;;  %v741_v16 = vmax.f32 %v739_v15, %v740_v0  ;;  %v4934_v15 = vld [vmem:[%s7897_s6 + $0x40] sm:$0xf] }
 0x119   :  { %v5300_v14 = vpop.eup %5299  ;;  %v743_v38 = vmax.f32 %v5298_v13, %v742_v19  ;;  %v4935_v0 = vor.u32 %v5195_v10, %v4934_v15 }
 0x11a   :  { %v5302_v17 = vpop.eup %5301  ;;  %v750_v18 = vsel %vm629_vm2, %v5300_v14, -inf  ;;  %v953_v20 = vpop.f32.mrf.mxu2  ;;  %v4276_v21 = vsel %vm4267_vm9, %v741_v16, %v4275_v43  ;;  %v4902_v16 = vld [vmem:[%s7897_s6 + $0x20] sm:$0xf]  ;;  %v5191_v14 = vld [vmem:[%s7897_s6 + $0x24] sm:$0xf0] }
 0x11b   :  { %v751_v22 = vsel %vm631_vm3, %v5302_v17, -inf  ;;  %v1073_v26 = vrot.slane %v953_v20, 1  ;;  %v1002_v23 = vpop.f32.mrf.mxu3  ;;  %v806_v27 = vpop.f32.mrf.mxu0  ;;  %v744_v29 = vrot.slane %v743_v38, 4  ;;  %2109 = vmatpush.bf16.msrb.mxu2 %v4935_v0  ;;  %v5194_v17 = vld [vmem:[%s7897_s6 + $0x44] sm:$0xf]  ;;  %vm3920_vm3 = vcmask 1043456  }
 0x11c   :  { %v752_v30 = vmax.f32 %v750_v18, %v751_v22  ;;  %v1076_v25 = vrot.slane %v1002_v23, 1  ;;  %v855_v33 = vpop.f32.mrf.mxu1  ;;  %v4936_v18 = vld [vmem:[%s7897_s6 + $0x48] sm:$0xf0] }
 0x11d   :  { %v1074_v34 = vsel %vm439_vm1, %v1072_v24, %v1073_v26  ;;  %v6103_v35 = vadd.f32 %v1073_v26, %v803_v7  ;;  %v745_v39 = vmax.f32 %v743_v38, %v744_v29  ;;  %v4903_v38 = vor.u32 %v5191_v14, %v4902_v16 }
 0x11e   :  { %v753_v40 = vrot.slane %v752_v30, 4  ;;  %v6106_v31 = vadd.f32 %v1074_v34, %v6072_v48  ;;  %v1077_v41 = vsel %vm439_vm1, %v1075_v4, %v1076_v25  ;;  %v6109_v42 = vadd.f32 %v1076_v25, %v852_v9  ;;  %4853 = vmatmul.msk.bf16.gmra.mxu0 %vm134_vm0, %v6114_v37 }
 0x11f   :  { %v6119_v43 = vadd.f32 %v1077_v41, %v6074_v50  ;;  %4861 = vmatmul.msk.bf16.gmra.mxu1 %vm134_vm0, %v6114_v37  ;;  %4885 = vmatmul.msk.bf16.gmra.mxu2 %vm134_vm0, %v6114_v37  ;;  %v746_v36 = vrot.slane %v745_v39, 2  ;;  %v4939_v4 = vor.u32 %v5194_v17, %v4936_v18 }
 0x120   :  { %v754_v44 = vmax.f32 %v752_v30, %v753_v40  ;;  %4893 = vmatmul.msk.bf16.gmra.mxu3 %vm134_vm0, %v6114_v37  ;;  %1847 = vmatpush.bf16.msrb.mxu0 %v4903_v38  ;;  %v6185_v40 = vld [vmem:[%s7891_s0 + $0x18] sm:$0xff] }
 0x121   :  { %v747_v45 = vmax.f32 %v745_v39, %v746_v36  ;;  %2158 = vmatpush.bf16.msrb.mxu3 %v4939_v4  ;;  %v5190_v36 = vld [vmem:[%s7897_s6 + $0x24] sm:$0xf] }
 0x122   :  { %v956_v47 = vpop.f32.mrf.mxu2  ;;  %v755_v54 = vrot.slane %v754_v44, 2 }
 0x123   :  { %v1005_v48 = vpop.f32.mrf.mxu3  ;;  %v808_v28 = vpop.f32.mrf.mxu0  ;;  %v748_v49 = vrot.slane %v747_v45, 1  ;;  %v1078_v63 = vrot.slane %v956_v47, 1 }
 0x124   :  { %v857_v55 = vpop.f32.mrf.mxu1  ;;  %v756_v50 = vmax.f32 %v754_v44, %v755_v54  ;;  %v1081_v46 = vrot.slane %v1005_v48, 1  ;;  %v4904_v44 = vld [vmem:[%s7897_s6 + $0x28] sm:$0xf0] }
 0x125   :  { %v749_v56 = vmax.f32 %v747_v45, %v748_v49  ;;  %v4907_v45 = vor.u32 %v5190_v36, %v4904_v44 }
 0x126   :  { %v757_v57 = vrot.slane %v756_v50, 1 }
 0x127   :  { %v6128_v58 = vsel %vm4269_vm10, %v749_v56, %v4268_v12  ;;  %1896 = vmatpush.bf16.msrb.mxu1 %v4907_v45 }
 0x128   :  { %7906 = vst [vmem:[#allocation5_spill] sm:$0xff] %v6128_v58  ;;  %v758_v59 = vmax.f32 %v756_v50, %v757_v57 }
 0x12a   :  { %v958_v60 = vpop.f32.mrf.mxu2  ;;  %v6131_v62 = vsel %vm4269_vm10, %v758_v59, %v4276_v21 }
 0x12b   :  { %7907 = vst [vmem:[#allocation6_spill] sm:$0xff] %v6131_v62  ;;  %v1079_v53 = vrot.slane %v958_v60, 1  ;;  %v1007_v52 = vpop.f32.mrf.mxu3  ;;  %v811_v1 = vpop.f32.mrf.mxu0 }
 0x12c   :  { %v1082_v2 = vrot.slane %v1007_v52, 1  ;;  %v860_v51 = vpop.f32.mrf.mxu1 }
 0x12d   :  { %v1080_v5 = vsel %vm439_vm1, %v1078_v63, %v1079_v53  ;;  %v6134_v32 = vadd.f32 %v1079_v53, %v808_v28 }
 0x12e   :  { %v6136_v3 = vadd.f32 %v1080_v5, %v806_v27  ;;  %v1083_v6 = vsel %vm439_vm1, %v1081_v46, %v1082_v2  ;;  %v6139_v7 = vadd.f32 %v1082_v2, %v857_v55  ;;  %4854 = vmatmul.msk.bf16.gmra.mxu0 %vm134_vm0, %v6144_v8 }
 0x12f   :  { %v6148_v9 = vadd.f32 %v1083_v6, %v855_v33  ;;  %4862 = vmatmul.msk.bf16.gmra.mxu1 %vm134_vm0, %v6144_v8  ;;  %4886 = vmatmul.msk.bf16.gmra.mxu2 %vm134_vm0, %v6144_v8 }
 0x130   :  { %4894 = vmatmul.msk.bf16.gmra.mxu3 %vm134_vm0, %v6144_v8 }
 0x132   :  { %v961_v11 = vpop.f32.mrf.mxu2 }
 0x133   :  { %v1010_v12 = vpop.f32.mrf.mxu3  ;;  %v813_v13 = vpop.f32.mrf.mxu0  ;;  %v1084_v22 = vrot.slane %v961_v11, 1 }
 0x134   :  { %v862_v19 = vpop.f32.mrf.mxu1  ;;  %v1087_v20 = vrot.slane %v1010_v12, 1 }
 0x13a   :  { %v963_v21 = vpop.f32.mrf.mxu2 }
 0x13b   :  { %v1085_v24 = vrot.slane %v963_v21, 1  ;;  %v1012_v26 = vpop.f32.mrf.mxu3  ;;  %v816_v23 = vpop.f32.mrf.mxu0 }
 0x13c   :  { %v1088_v27 = vrot.slane %v1012_v26, 1  ;;  %v865_v29 = vpop.f32.mrf.mxu1 }
 0x13d   :  { %v1086_v30 = vsel %vm439_vm1, %v1084_v22, %v1085_v24  ;;  %v6175_v25 = vadd.f32 %v1085_v24, %v813_v13  ;;  %v6237_v24 = vld [vmem:[%s7891_s0 + $0x28] sm:$0xff] }
 0x13e   :  { %v6177_v33 = vadd.f32 %v1086_v30, %v811_v1  ;;  %v1089_v34 = vsel %vm439_vm1, %v1087_v20, %v1088_v27  ;;  %v6180_v39 = vadd.f32 %v1088_v27, %v862_v19  ;;  %4855 = vmatmul.msk.bf16.gmra.mxu0 %vm134_vm0, %v6185_v40 }
 0x13f   :  { %v6189_v41 = vadd.f32 %v1089_v34, %v860_v51  ;;  %4863 = vmatmul.msk.bf16.gmra.mxu1 %vm134_vm0, %v6185_v40  ;;  %4887 = vmatmul.msk.bf16.gmra.mxu2 %vm134_vm0, %v6185_v40  ;;  %v6214_v51 = vld [vmem:[%s7891_s0 + $0x20] sm:$0xff] }
 0x140   :  { %4895 = vmatmul.msk.bf16.gmra.mxu3 %vm134_vm0, %v6185_v40 }
 0x142   :  { %v966_v47 = vpop.f32.mrf.mxu2 }
 0x143   :  { %v1015_v54 = vpop.f32.mrf.mxu3  ;;  %v818_v48 = vpop.f32.mrf.mxu0  ;;  %v1090_v50 = vrot.slane %v966_v47, 1 }
 0x144   :  { %v867_v28 = vpop.f32.mrf.mxu1  ;;  %v1093_v49 = vrot.slane %v1015_v54, 1 }
 0x14a   :  { %v968_v55 = vpop.f32.mrf.mxu2 }
 0x14b   :  { %v1091_v56 = vrot.slane %v968_v55, 1  ;;  %v1017_v57 = vpop.f32.mrf.mxu3  ;;  %v821_v59 = vpop.f32.mrf.mxu0 }
 0x14c   :  { %v1094_v46 = vrot.slane %v1017_v57, 1  ;;  %v870_v60 = vpop.f32.mrf.mxu1 }
 0x14d   :  { %v1092_v63 = vsel %vm439_vm1, %v1090_v50, %v1091_v56  ;;  %v6204_v53 = vadd.f32 %v1091_v56, %v818_v48 }
 0x14e   :  { %v6206_v52 = vadd.f32 %v1092_v63, %v816_v23  ;;  %v1095_v1 = vsel %vm439_vm1, %v1093_v49, %v1094_v46  ;;  %v6209_v2 = vadd.f32 %v1094_v46, %v867_v28  ;;  %4856 = vmatmul.msk.bf16.gmra.mxu0 %vm134_vm0, %v6214_v51  ;;  %v5205_v63 = vld [vmem:[%s7899_s8 + $0x14] sm:$0xf0] }
 0x14f   :  { %v6218_v5 = vadd.f32 %v1095_v1, %v865_v29  ;;  %4864 = vmatmul.msk.bf16.gmra.mxu1 %vm134_vm0, %v6214_v51  ;;  %4888 = vmatmul.msk.bf16.gmra.mxu2 %vm134_vm0, %v6214_v51 }
 0x150   :  { %4896 = vmatmul.msk.bf16.gmra.mxu3 %vm134_vm0, %v6214_v51 }
 0x152   :  { %v971_v6 = vpop.f32.mrf.mxu2 }
 0x153   :  { %v1020_v15 = vpop.f32.mrf.mxu3  ;;  %v823_v10 = vpop.f32.mrf.mxu0  ;;  %v1096_v13 = vrot.slane %v971_v6, 1 }
 0x154   :  { %v872_v0 = vpop.f32.mrf.mxu1  ;;  %v1099_v11 = vrot.slane %v1020_v15, 1 }
 0x15a   :  { %v973_v12 = vpop.f32.mrf.mxu2 }
 0x15b   :  { %v1097_v19 = vrot.slane %v973_v12, 1  ;;  %v1022_v16 = vpop.f32.mrf.mxu3  ;;  %v826_v14 = vpop.f32.mrf.mxu0 }
 0x15c   :  { %v1100_v38 = vrot.slane %v1022_v16, 1  ;;  %v875_v17 = vpop.f32.mrf.mxu1 }
 0x15d   :  { %v1098_v18 = vsel %vm439_vm1, %v1096_v13, %v1097_v19  ;;  %v6227_v4 = vadd.f32 %v1097_v19, %v823_v10 }
 0x15e   :  { %v6229_v20 = vadd.f32 %v1098_v18, %v821_v59  ;;  %v1101_v21 = vsel %vm439_vm1, %v1099_v11, %v1100_v38  ;;  %v6232_v22 = vadd.f32 %v1100_v38, %v872_v0  ;;  %4857 = vmatmul.msk.bf16.gmra.mxu0 %vm134_vm0, %v6237_v24  ;;  %v6260_v59 = vld [vmem:[%s7891_s0 + $0x30] sm:$0xff]  ;;  %v5201_v11 = vld [vmem:[%s7897_s6 + $0x74] sm:$0xf0] }
 0x15f   :  { %v6241_v26 = vadd.f32 %v1101_v21, %v870_v60  ;;  %4865 = vmatmul.msk.bf16.gmra.mxu1 %vm134_vm0, %v6237_v24  ;;  %4889 = vmatmul.msk.bf16.gmra.mxu2 %vm134_vm0, %v6237_v24  ;;  %v5006_v60 = vld [vmem:[%s7899_s8 + $0x10] sm:$0xf] }
 0x160   :  { %4897 = vmatmul.msk.bf16.gmra.mxu3 %vm134_vm0, %v6237_v24  ;;  %v5007_v1 = vor.u32 %v5205_v63, %v5006_v60  ;;  %v4974_v0 = vld [vmem:[%s7897_s6 + $0x70] sm:$0xf] }
 0x161   :  { %v4975_v13 = vor.u32 %v5201_v11, %v4974_v0 }
 0x162   :  { %v976_v23 = vpop.f32.mrf.mxu2  ;;  %2860 = vmatpush.bf16.msra.mxu2 %v5007_v1 }
 0x163   :  { %v1025_v27 = vpop.f32.mrf.mxu3  ;;  %v828_v29 = vpop.f32.mrf.mxu0  ;;  %v1102_v44 = vrot.slane %v976_v23, 1  ;;  %2370 = vmatpush.bf16.msra.mxu0 %v4975_v13 }
 0x164   :  { %v877_v30 = vpop.f32.mrf.mxu1  ;;  %v1105_v34 = vrot.slane %v1025_v27, 1 }
 0x16a   :  { %v978_v36 = vpop.f32.mrf.mxu2 }
 0x16b   :  { %v1103_v45 = vrot.slane %v978_v36, 1  ;;  %v1027_v47 = vpop.f32.mrf.mxu3  ;;  %v831_v54 = vpop.f32.mrf.mxu0 }
 0x16c   :  { %v1106_v48 = vrot.slane %v1027_v47, 1  ;;  %v880_v28 = vpop.f32.mrf.mxu1 }
 0x16d   :  { %v1104_v49 = vsel %vm439_vm1, %v1102_v44, %v1103_v45  ;;  %v6250_v55 = vadd.f32 %v1103_v45, %v828_v29  ;;  %v6295_v44 = vld [vmem:[%s7891_s0 + $0x38] sm:$0xff] }
 0x16e   :  { %v6252_v50 = vadd.f32 %v1104_v49, %v826_v14  ;;  %v1107_v56 = vsel %vm439_vm1, %v1105_v34, %v1106_v48  ;;  %v6255_v57 = vadd.f32 %v1106_v48, %v877_v30  ;;  %4858 = vmatmul.msk.bf16.gmra.mxu0 %vm134_vm0, %v6260_v59 }
 0x16f   :  { %v6264_v46 = vadd.f32 %v1107_v56, %v875_v17  ;;  %4866 = vmatmul.msk.bf16.gmra.mxu1 %vm134_vm0, %v6260_v59  ;;  %4890 = vmatmul.msk.bf16.gmra.mxu2 %vm134_vm0, %v6260_v59 }
 0x170   :  { %4898 = vmatmul.msk.bf16.gmra.mxu3 %vm134_vm0, %v6260_v59 }
 0x172   :  { %v981_v6 = vpop.f32.mrf.mxu2 }
 0x173   :  { %v1030_v15 = vpop.f32.mrf.mxu3  ;;  %v833_v10 = vpop.f32.mrf.mxu0  ;;  %v1108_v14 = vrot.slane %v981_v6, 1 }
 0x174   :  { %v882_v12 = vpop.f32.mrf.mxu1  ;;  %v1111_v19 = vrot.slane %v1030_v15, 1 }
 0x17a   :  { %v983_v16 = vpop.f32.mrf.mxu2 }
 0x17b   :  { %v1109_v38 = vrot.slane %v983_v16, 1  ;;  %v1032_v17 = vpop.f32.mrf.mxu3  ;;  %v836_v18 = vpop.f32.mrf.mxu0 }
 0x17c   :  { %v1112_v21 = vrot.slane %v1032_v17, 1  ;;  %v885_v23 = vpop.f32.mrf.mxu1  ;;  %v5008_v17 = vld [vmem:[%s7899_s8 + $0x18] sm:$0xf0] }
 0x17d   :  { %v1110_v27 = vsel %vm439_vm1, %v1108_v14, %v1109_v38  ;;  %v6285_v29 = vadd.f32 %v1109_v38, %v833_v10  ;;  %v771_v14 = vld [vmem:[%s7896_s5] sm:$0x3]  ;;  %v5204_v38 = vld [vmem:[%s7899_s8 + $0x14] sm:$0xf] }
 0x17e   :  { %v6287_v30 = vadd.f32 %v1110_v27, %v831_v54  ;;  %v1113_v34 = vsel %vm439_vm1, %v1111_v19, %v1112_v21  ;;  %v6290_v36 = vadd.f32 %v1112_v21, %v882_v12  ;;  %4859 = vmatmul.msk.bf16.gmra.mxu0 %vm134_vm0, %v6295_v44 }
 0x17f   :  { %v6299_v45 = vadd.f32 %v1113_v34, %v880_v28  ;;  %4867 = vmatmul.msk.bf16.gmra.mxu1 %vm134_vm0, %v6295_v44  ;;  %4891 = vmatmul.msk.bf16.gmra.mxu2 %vm134_vm0, %v6295_v44 }
 0x180   :  { %4899 = vmatmul.msk.bf16.gmra.mxu3 %vm134_vm0, %v6295_v44 }
 0x182   :  { %v986_v47 = vpop.f32.mrf.mxu2 }
 0x183   :  { %v1035_v54 = vpop.f32.mrf.mxu3  ;;  %v838_v48 = vpop.f32.mrf.mxu0  ;;  %v1114_v63 = vrot.slane %v986_v47, 1 }
 0x184   :  { %v887_v49 = vpop.f32.mrf.mxu1  ;;  %v1117_v56 = vrot.slane %v1035_v54, 1 }
 0x18a   :  { %v988_v60 = vpop.f32.mrf.mxu2 }
 0x18b   :  { %v1115_v1 = vrot.slane %v988_v60, 1  ;;  %v1037_v6 = vpop.f32.mrf.mxu3  ;;  %v1213_v28 = vpop.f32.mrf.mxu0 }
 0x18c   :  { %v1118_v15 = vrot.slane %v1037_v6, 1  ;;  %v1262_v10 = vpop.f32.mrf.mxu1 }
 0x18d   :  { %v1116_v0 = vsel %vm439_vm1, %v1114_v63, %v1115_v1  ;;  %v6308_v11 = vadd.f32 %v1115_v1, %v838_v48  ;;  %v1338_v27 = vrot.slane %v1262_v10, 2  ;;  %v1335_v48 = vrot.slane %v1213_v28, 2 }
 0x18e   :  { %v6310_v12 = vadd.f32 %v1116_v0, %v836_v18  ;;  %v1119_v13 = vsel %vm439_vm1, %v1117_v56, %v1118_v15  ;;  %v6313_v19 = vadd.f32 %v1118_v15, %v887_v49  ;;  %4916 = vmatmul.msk.bf16.vlgmr.msrb.gmra.mxu0 %vm134_vm0, %v6082_v61  ;;  %v5200_v18 = vld [vmem:[%s7897_s6 + $0x74] sm:$0xf]  ;;  %v6344_v56 = vperm.slane %v771_v14, 0 }
 0x18f   :  { %v6317_v16 = vadd.f32 %v1119_v13, %v885_v23  ;;  %4924 = vmatmul.msk.bf16.vlgmr.msrb.gmra.mxu1 %vm134_vm0, %v6082_v61  ;;  %4948 = vmatmul.msk.bf16.vlgmr.msrb.gmra.mxu2 %vm134_vm0, %v6082_v61  ;;  %v5011_v23 = vor.u32 %v5204_v38, %v5008_v17  ;;  %v6346_v1 = vperm.slane %v771_v14, 1 }
 0x190   :  { %4956 = vmatmul.msk.bf16.vlgmr.msrb.gmra.mxu3 %vm134_vm0, %v6082_v61  ;;  %v4976_v61 = vld [vmem:[%s7897_s6 + $0x78] sm:$0xf0] }
 0x191   :  { %v4979_v54 = vor.u32 %v5200_v18, %v4976_v61  ;;  %2909 = vmatpush.bf16.msra.mxu3 %v5011_v23 }
 0x192   :  { %v6337_v21 = vpop.f32.mrf.mxu2 }
 0x193   :  { %v6342_v34 = vpop.f32.mrf.mxu3  ;;  %v1215_v47 = vpop.f32.mrf.mxu0  ;;  %2419 = vmatpush.bf16.msra.mxu1 %v4979_v54 }
 0x194   :  { %v1336_v49 = vrot.slane %v1215_v47, 2  ;;  %v1264_v60 = vpop.f32.mrf.mxu1 }
 0x195   :  { %v1339_v63 = vrot.slane %v1264_v60, 2 }
 0x196   :  { %v1337_v6 = vsel %vm1334_vm11, %v1335_v48, %v1336_v49  ;;  %v1417_v15 = vadd.f32 %v1336_v49, %v6103_v35 }
 0x197   :  { %v1415_v10 = vadd.f32 %v1337_v6, %v6106_v31  ;;  %v1340_v0 = vsel %vm1334_vm11, %v1338_v27, %v1339_v63  ;;  %v1418_v13 = vadd.f32 %v1339_v63, %v6109_v42 }
 0x198   :  { %v1454_v28 = vadd.f32 %v6344_v56, %v1417_v15  ;;  %v1416_v38 = vadd.f32 %v1340_v0, %v6119_v43 }
 0x199   :  { %v1452_v17 = vadd.f32 %v6344_v56, %v1415_v10  ;;  %v1455_v14 = vadd.f32 %v6346_v1, %v1418_v13 }
 0x19a   :  { %5303 = vtanh.f32 %v1454_v28  ;;  %v1453_v18 = vadd.f32 %v6346_v1, %v1416_v38  ;;  %v6358_v23 = vpop.f32.mrf.mxu2 }
 0x19b   :  { %5305 = vtanh.f32 %v1452_v17  ;;  %v6360_v35 = vpop.f32.mrf.mxu3  ;;  %v1218_v31 = vpop.f32.mrf.mxu0 }
 0x19c   :  { %5307 = vtanh.f32 %v1453_v18  ;;  %v1267_v61 = vpop.f32.mrf.mxu1  ;;  %v1341_v0 = vrot.slane %v1218_v31, 2 }
 0x19d   :  { %5309 = vtanh.f32 %v1455_v14  ;;  %v1344_v63 = vrot.slane %v1267_v61, 2 }
 0x19e   :  { %4917 = vmatmul.msk.bf16.gmra.mxu0 %vm134_vm0, %v6114_v37 }
 0x19f   :  { %4925 = vmatmul.msk.bf16.gmra.mxu1 %vm134_vm0, %v6114_v37  ;;  %4949 = vmatmul.msk.bf16.gmra.mxu2 %vm134_vm0, %v6114_v37 }
 0x1a0   :  { %v5304_v42 = vpop.eup %5303  ;;  %4957 = vmatmul.msk.bf16.gmra.mxu3 %vm134_vm0, %v6114_v37 }
 0x1a1   :  { %v5306_v43 = vpop.eup %5305  ;;  %v1516_v27 = vsel %vm1334_vm11, %v5304_v42, -inf }
 0x1a2   :  { %v5308_v47 = vpop.eup %5307  ;;  %v1517_v54 = vmax.f32 %v5306_v43, %v1516_v27  ;;  %v6371_v48 = vpop.f32.mrf.mxu2 }
 0x1a3   :  { %v5310_v49 = vpop.eup %5309  ;;  %v1524_v60 = vsel %vm629_vm2, %v5308_v47, -inf  ;;  %v6374_v6 = vpop.f32.mrf.mxu3 }
 0x1a4   :  { %v1220_v15 = vpop.f32.mrf.mxu0  ;;  %v1526_v10 = vsel %vm1525_vm12, %v5310_v49, -inf  ;;  %v1269_v37 = vpop.f32.mrf.mxu1  ;;  %v1518_v49 = vrot.slane %v1517_v54, 4 }
 0x1a5   :  { %v1342_v13 = vrot.slane %v1220_v15, 2  ;;  %v1527_v28 = vmax.f32 %v1524_v60, %v1526_v10  ;;  %v1345_v38 = vrot.slane %v1269_v37, 2 }
 0x1a6   :  { %v1519_v10 = vmax.f32 %v1517_v54, %v1518_v49 }
 0x1a7   :  { %v1343_v17 = vsel %vm1334_vm11, %v1341_v0, %v1342_v13  ;;  %v1421_v14 = vadd.f32 %v1342_v13, %v6134_v32  ;;  %v1346_v42 = vsel %vm1334_vm11, %v1344_v63, %v1345_v38  ;;  %v1422_v61 = vadd.f32 %v1345_v38, %v6139_v7 }
 0x1a8   :  { %v1419_v18 = vadd.f32 %v1343_v17, %v6136_v3  ;;  %v1420_v27 = vadd.f32 %v1346_v42, %v6148_v9  ;;  %v1528_v63 = vrot.slane %v1527_v28, 4  ;;  %v1520_v17 = vrot.slane %v1519_v10, 2 }
 0x1a9   :  { %v1458_v43 = vadd.f32 %v6344_v56, %v1421_v14  ;;  %v1459_v47 = vadd.f32 %v6346_v1, %v1422_v61 }
 0x1aa   :  { %v1456_v31 = vadd.f32 %v6344_v56, %v1419_v18  ;;  %v1457_v60 = vadd.f32 %v6346_v1, %v1420_v27  ;;  %v6387_v15 = vpop.f32.mrf.mxu2  ;;  %v1529_v13 = vmax.f32 %v1527_v28, %v1528_v63  ;;  %v1521_v62 = vmax.f32 %v1519_v10, %v1520_v17 }
 0x1ab   :  { %5311 = vtanh.f32 %v1458_v43  ;;  %v6389_v32 = vpop.f32.mrf.mxu3 }
 0x1ac   :  { %5313 = vtanh.f32 %v1456_v31  ;;  %v1223_v3 = vpop.f32.mrf.mxu0  ;;  %v1272_v7 = vpop.f32.mrf.mxu1 }
 0x1ad   :  { %5315 = vtanh.f32 %v1457_v60  ;;  %v1350_v61 = vrot.slane %v1272_v7, 2  ;;  %v1530_v60 = vrot.slane %v1529_v13, 2 }
 0x1ae   :  { %5317 = vtanh.f32 %v1459_v47  ;;  %4918 = vmatmul.msk.bf16.gmra.mxu0 %vm134_vm0, %v6144_v8 }
 0x1af   :  { %4926 = vmatmul.msk.bf16.gmra.mxu1 %vm134_vm0, %v6144_v8  ;;  %4950 = vmatmul.msk.bf16.gmra.mxu2 %vm134_vm0, %v6144_v8 }
 0x1b0   :  { %4958 = vmatmul.msk.bf16.gmra.mxu3 %vm134_vm0, %v6144_v8  ;;  %v1347_v8 = vrot.slane %v1223_v3, 2 }
 0x1b1   :  { %v5312_v9 = vpop.eup %5311 }
 0x1b2   :  { %v5314_v0 = vpop.eup %5313  ;;  %v1534_v37 = vsel %vm1334_vm11, %v5312_v9, -inf  ;;  %v6400_v14 = vpop.f32.mrf.mxu2 }
 0x1b3   :  { %v5316_v38 = vpop.eup %5315  ;;  %v1535_v54 = vmax.f32 %v5314_v0, %v1534_v37  ;;  %7908 = vst [vmem:[#allocation7_spill] sm:$0xff] %v6400_v14  ;;  %v6403_v43 = vpop.f32.mrf.mxu3 }
 0x1b4   :  { %v5318_v18 = vpop.eup %5317  ;;  %v1542_v42 = vsel %vm629_vm2, %v5316_v38, -inf  ;;  %7909 = vst [vmem:[#allocation8_spill] sm:$0xff] %v6403_v43  ;;  %v1225_v27 = vpop.f32.mrf.mxu0 }
 0x1b5   :  { %v1536_v31 = vrot.slane %v1535_v54, 4  ;;  %v1543_v47 = vsel %vm1525_vm12, %v5318_v18, -inf  ;;  %v1348_v49 = vrot.slane %v1225_v27, 2  ;;  %v1274_v28 = vpop.f32.mrf.mxu1 }
 0x1b6   :  { %v1544_v63 = vmax.f32 %v1542_v42, %v1543_v47  ;;  %v1351_v9 = vrot.slane %v1274_v28, 2  ;;  %v1531_v42 = vmax.f32 %v1529_v13, %v1530_v60  ;;  %v5203_v13 = vld [vmem:[%s7899_s8 + $0x4] sm:$0xf0] }
 0x1b7   :  { %v1537_v0 = vmax.f32 %v1535_v54, %v1536_v31  ;;  %v1349_v37 = vsel %vm1334_vm11, %v1347_v8, %v1348_v49  ;;  %v1425_v58 = vadd.f32 %v1348_v49, %v6175_v25  ;;  %v1522_v54 = vrot.slane %v1521_v62, 1  ;;  %v4966_v49 = vld [vmem:[%s7897_s6 + $0x60] sm:$0xf]  ;;  %v5199_v28 = vld [vmem:[%s7897_s6 + $0x64] sm:$0xf0] }
 0x1b8   :  { %v1545_v38 = vrot.slane %v1544_v63, 4  ;;  %v1423_v7 = vadd.f32 %v1349_v37, %v6177_v33  ;;  %v1352_v43 = vsel %vm1334_vm11, %v1350_v61, %v1351_v9  ;;  %v1426_v14 = vadd.f32 %v1351_v9, %v6180_v39 }
 0x1b9   :  { %v1538_v18 = vrot.slane %v1537_v0, 2  ;;  %v1462_v3 = vadd.f32 %v6344_v56, %v1425_v58  ;;  %v1424_v27 = vadd.f32 %v1352_v43, %v6189_v41  ;;  %v4998_v41 = vld [vmem:[%s7899_s8] sm:$0xf]  ;;  %v1532_v60 = vrot.slane %v1531_v42, 1 }
 0x1ba   :  { %v1546_v47 = vmax.f32 %v1544_v63, %v1545_v38  ;;  %v1460_v10 = vadd.f32 %v6344_v56, %v1423_v7  ;;  %v1463_v17 = vadd.f32 %v6346_v1, %v1426_v14  ;;  %v6416_v31 = vpop.f32.mrf.mxu2  ;;  %v4999_v8 = vor.u32 %v5203_v13, %v4998_v41 }
 0x1bb   :  { %v1539_v25 = vmax.f32 %v1537_v0, %v1538_v18  ;;  %5319 = vtanh.f32 %v1462_v3  ;;  %v1461_v33 = vadd.f32 %v6346_v1, %v1424_v27  ;;  %v6418_v39 = vpop.f32.mrf.mxu3  ;;  %v4967_v9 = vor.u32 %v5199_v28, %v4966_v49 }
 0x1bc   :  { %v1547_v61 = vrot.slane %v1546_v47, 2  ;;  %5321 = vtanh.f32 %v1460_v10  ;;  %v1228_v58 = vpop.f32.mrf.mxu0  ;;  %v1523_v0 = vmax.f32 %v1521_v62, %v1522_v54  ;;  %2861 = vmatpush.bf16.msra.mxu2 %v4999_v8  ;;  %v1533_v3 = vmax.f32 %v1531_v42, %v1532_v60 }
 0x1bd   :  { %v1540_v14 = vrot.slane %v1539_v25, 1  ;;  %5323 = vtanh.f32 %v1461_v33  ;;  %v1277_v43 = vpop.f32.mrf.mxu1  ;;  %2371 = vmatpush.bf16.msra.mxu0 %v4967_v9  ;;  %v1353_v42 = vrot.slane %v1228_v58, 2 }
 0x1be   :  { %v1548_v63 = vmax.f32 %v1546_v47, %v1547_v61  ;;  %5325 = vtanh.f32 %v1463_v17  ;;  %4919 = vmatmul.msk.bf16.gmra.mxu0 %vm134_vm0, %v6185_v40  ;;  %v1356_v61 = vrot.slane %v1277_v43, 2 }
 0x1bf   :  { %v1541_v37 = vmax.f32 %v1539_v25, %v1540_v14  ;;  %4927 = vmatmul.msk.bf16.gmra.mxu1 %vm134_vm0, %v6185_v40  ;;  %4951 = vmatmul.msk.bf16.gmra.mxu2 %vm134_vm0, %v6185_v40 }
 0x1c0   :  { %v1549_v38 = vrot.slane %v1548_v63, 1  ;;  %4959 = vmatmul.msk.bf16.gmra.mxu3 %vm134_vm0, %v6185_v40 }
 0x1c1   :  { %v5320_v7 = vpop.eup %5319  ;;  %v6441_v18 = vsel %vm4257_vm4, %v1541_v37, %v1523_v0 }
 0x1c2   :  { %v5322_v62 = vpop.eup %5321  ;;  %v1550_v27 = vmax.f32 %v1548_v63, %v1549_v38  ;;  %v1551_v47 = vsel %vm1334_vm11, %v5320_v7, -inf  ;;  %v6444_v54 = vpop.f32.mrf.mxu2 }
 0x1c3   :  { %v5324_v10 = vpop.eup %5323  ;;  %v1552_v17 = vmax.f32 %v5322_v62, %v1551_v47  ;;  %v6447_v41 = vpop.f32.mrf.mxu3 }
 0x1c4   :  { %v5326_v25 = vpop.eup %5325  ;;  %v1559_v33 = vsel %vm629_vm2, %v5324_v10, -inf  ;;  %v1230_v40 = vpop.f32.mrf.mxu0  ;;  %v4303_v13 = vsel %vm4257_vm4, %v1550_v27, %v1533_v3 }
 0x1c5   :  { %v1553_v14 = vrot.slane %v1552_v17, 4  ;;  %v1560_v8 = vsel %vm1525_vm12, %v5326_v25, -inf  ;;  %v1354_v49 = vrot.slane %v1230_v40, 2  ;;  %v1279_v28 = vpop.f32.mrf.mxu1  ;;  %v4968_v40 = vld [vmem:[%s7897_s6 + $0x68] sm:$0xf0] }
 0x1c6   :  { %v1561_v60 = vmax.f32 %v1559_v33, %v1560_v8  ;;  %v1357_v63 = vrot.slane %v1279_v28, 2 }
 0x1c7   :  { %v1554_v9 = vmax.f32 %v1552_v17, %v1553_v14  ;;  %v1355_v0 = vsel %vm1334_vm11, %v1353_v42, %v1354_v49  ;;  %v1429_v37 = vadd.f32 %v1354_v49, %v6204_v53  ;;  %v5202_v53 = vld [vmem:[%s7899_s8 + $0x4] sm:$0xf] }
 0x1c8   :  { %v1562_v38 = vrot.slane %v1561_v60, 4  ;;  %v1427_v43 = vadd.f32 %v1355_v0, %v6206_v52  ;;  %v1358_v7 = vsel %vm1334_vm11, %v1356_v61, %v1357_v63  ;;  %v1430_v62 = vadd.f32 %v1357_v63, %v6209_v2  ;;  %v5000_v52 = vld [vmem:[%s7899_s8 + $0x8] sm:$0xf0]  ;;  %v5198_v2 = vld [vmem:[%s7897_s6 + $0x64] sm:$0xf] }
 0x1c9   :  { %v1555_v3 = vrot.slane %v1554_v9, 2  ;;  %v1466_v27 = vadd.f32 %v6344_v56, %v1429_v37  ;;  %v1428_v58 = vadd.f32 %v1358_v7, %v6218_v5  ;;  %v5003_v61 = vor.u32 %v5202_v53, %v5000_v52 }
 0x1ca   :  { %v1563_v47 = vmax.f32 %v1561_v60, %v1562_v38  ;;  %v1464_v10 = vadd.f32 %v6344_v56, %v1427_v43  ;;  %v1467_v17 = vadd.f32 %v6346_v1, %v1430_v62  ;;  %v6470_v33 = vpop.f32.mrf.mxu2  ;;  %v4971_v49 = vor.u32 %v5198_v2, %v4968_v40 }
 0x1cb   :  { %v1556_v25 = vmax.f32 %v1554_v9, %v1555_v3  ;;  %5327 = vtanh.f32 %v1466_v27  ;;  %v1465_v5 = vadd.f32 %v6346_v1, %v1428_v58  ;;  %v6475_v8 = vpop.f32.mrf.mxu3  ;;  %2910 = vmatpush.bf16.msra.mxu3 %v5003_v61 }
 0x1cc   :  { %v1564_v14 = vrot.slane %v1563_v47, 2  ;;  %5329 = vtanh.f32 %v1464_v10  ;;  %v1233_v42 = vpop.f32.mrf.mxu0  ;;  %2420 = vmatpush.bf16.msra.mxu1 %v4971_v49 }
 0x1cd   :  { %5331 = vtanh.f32 %v1465_v5  ;;  %v1282_v28 = vpop.f32.mrf.mxu1  ;;  %v1557_v60 = vrot.slane %v1556_v25, 1 }
 0x1ce   :  { %v1565_v63 = vmax.f32 %v1563_v47, %v1564_v14  ;;  %5333 = vtanh.f32 %v1467_v17  ;;  %4920 = vmatmul.msk.bf16.gmra.mxu0 %vm134_vm0, %v6214_v51  ;;  %v1362_v17 = vrot.slane %v1282_v28, 2 }
 0x1cf   :  { %v1558_v9 = vmax.f32 %v1556_v25, %v1557_v60  ;;  %4928 = vmatmul.msk.bf16.gmra.mxu1 %vm134_vm0, %v6214_v51  ;;  %4952 = vmatmul.msk.bf16.gmra.mxu2 %vm134_vm0, %v6214_v51  ;;  %v1359_v25 = vrot.slane %v1233_v42, 2 }
 0x1d0   :  { %v1566_v0 = vrot.slane %v1565_v63, 1  ;;  %4960 = vmatmul.msk.bf16.gmra.mxu3 %vm134_vm0, %v6214_v51 }
 0x1d1   :  { %v5328_v37 = vpop.eup %5327  ;;  %v4297_v38 = vsel %vm4259_vm5, %v1558_v9, %v6441_v18 }
 0x1d2   :  { %v5330_v43 = vpop.eup %5329  ;;  %v1568_v7 = vsel %vm1334_vm11, %v5328_v37, -inf  ;;  %v1567_v62 = vmax.f32 %v1565_v63, %v1566_v0  ;;  %v6488_v58 = vpop.f32.mrf.mxu2 }
 0x1d3   :  { %v5332_v3 = vpop.eup %5331  ;;  %v1569_v27 = vmax.f32 %v5330_v43, %v1568_v7  ;;  %v6491_v53 = vpop.f32.mrf.mxu3 }
 0x1d4   :  { %v5334_v47 = vpop.eup %5333  ;;  %v1576_v10 = vsel %vm629_vm2, %v5332_v3, -inf  ;;  %v1235_v52 = vpop.f32.mrf.mxu0  ;;  %v4304_v51 = vsel %vm4259_vm5, %v1567_v62, %v4303_v13 }
 0x1d5   :  { %v1570_v2 = vrot.slane %v1569_v27, 4  ;;  %v1577_v18 = vsel %vm1525_vm12, %v5334_v47, -inf  ;;  %v1360_v5 = vrot.slane %v1235_v52, 2  ;;  %v1284_v61 = vpop.f32.mrf.mxu1 }
 0x1d6   :  { %v1578_v40 = vmax.f32 %v1576_v10, %v1577_v18  ;;  %v1363_v14 = vrot.slane %v1284_v61, 2 }
 0x1d7   :  { %v1571_v49 = vmax.f32 %v1569_v27, %v1570_v2  ;;  %v1361_v60 = vsel %vm1334_vm11, %v1359_v25, %v1360_v5  ;;  %v1433_v63 = vadd.f32 %v1360_v5, %v6227_v4 }
 0x1d8   :  { %v1579_v9 = vrot.slane %v1578_v40, 4  ;;  %v1431_v28 = vadd.f32 %v1361_v60, %v6229_v20  ;;  %v1364_v0 = vsel %vm1334_vm11, %v1362_v17, %v1363_v14  ;;  %v1434_v13 = vadd.f32 %v1363_v14, %v6232_v22 }
 0x1d9   :  { %v1572_v37 = vrot.slane %v1571_v49, 2  ;;  %v1470_v43 = vadd.f32 %v6344_v56, %v1433_v63  ;;  %v1432_v42 = vadd.f32 %v1364_v0, %v6241_v26 }
 0x1da   :  { %v1580_v7 = vmax.f32 %v1578_v40, %v1579_v9  ;;  %v1468_v62 = vadd.f32 %v6344_v56, %v1431_v28  ;;  %v1471_v3 = vadd.f32 %v6346_v1, %v1434_v13  ;;  %v6505_v27 = vpop.f32.mrf.mxu2 }
 0x1db   :  { %5335 = vtanh.f32 %v1470_v43  ;;  %v1469_v4 = vadd.f32 %v6346_v1, %v1432_v42  ;;  %v1573_v20 = vmax.f32 %v1571_v49, %v1572_v37  ;;  %v6507_v10 = vpop.f32.mrf.mxu3 }
 0x1dc   :  { %v1581_v47 = vrot.slane %v1580_v7, 2  ;;  %5337 = vtanh.f32 %v1468_v62  ;;  %v1238_v22 = vpop.f32.mrf.mxu0 }
 0x1dd   :  { %5339 = vtanh.f32 %v1469_v4  ;;  %v1287_v17 = vpop.f32.mrf.mxu1  ;;  %v1574_v52 = vrot.slane %v1573_v20, 1  ;;  %v1365_v42 = vrot.slane %v1238_v22, 2 }
 0x1de   :  { %5341 = vtanh.f32 %v1471_v3  ;;  %v1582_v26 = vmax.f32 %v1580_v7, %v1581_v47  ;;  %4921 = vmatmul.msk.bf16.gmra.mxu0 %vm134_vm0, %v6237_v24  ;;  %v1368_v0 = vrot.slane %v1287_v17, 2 }
 0x1df   :  { %v1575_v2 = vmax.f32 %v1573_v20, %v1574_v52  ;;  %4929 = vmatmul.msk.bf16.gmra.mxu1 %vm134_vm0, %v6237_v24  ;;  %4953 = vmatmul.msk.bf16.gmra.mxu2 %vm134_vm0, %v6237_v24 }
 0x1e0   :  { %v1583_v18 = vrot.slane %v1582_v26, 1  ;;  %4961 = vmatmul.msk.bf16.gmra.mxu3 %vm134_vm0, %v6237_v24 }
 0x1e1   :  { %v5336_v25 = vpop.eup %5335  ;;  %v4298_v5 = vsel %vm4261_vm6, %v1575_v2, %v4297_v38 }
 0x1e2   :  { %v5338_v61 = vpop.eup %5337  ;;  %v1585_v40 = vsel %vm1334_vm11, %v5336_v25, -inf  ;;  %v1584_v14 = vmax.f32 %v1582_v26, %v1583_v18  ;;  %v6519_v63 = vpop.f32.mrf.mxu2 }
 0x1e3   :  { %v5340_v49 = vpop.eup %5339  ;;  %v1586_v60 = vmax.f32 %v5338_v61, %v1585_v40  ;;  %v6522_v13 = vpop.f32.mrf.mxu3 }
 0x1e4   :  { %v5342_v9 = vpop.eup %5341  ;;  %v1593_v28 = vsel %vm629_vm2, %v5340_v49, -inf  ;;  %v1240_v37 = vpop.f32.mrf.mxu0  ;;  %v4305_v43 = vsel %vm4261_vm6, %v1584_v14, %v4304_v51 }
 0x1e5   :  { %v1587_v24 = vrot.slane %v1586_v60, 4  ;;  %v1594_v38 = vsel %vm1525_vm12, %v5342_v9, -inf  ;;  %v1366_v7 = vrot.slane %v1240_v37, 2  ;;  %v1289_v62 = vpop.f32.mrf.mxu1 }
 0x1e6   :  { %v1595_v3 = vmax.f32 %v1593_v28, %v1594_v38  ;;  %v1369_v4 = vrot.slane %v1289_v62, 2 }
 0x1e7   :  { %v1588_v20 = vmax.f32 %v1586_v60, %v1587_v24  ;;  %v1367_v47 = vsel %vm1334_vm11, %v1365_v42, %v1366_v7  ;;  %v1437_v52 = vadd.f32 %v1366_v7, %v6250_v55 }
 0x1e8   :  { %v1596_v26 = vrot.slane %v1595_v3, 4  ;;  %v1435_v17 = vadd.f32 %v1367_v47, %v6252_v50  ;;  %v1370_v2 = vsel %vm1334_vm11, %v1368_v0, %v1369_v4  ;;  %v1438_v51 = vadd.f32 %v1369_v4, %v6255_v57 }
 0x1e9   :  { %v1474_v18 = vadd.f32 %v6344_v56, %v1437_v52  ;;  %v1436_v22 = vadd.f32 %v1370_v2, %v6264_v46  ;;  %v1589_v25 = vrot.slane %v1588_v20, 2 }
 0x1ea   :  { %v1597_v61 = vmax.f32 %v1595_v3, %v1596_v26  ;;  %v1472_v40 = vadd.f32 %v6344_v56, %v1435_v17  ;;  %v1475_v14 = vadd.f32 %v6346_v1, %v1438_v51  ;;  %v6536_v49 = vpop.f32.mrf.mxu2 }
 0x1eb   :  { %5343 = vtanh.f32 %v1474_v18  ;;  %v1473_v55 = vadd.f32 %v6346_v1, %v1436_v22  ;;  %v1590_v50 = vmax.f32 %v1588_v20, %v1589_v25  ;;  %v6538_v60 = vpop.f32.mrf.mxu3 }
 0x1ec   :  { %5345 = vtanh.f32 %v1472_v40  ;;  %v1243_v57 = vpop.f32.mrf.mxu0  ;;  %v1598_v9 = vrot.slane %v1597_v61, 2  ;;  %v5070_v40 = vld [vmem:[%s7899_s8 + $0x50] sm:$0xf] }
 0x1ed   :  { %5347 = vtanh.f32 %v1473_v55  ;;  %v1292_v28 = vpop.f32.mrf.mxu1  ;;  %v1591_v46 = vrot.slane %v1590_v50, 1  ;;  %v1371_v22 = vrot.slane %v1243_v57, 2 }
 0x1ee   :  { %5349 = vtanh.f32 %v1475_v14  ;;  %v1599_v0 = vmax.f32 %v1597_v61, %v1598_v9  ;;  %4922 = vmatmul.msk.bf16.gmra.mxu0 %vm134_vm0, %v6260_v59  ;;  %v1374_v17 = vrot.slane %v1292_v28, 2 }
 0x1ef   :  { %v1592_v37 = vmax.f32 %v1590_v50, %v1591_v46  ;;  %4930 = vmatmul.msk.bf16.gmra.mxu1 %vm134_vm0, %v6260_v59  ;;  %4954 = vmatmul.msk.bf16.gmra.mxu2 %vm134_vm0, %v6260_v59  ;;  %v5213_v50 = vld [vmem:[%s7899_s8 + $0x54] sm:$0xf0] }
 0x1f0   :  { %v1600_v24 = vrot.slane %v1599_v0, 1  ;;  %4962 = vmatmul.msk.bf16.gmra.mxu3 %vm134_vm0, %v6260_v59  ;;  %v5071_v28 = vor.u32 %v5213_v50, %v5070_v40  ;;  %v5209_v46 = vld [vmem:[%s7899_s8 + $0x34] sm:$0xf0]  ;;  %v5208_v50 = vld [vmem:[%s7899_s8 + $0x34] sm:$0xf] }
 0x1f1   :  { %v5344_v38 = vpop.eup %5343  ;;  %v6549_v42 = vsel %vm4263_vm7, %v1592_v37, %v4298_v5 }
 0x1f2   :  { %v5346_v7 = vpop.eup %5345  ;;  %v1602_v62 = vsel %vm1334_vm11, %v5344_v38, -inf  ;;  %v1601_v3 = vmax.f32 %v1599_v0, %v1600_v24  ;;  %v6552_v47 = vpop.f32.mrf.mxu2  ;;  %3272 = vmatpush.bf16.msrb.mxu2 %v5071_v28 }
 0x1f3   :  { %v5348_v4 = vpop.eup %5347  ;;  %v1603_v20 = vmax.f32 %v5346_v7, %v1602_v62  ;;  %v6555_v2 = vpop.f32.mrf.mxu3 }
 0x1f4   :  { %v5350_v52 = vpop.eup %5349  ;;  %v1610_v26 = vsel %vm629_vm2, %v5348_v4, -inf  ;;  %v1245_v51 = vpop.f32.mrf.mxu0  ;;  %v6558_v59 = vsel %vm4263_vm7, %v1601_v3, %v4305_v43  ;;  %v5038_v43 = vld [vmem:[%s7899_s8 + $0x30] sm:$0xf] }
 0x1f5   :  { %v1604_v5 = vrot.slane %v1603_v20, 4  ;;  %v1611_v18 = vsel %vm1525_vm12, %v5350_v52, -inf  ;;  %v1372_v25 = vrot.slane %v1245_v51, 2  ;;  %v1294_v61 = vpop.f32.mrf.mxu1  ;;  %v5039_v4 = vor.u32 %v5209_v46, %v5038_v43  ;;  %v5040_v43 = vld [vmem:[%s7899_s8 + $0x38] sm:$0xf0] }
 0x1f6   :  { %v1612_v14 = vmax.f32 %v1610_v26, %v1611_v18  ;;  %v1375_v55 = vrot.slane %v1294_v61, 2  ;;  %v5043_v28 = vor.u32 %v5208_v50, %v5040_v43 }
 0x1f7   :  { %v1373_v9 = vsel %vm1334_vm11, %v1371_v22, %v1372_v25  ;;  %v1441_v57 = vadd.f32 %v1372_v25, %v6285_v29  ;;  %v1605_v0 = vmax.f32 %v1603_v20, %v1604_v5  ;;  %v5212_v29 = vld [vmem:[%s7899_s8 + $0x54] sm:$0xf]  ;;  %v5072_v20 = vld [vmem:[%s7899_s8 + $0x58] sm:$0xf0]  ;;  %3010 = vmatpush.bf16.msrb.mxu0 %v5039_v4 }
 0x1f8   :  { %v1613_v37 = vrot.slane %v1612_v14, 4  ;;  %v1439_v24 = vadd.f32 %v1373_v9, %v6287_v30  ;;  %v1376_v38 = vsel %vm1334_vm11, %v1374_v17, %v1375_v55  ;;  %v1442_v7 = vadd.f32 %v1375_v55, %v6290_v36  ;;  %3059 = vmatpush.bf16.msrb.mxu1 %v5043_v28 }
 0x1f9   :  { %v1478_v62 = vadd.f32 %v6344_v56, %v1441_v57  ;;  %v1440_v3 = vadd.f32 %v1376_v38, %v6299_v45  ;;  %v1606_v52 = vrot.slane %v1605_v0, 2  ;;  %v5075_v36 = vor.u32 %v5212_v29, %v5072_v20 }
 0x1fa   :  { %v1476_v30 = vadd.f32 %v6344_v56, %v1439_v24  ;;  %v1479_v26 = vadd.f32 %v6346_v1, %v1442_v7  ;;  %v1614_v17 = vmax.f32 %v1612_v14, %v1613_v37  ;;  %v6589_v51 = vpop.f32.mrf.mxu2 }
 0x1fb   :  { %5351 = vtanh.f32 %v1478_v62  ;;  %v1477_v45 = vadd.f32 %v6346_v1, %v1440_v3  ;;  %v1607_v5 = vmax.f32 %v1605_v0, %v1606_v52  ;;  %v6591_v18 = vpop.f32.mrf.mxu3  ;;  %3321 = vmatpush.bf16.msrb.mxu3 %v5075_v36 }
 0x1fc   :  { %5353 = vtanh.f32 %v1476_v30  ;;  %v1248_v22 = vpop.f32.mrf.mxu0  ;;  %v1615_v25 = vrot.slane %v1614_v17, 2 }
 0x1fd   :  { %5355 = vtanh.f32 %v1477_v45  ;;  %v1297_v61 = vpop.f32.mrf.mxu1  ;;  %v1608_v40 = vrot.slane %v1607_v5, 1  ;;  %v1377_v30 = vrot.slane %v1248_v22, 2 }
 0x1fe   :  { %5357 = vtanh.f32 %v1479_v26  ;;  %v1616_v55 = vmax.f32 %v1614_v17, %v1615_v25  ;;  %4923 = vmatmul.msk.bf16.gmra.mxu0 %vm134_vm0, %v6295_v44  ;;  %v1380_v29 = vrot.slane %v1297_v61, 2 }
 0x1ff   :  { %v1609_v14 = vmax.f32 %v1607_v5, %v1608_v40  ;;  %4931 = vmatmul.msk.bf16.gmra.mxu1 %vm134_vm0, %v6295_v44  ;;  %4955 = vmatmul.msk.bf16.gmra.mxu2 %vm134_vm0, %v6295_v44 }
 0x200   :  { %v1617_v9 = vrot.slane %v1616_v55, 1  ;;  %4963 = vmatmul.msk.bf16.gmra.mxu3 %vm134_vm0, %v6295_v44 }
 0x201   :  { %v5352_v57 = vpop.eup %5351  ;;  %v4300_v46 = vsel %vm4265_vm8, %v1609_v14, %v6549_v42 }
 0x202   :  { %v5354_v0 = vpop.eup %5353  ;;  %v1619_v37 = vsel %vm1334_vm11, %v5352_v57, -inf  ;;  %v1618_v24 = vmax.f32 %v1616_v55, %v1617_v9  ;;  %v6610_v62 = vpop.f32.mrf.mxu2 }
 0x203   :  { %v5356_v38 = vpop.eup %5355  ;;  %v1620_v7 = vmax.f32 %v5354_v0, %v1619_v37  ;;  %v6613_v20 = vpop.f32.mrf.mxu3 }
 0x204   :  { %v5358_v3 = vpop.eup %5357  ;;  %v1627_v4 = vsel %vm629_vm2, %v5356_v38, -inf  ;;  %v1250_v44 = vpop.f32.mrf.mxu0  ;;  %v4307_v52 = vsel %vm4265_vm8, %v1618_v24, %v6558_v59 }
 0x205   :  { %v1628_v42 = vsel %vm1525_vm12, %v5358_v3, -inf  ;;  %v1378_v26 = vrot.slane %v1250_v44, 2  ;;  %v1299_v36 = vpop.f32.mrf.mxu1  ;;  %v1621_v17 = vrot.slane %v1620_v7, 4 }
 0x206   :  { %v1629_v45 = vmax.f32 %v1627_v4, %v1628_v42  ;;  %v1381_v5 = vrot.slane %v1299_v36, 2 }
 0x207   :  { %v1379_v25 = vsel %vm1334_vm11, %v1377_v30, %v1378_v26  ;;  %v1445_v40 = vadd.f32 %v1378_v26, %v6308_v11  ;;  %v1622_v55 = vmax.f32 %v1620_v7, %v1621_v17 }
 0x208   :  { %v1443_v61 = vadd.f32 %v1379_v25, %v6310_v12  ;;  %v1382_v14 = vsel %vm1334_vm11, %v1380_v29, %v1381_v5  ;;  %v1446_v50 = vadd.f32 %v1381_v5, %v6313_v19  ;;  %v1630_v59 = vrot.slane %v1629_v45, 4 }
 0x209   :  { %v1482_v43 = vadd.f32 %v6344_v56, %v1445_v40  ;;  %v1444_v22 = vadd.f32 %v1382_v14, %v6317_v16  ;;  %v1623_v9 = vrot.slane %v1622_v55, 2 }
 0x20a   :  { %v1480_v57 = vadd.f32 %v6344_v56, %v1443_v61  ;;  %v1483_v28 = vadd.f32 %v6346_v1, %v1446_v50  ;;  %v1631_v0 = vmax.f32 %v1629_v45, %v1630_v59  ;;  %v6628_v37 = vpop.f32.mrf.mxu2  ;;  %v6635_v56 = vld [vmem:[%s7891_s0] sm:$0xff] }
 0x20b   :  { %5359 = vtanh.f32 %v1482_v43  ;;  %v1481_v11 = vadd.f32 %v6346_v1, %v1444_v22  ;;  %v1624_v12 = vmax.f32 %v1622_v55, %v1623_v9  ;;  %v6630_v24 = vpop.f32.mrf.mxu3 }
 0x20c   :  { %5361 = vtanh.f32 %v1480_v57  ;;  %v1849_v19 = vpop.f32.mrf.mxu0  ;;  %v1632_v38 = vrot.slane %v1631_v0, 2 }
 0x20d   :  { %5363 = vtanh.f32 %v1481_v11  ;;  %v1898_v7 = vpop.f32.mrf.mxu1  ;;  %v1625_v16 = vrot.slane %v1624_v12, 1  ;;  %v1970_v59 = vrot.slane %v1849_v19, 1 }
 0x20e   :  { %5365 = vtanh.f32 %v1483_v28  ;;  %v1633_v3 = vmax.f32 %v1631_v0, %v1632_v38  ;;  %4980 = vmatmul.msk.bf16.vlgmr.msra.gmra.mxu0 %vm134_vm0, %v6635_v56  ;;  %v1973_v25 = vrot.slane %v1898_v7, 1 }
 0x20f   :  { %v1626_v1 = vmax.f32 %v1624_v12, %v1625_v16  ;;  %4988 = vmatmul.msk.bf16.vlgmr.msra.gmra.mxu1 %vm134_vm0, %v6635_v56  ;;  %5012 = vmatmul.msk.bf16.vlgmr.msra.gmra.mxu2 %vm134_vm0, %v6635_v56 }
 0x210   :  { %v1634_v4 = vrot.slane %v1633_v3, 1  ;;  %5020 = vmatmul.msk.bf16.vlgmr.msra.gmra.mxu3 %vm134_vm0, %v6635_v56 }
 0x211   :  { %v5360_v29 = vpop.eup %5359  ;;  %v4301_v44 = vsel %vm4267_vm9, %v1626_v1, %v4300_v46 }
 0x212   :  { %v5362_v42 = vpop.eup %5361  ;;  %v1636_v30 = vsel %vm1334_vm11, %v5360_v29, -inf  ;;  %v1635_v26 = vmax.f32 %v1633_v3, %v1634_v4  ;;  %v2111_v17 = vpop.f32.mrf.mxu2 }
 0x213   :  { %v5364_v36 = vpop.eup %5363  ;;  %v1637_v45 = vmax.f32 %v5362_v42, %v1636_v30  ;;  %v2160_v40 = vpop.f32.mrf.mxu3 }
 0x214   :  { %v5366_v5 = vpop.eup %5365  ;;  %v1851_v55 = vpop.f32.mrf.mxu0  ;;  %v1644_v61 = vsel %vm629_vm2, %v5364_v36, -inf  ;;  %v4308_v14 = vsel %vm4267_vm9, %v1635_v26, %v4307_v52  ;;  %v2235_v16 = vrot.slane %v2160_v40, 2  ;;  %v2232_v52 = vrot.slane %v2111_v17, 2 }
 0x215   :  { %v1645_v50 = vsel %vm1525_vm12, %v5366_v5, -inf  ;;  %v1971_v43 = vrot.slane %v1851_v55, 1  ;;  %v1900_v46 = vpop.f32.mrf.mxu1  ;;  %v1638_v22 = vrot.slane %v1637_v45, 4  ;;  %vm4111_vm12 = vcmask 175104  }
 0x216   :  { %v1974_v9 = vrot.slane %v1900_v46, 1  ;;  %v1646_v57 = vmax.f32 %v1644_v61, %v1645_v50 }
 0x217   :  { %v1972_v28 = vsel %vm439_vm1, %v1970_v59, %v1971_v43  ;;  %v1639_v0 = vmax.f32 %v1637_v45, %v1638_v22  ;;  %v2052_v4 = vadd.f32 %v1971_v43, %v6358_v23 }
 0x218   :  { %v1975_v11 = vsel %vm439_vm1, %v1973_v25, %v1974_v9  ;;  %v1647_v12 = vrot.slane %v1646_v57, 4  ;;  %v2050_v26 = vadd.f32 %v1972_v28, %v6337_v21  ;;  %v2053_v36 = vadd.f32 %v1974_v9, %v6360_v35  ;;  %v6667_v21 = vld [vmem:[%s7891_s0 + $0x8] sm:$0xff] }
 0x219   :  { %v1640_v38 = vrot.slane %v1639_v0, 2  ;;  %v2051_v55 = vadd.f32 %v1975_v11, %v6342_v34 }
 0x21a   :  { %v1648_v7 = vmax.f32 %v1646_v57, %v1647_v12  ;;  %v2113_v3 = vpop.f32.mrf.mxu2 }
 0x21b   :  { %v1641_v1 = vmax.f32 %v1639_v0, %v1640_v38  ;;  %v2233_v19 = vrot.slane %v2113_v3, 2  ;;  %v2162_v29 = vpop.f32.mrf.mxu3 }
 0x21c   :  { %v1854_v42 = vpop.f32.mrf.mxu0  ;;  %v1649_v30 = vrot.slane %v1648_v7, 2  ;;  %v2236_v45 = vrot.slane %v2162_v29, 2 }
 0x21d   :  { %v1903_v5 = vpop.f32.mrf.mxu1  ;;  %v1642_v25 = vrot.slane %v1641_v1, 1  ;;  %v2234_v40 = vsel %vm1334_vm11, %v2232_v52, %v2233_v19  ;;  %v6657_v61 = vadd.f32 %v2233_v19, %v2052_v4  ;;  %v1976_v12 = vrot.slane %v1854_v42, 1 }
 0x21e   :  { %v1650_v17 = vmax.f32 %v1648_v7, %v1649_v30  ;;  %v6659_v50 = vadd.f32 %v2234_v40, %v2050_v26  ;;  %v2237_v23 = vsel %vm1334_vm11, %v2235_v16, %v2236_v45  ;;  %v6662_v59 = vadd.f32 %v2236_v45, %v2053_v36  ;;  %4981 = vmatmul.msk.bf16.gmra.mxu0 %vm134_vm0, %v6667_v21 }
 0x21f   :  { %v1643_v34 = vmax.f32 %v1641_v1, %v1642_v25  ;;  %v6671_v35 = vadd.f32 %v2237_v23, %v2051_v55  ;;  %4989 = vmatmul.msk.bf16.gmra.mxu1 %vm134_vm0, %v6667_v21  ;;  %5013 = vmatmul.msk.bf16.gmra.mxu2 %vm134_vm0, %v6667_v21  ;;  %v1979_v57 = vrot.slane %v1903_v5, 1 }
 0x220   :  { %v1651_v43 = vrot.slane %v1650_v17, 1  ;;  %5021 = vmatmul.msk.bf16.gmra.mxu3 %vm134_vm0, %v6667_v21 }
 0x221   :  { %v4302_v46 = vsel %vm4269_vm10, %v1643_v34, %v4301_v44  ;;  %v5211_v34 = vld [vmem:[%s7899_s8 + $0x44] sm:$0xf0] }
 0x222   :  { %v1652_v22 = vmax.f32 %v1650_v17, %v1651_v43  ;;  %v2116_v9 = vpop.f32.mrf.mxu2 }
 0x223   :  { %v2165_v28 = vpop.f32.mrf.mxu3  ;;  %v2238_v19 = vrot.slane %v2116_v9, 2 }
 0x224   :  { %v1856_v0 = vpop.f32.mrf.mxu0  ;;  %v4309_v11 = vsel %vm4269_vm10, %v1652_v22, %v4308_v14  ;;  %v2241_v4 = vrot.slane %v2165_v28, 2 }
 0x225   :  { %v1977_v38 = vrot.slane %v1856_v0, 1  ;;  %v1905_v7 = vpop.f32.mrf.mxu1  ;;  %v5227_v16 = vpack.i.bf16 %v4309_v11, %v4302_v46 }
 0x226   :  { %v1980_v3 = vrot.slane %v1905_v7, 1 }
 0x227   :  { %v1978_v1 = vsel %vm439_vm1, %v1976_v12, %v1977_v38  ;;  %5228 = vrot.lane.b32.xlu0 %v5227_v16, %s5545_s27  ;;  %v2056_v29 = vadd.f32 %v1977_v38, %v6387_v15  ;;  %v5030_v12 = vld [vmem:[%s7899_s8 + $0x20] sm:$0xf]  ;;  %v5207_v38 = vld [vmem:[%s7899_s8 + $0x24] sm:$0xf0] }
 0x228   :  { %v1981_v52 = vsel %vm439_vm1, %v1979_v57, %v1980_v3  ;;  %v2054_v14 = vadd.f32 %v1978_v1, %v6371_v48  ;;  %v2057_v42 = vadd.f32 %v1980_v3, %v6389_v32  ;;  %v6698_v48 = vld [vmem:[%s7891_s0 + $0x10] sm:$0xff]  ;;  %v5031_v16 = vor.u32 %v5207_v38, %v5030_v12 }
 0x229   :  { %v2055_v25 = vadd.f32 %v1981_v52, %v6374_v6  ;;  %v5062_v6 = vld [vmem:[%s7899_s8 + $0x40] sm:$0xf]  ;;  %v5210_v52 = vld [vmem:[%s7899_s8 + $0x44] sm:$0xf] }
 0x22a   :  { %v2118_v44 = vpop.f32.mrf.mxu2  ;;  %v5063_v43 = vor.u32 %v5211_v34, %v5062_v6  ;;  %3011 = vmatpush.bf16.msrb.mxu0 %v5031_v16  ;;  %v7911_v6 = vld [vmem:[#allocation8_spill] sm:$0xff] }
 0x22b   :  { %v2239_v30 = vrot.slane %v2118_v44, 2  ;;  %v2167_v26 = vpop.f32.mrf.mxu3 }
 0x22c   :  { %v1859_v36 = vpop.f32.mrf.mxu0  ;;  %v2242_v45 = vrot.slane %v2167_v26, 2  ;;  %3273 = vmatpush.bf16.msrb.mxu2 %v5063_v43 }
 0x22d   :  { %v1908_v5 = vpop.f32.mrf.mxu1  ;;  %v2240_v55 = vsel %vm1334_vm11, %v2238_v19, %v2239_v30  ;;  %v6688_v40 = vadd.f32 %v2239_v30, %v2056_v29  ;;  %v1982_v28 = vrot.slane %v1859_v36, 1 }
 0x22e   :  { %v6690_v17 = vadd.f32 %v2240_v55, %v2054_v14  ;;  %v2243_v23 = vsel %vm1334_vm11, %v2241_v4, %v2242_v45  ;;  %v6693_v15 = vadd.f32 %v2242_v45, %v2057_v42  ;;  %4982 = vmatmul.msk.bf16.gmra.mxu0 %vm134_vm0, %v6698_v48  ;;  %v1985_v22 = vrot.slane %v1908_v5, 1  ;;  %v5064_v4 = vld [vmem:[%s7899_s8 + $0x48] sm:$0xf0]  ;;  %v7910_v45 = vld [vmem:[#allocation7_spill] sm:$0xff] }
 0x22f   :  { %v6702_v32 = vadd.f32 %v2243_v23, %v2055_v25  ;;  %4990 = vmatmul.msk.bf16.gmra.mxu1 %vm134_vm0, %v6698_v48  ;;  %5014 = vmatmul.msk.bf16.gmra.mxu2 %vm134_vm0, %v6698_v48  ;;  %v5067_v44 = vor.u32 %v5210_v52, %v5064_v4 }
 0x230   :  { %5022 = vmatmul.msk.bf16.gmra.mxu3 %vm134_vm0, %v6698_v48 }
 0x231   :  { %3322 = vmatpush.bf16.msrb.mxu3 %v5067_v44 }
 0x232   :  { %v2121_v46 = vpop.f32.mrf.mxu2 }
 0x233   :  { %v2170_v9 = vpop.f32.mrf.mxu3  ;;  %v2244_v30 = vrot.slane %v2121_v46, 2 }
 0x234   :  { %v1861_v57 = vpop.f32.mrf.mxu0  ;;  %v2247_v19 = vrot.slane %v2170_v9, 2 }
 0x235   :  { %v1983_v0 = vrot.slane %v1861_v57, 1  ;;  %v1910_v11 = vpop.f32.mrf.mxu1  ;;  %v6745_v57 = vld [vmem:[%s7891_s0 + $0x18] sm:$0xff] }
 0x236   :  { %v1986_v7 = vrot.slane %v1910_v11, 1 }
 0x237   :  { %v1984_v3 = vsel %vm439_vm1, %v1982_v28, %v1983_v0  ;;  %v2060_v26 = vadd.f32 %v1983_v0, %v6416_v31  ;;  %v5206_v28 = vld [vmem:[%s7899_s8 + $0x24] sm:$0xf]  ;;  %v5032_v0 = vld [vmem:[%s7899_s8 + $0x28] sm:$0xf0] }
 0x238   :  { %v1987_v1 = vsel %vm439_vm1, %v1985_v22, %v1986_v7  ;;  %v2058_v5 = vadd.f32 %v1984_v3, %v7910_v45  ;;  %v2061_v25 = vadd.f32 %v1986_v7, %v6418_v39  ;;  %v5035_v11 = vor.u32 %v5206_v28, %v5032_v0 }
 0x239   :  { %v2059_v34 = vadd.f32 %v1987_v1, %v7911_v6 }
 0x23a   :  { %v2123_v29 = vpop.f32.mrf.mxu2  ;;  %3060 = vmatpush.bf16.msrb.mxu1 %v5035_v11 }
 0x23b   :  { %v2245_v36 = vrot.slane %v2123_v29, 2  ;;  %v2172_v14 = vpop.f32.mrf.mxu3 }
 0x23c   :  { %v1864_v42 = vpop.f32.mrf.mxu0  ;;  %v2248_v55 = vrot.slane %v2172_v14, 2 }
 0x23d   :  { %v1913_v23 = vpop.f32.mrf.mxu1  ;;  %v2246_v43 = vsel %vm1334_vm11, %v2244_v30, %v2245_v36  ;;  %v6735_v22 = vadd.f32 %v2245_v36, %v2060_v26  ;;  %v1988_v3 = vrot.slane %v1864_v42, 1 }
 0x23e   :  { %v6737_v9 = vadd.f32 %v2246_v43, %v2058_v5  ;;  %v2249_v31 = vsel %vm1334_vm11, %v2247_v19, %v2248_v55  ;;  %v6740_v46 = vadd.f32 %v2248_v55, %v2061_v25  ;;  %4983 = vmatmul.msk.bf16.gmra.mxu0 %vm134_vm0, %v6745_v57  ;;  %v1991_v38 = vrot.slane %v1913_v23, 1 }
 0x23f   :  { %v6749_v39 = vadd.f32 %v2249_v31, %v2059_v34  ;;  %4991 = vmatmul.msk.bf16.gmra.mxu1 %vm134_vm0, %v6745_v57  ;;  %5015 = vmatmul.msk.bf16.gmra.mxu2 %vm134_vm0, %v6745_v57 }
 0x240   :  { %5023 = vmatmul.msk.bf16.gmra.mxu3 %vm134_vm0, %v6745_v57 }
 0x242   :  { %v2126_v12 = vpop.f32.mrf.mxu2 }
 0x243   :  { %v2175_v7 = vpop.f32.mrf.mxu3  ;;  %v2250_v26 = vrot.slane %v2126_v12, 2 }
 0x244   :  { %v1866_v16 = vpop.f32.mrf.mxu0  ;;  %v2253_v29 = vrot.slane %v2175_v7, 2 }
 0x245   :  { %v1989_v1 = vrot.slane %v1866_v16, 1  ;;  %v1915_v52 = vpop.f32.mrf.mxu1 }
 0x246   :  { %v1992_v4 = vrot.slane %v1915_v52, 1 }
 0x247   :  { %v1990_v44 = vsel %vm439_vm1, %v1988_v3, %v1989_v1  ;;  %v2064_v36 = vadd.f32 %v1989_v1, %v6470_v33 }
 0x248   :  { %v1993_v19 = vsel %vm439_vm1, %v1991_v38, %v1992_v4  ;;  %v2062_v25 = vadd.f32 %v1990_v44, %v6444_v54  ;;  %v2065_v55 = vadd.f32 %v1992_v4, %v6475_v8  ;;  %v6780_v54 = vld [vmem:[%s7891_s0 + $0x20] sm:$0xff] }
 0x249   :  { %v2063_v6 = vadd.f32 %v1993_v19, %v6447_v41 }
 0x24a   :  { %v2128_v30 = vpop.f32.mrf.mxu2 }
 0x24b   :  { %v2251_v14 = vrot.slane %v2128_v30, 2  ;;  %v2177_v45 = vpop.f32.mrf.mxu3 }
 0x24c   :  { %v1869_v5 = vpop.f32.mrf.mxu0  ;;  %v2254_v42 = vrot.slane %v2177_v45, 2 }
 0x24d   :  { %v1918_v23 = vpop.f32.mrf.mxu1  ;;  %v2252_v34 = vsel %vm1334_vm11, %v2250_v26, %v2251_v14  ;;  %v6770_v43 = vadd.f32 %v2251_v14, %v2064_v36  ;;  %v1994_v38 = vrot.slane %v1869_v5, 1 }
 0x24e   :  { %v6772_v31 = vadd.f32 %v2252_v34, %v2062_v25  ;;  %v2255_v28 = vsel %vm1334_vm11, %v2253_v29, %v2254_v42  ;;  %v6775_v33 = vadd.f32 %v2254_v42, %v2065_v55  ;;  %4984 = vmatmul.msk.bf16.gmra.mxu0 %vm134_vm0, %v6780_v54  ;;  %v1997_v0 = vrot.slane %v1918_v23, 1 }
 0x24f   :  { %v6784_v8 = vadd.f32 %v2255_v28, %v2063_v6  ;;  %4992 = vmatmul.msk.bf16.gmra.mxu1 %vm134_vm0, %v6780_v54  ;;  %5016 = vmatmul.msk.bf16.gmra.mxu2 %vm134_vm0, %v6780_v54 }
 0x250   :  { %5024 = vmatmul.msk.bf16.gmra.mxu3 %vm134_vm0, %v6780_v54 }
 0x252   :  { %v2131_v41 = vpop.f32.mrf.mxu2 }
 0x253   :  { %v2180_v11 = vpop.f32.mrf.mxu3  ;;  %v2256_v19 = vrot.slane %v2131_v41, 2 }
 0x254   :  { %v1871_v12 = vpop.f32.mrf.mxu0  ;;  %v2259_v4 = vrot.slane %v2180_v11, 2 }
 0x255   :  { %v1995_v7 = vrot.slane %v1871_v12, 1  ;;  %v1920_v16 = vpop.f32.mrf.mxu1 }
 0x256   :  { %v1998_v3 = vrot.slane %v1920_v16, 1 }
 0x257   :  { %v1996_v1 = vsel %vm439_vm1, %v1994_v38, %v1995_v7  ;;  %v2068_v29 = vadd.f32 %v1995_v7, %v6505_v27 }
 0x258   :  { %v1999_v52 = vsel %vm439_vm1, %v1997_v0, %v1998_v3  ;;  %v2066_v14 = vadd.f32 %v1996_v1, %v6488_v58  ;;  %v2069_v45 = vadd.f32 %v1998_v3, %v6507_v10  ;;  %v6809_v58 = vld [vmem:[%s7891_s0 + $0x28] sm:$0xff] }
 0x259   :  { %v2067_v55 = vadd.f32 %v1999_v52, %v6491_v53 }
 0x25a   :  { %v2133_v44 = vpop.f32.mrf.mxu2 }
 0x25b   :  { %v2257_v30 = vrot.slane %v2133_v44, 2  ;;  %v2182_v26 = vpop.f32.mrf.mxu3 }
 0x25c   :  { %v1874_v36 = vpop.f32.mrf.mxu0  ;;  %v2260_v5 = vrot.slane %v2182_v26, 2 }
 0x25d   :  { %v1923_v25 = vpop.f32.mrf.mxu1  ;;  %v2258_v42 = vsel %vm1334_vm11, %v2256_v19, %v2257_v30  ;;  %v6799_v23 = vadd.f32 %v2257_v30, %v2068_v29  ;;  %v2000_v11 = vrot.slane %v1874_v36, 1 }
 0x25e   :  { %v6801_v6 = vadd.f32 %v2258_v42, %v2066_v14  ;;  %v2261_v34 = vsel %vm1334_vm11, %v2259_v4, %v2260_v5  ;;  %v6804_v27 = vadd.f32 %v2260_v5, %v2069_v45  ;;  %4985 = vmatmul.msk.bf16.gmra.mxu0 %vm134_vm0, %v6809_v58  ;;  %v2003_v28 = vrot.slane %v1923_v25, 1 }
 0x25f   :  { %v6813_v10 = vadd.f32 %v2261_v34, %v2067_v55  ;;  %4993 = vmatmul.msk.bf16.gmra.mxu1 %vm134_vm0, %v6809_v58  ;;  %5017 = vmatmul.msk.bf16.gmra.mxu2 %vm134_vm0, %v6809_v58 }
 0x260   :  { %5025 = vmatmul.msk.bf16.gmra.mxu3 %vm134_vm0, %v6809_v58 }
 0x262   :  { %v2136_v53 = vpop.f32.mrf.mxu2 }
 0x263   :  { %v2185_v41 = vpop.f32.mrf.mxu3  ;;  %v2262_v4 = vrot.slane %v2136_v53, 2  ;;  %v5221_v53 = vld [vmem:[%s7899_s8 + $0x94] sm:$0xf0] }
 0x264   :  { %v1876_v0 = vpop.f32.mrf.mxu0  ;;  %v2265_v1 = vrot.slane %v2185_v41, 2 }
 0x265   :  { %v2001_v12 = vrot.slane %v1876_v0, 1  ;;  %v1925_v38 = vpop.f32.mrf.mxu1 }
 0x266   :  { %v2004_v7 = vrot.slane %v1925_v38, 1  ;;  %v5102_v38 = vld [vmem:[%s7899_s8 + $0x70] sm:$0xf] }
 0x267   :  { %v2002_v16 = vsel %vm439_vm1, %v2000_v11, %v2001_v12  ;;  %v2072_v44 = vadd.f32 %v2001_v12, %v6536_v49 }
 0x268   :  { %v2005_v3 = vsel %vm439_vm1, %v2003_v28, %v2004_v7  ;;  %v2070_v26 = vadd.f32 %v2002_v16, %v6519_v63  ;;  %v2073_v14 = vadd.f32 %v2004_v7, %v6538_v60  ;;  %v6838_v63 = vld [vmem:[%s7891_s0 + $0x30] sm:$0xff]  ;;  %v5217_v7 = vld [vmem:[%s7899_s8 + $0x74] sm:$0xf0] }
 0x269   :  { %v2071_v5 = vadd.f32 %v2005_v3, %v6522_v13  ;;  %v5134_v13 = vld [vmem:[%s7899_s8 + $0x90] sm:$0xf] }
 0x26a   :  { %v2138_v52 = vpop.f32.mrf.mxu2  ;;  %v5135_v28 = vor.u32 %v5221_v53, %v5134_v13 }
 0x26b   :  { %v2263_v19 = vrot.slane %v2138_v52, 2  ;;  %v2187_v29 = vpop.f32.mrf.mxu3  ;;  %v5103_v52 = vor.u32 %v5217_v7, %v5102_v38 }
 0x26c   :  { %v1879_v30 = vpop.f32.mrf.mxu0  ;;  %v2266_v36 = vrot.slane %v2187_v29, 2  ;;  %3796 = vmatpush.bf16.msra.mxu2 %v5135_v28 }
 0x26d   :  { %v1928_v45 = vpop.f32.mrf.mxu1  ;;  %v2264_v25 = vsel %vm1334_vm11, %v2262_v4, %v2263_v19  ;;  %v6828_v55 = vadd.f32 %v2263_v19, %v2072_v44  ;;  %v2006_v16 = vrot.slane %v1879_v30, 1  ;;  %3534 = vmatpush.bf16.msra.mxu0 %v5103_v52 }
 0x26e   :  { %v6830_v42 = vadd.f32 %v2264_v25, %v2070_v26  ;;  %v2267_v34 = vsel %vm1334_vm11, %v2265_v1, %v2266_v36  ;;  %v6833_v49 = vadd.f32 %v2266_v36, %v2073_v14  ;;  %4986 = vmatmul.msk.bf16.gmra.mxu0 %vm134_vm0, %v6838_v63  ;;  %v2009_v0 = vrot.slane %v1928_v45, 1 }
 0x26f   :  { %v6842_v60 = vadd.f32 %v2267_v34, %v2071_v5  ;;  %4994 = vmatmul.msk.bf16.gmra.mxu1 %vm134_vm0, %v6838_v63  ;;  %5018 = vmatmul.msk.bf16.gmra.mxu2 %vm134_vm0, %v6838_v63 }
 0x270   :  { %5026 = vmatmul.msk.bf16.gmra.mxu3 %vm134_vm0, %v6838_v63 }
 0x272   :  { %v2141_v41 = vpop.f32.mrf.mxu2 }
 0x273   :  { %v2190_v11 = vpop.f32.mrf.mxu3  ;;  %v2268_v14 = vrot.slane %v2141_v41, 2 }
 0x274   :  { %v1881_v12 = vpop.f32.mrf.mxu0  ;;  %v2271_v29 = vrot.slane %v2190_v11, 2 }
 0x275   :  { %v2007_v3 = vrot.slane %v1881_v12, 1  ;;  %v1930_v1 = vpop.f32.mrf.mxu1 }
 0x276   :  { %v2010_v4 = vrot.slane %v1930_v1, 1 }
 0x277   :  { %v2008_v44 = vsel %vm439_vm1, %v2006_v16, %v2007_v3  ;;  %v2076_v36 = vadd.f32 %v2007_v3, %v6589_v51 }
 0x278   :  { %v2011_v19 = vsel %vm439_vm1, %v2009_v0, %v2010_v4  ;;  %v2074_v34 = vadd.f32 %v2008_v44, %v6552_v47  ;;  %v2077_v30 = vadd.f32 %v2010_v4, %v6591_v18  ;;  %v6879_v47 = vld [vmem:[%s7891_s0 + $0x38] sm:$0xff] }
 0x279   :  { %v2075_v28 = vadd.f32 %v2011_v19, %v6555_v2 }
 0x27a   :  { %v2143_v26 = vpop.f32.mrf.mxu2 }
 0x27b   :  { %v2269_v45 = vrot.slane %v2143_v26, 2  ;;  %v2192_v5 = vpop.f32.mrf.mxu3 }
 0x27c   :  { %v1884_v25 = vpop.f32.mrf.mxu0  ;;  %v2272_v13 = vrot.slane %v2192_v5, 2 }
 0x27d   :  { %v1933_v53 = vpop.f32.mrf.mxu1  ;;  %v2270_v12 = vsel %vm1334_vm11, %v2268_v14, %v2269_v45  ;;  %v6869_v38 = vadd.f32 %v2269_v45, %v2076_v36  ;;  %v2012_v3 = vrot.slane %v1884_v25, 1 }
 0x27e   :  { %v6871_v0 = vadd.f32 %v2270_v12, %v2074_v34  ;;  %v2273_v41 = vsel %vm1334_vm11, %v2271_v29, %v2272_v13  ;;  %v6874_v51 = vadd.f32 %v2272_v13, %v2077_v30  ;;  %4987 = vmatmul.msk.bf16.gmra.mxu0 %vm134_vm0, %v6879_v47  ;;  %v2015_v11 = vrot.slane %v1933_v53, 1 }
 0x27f   :  { %v6883_v18 = vadd.f32 %v2273_v41, %v2075_v28  ;;  %4995 = vmatmul.msk.bf16.gmra.mxu1 %vm134_vm0, %v6879_v47  ;;  %5019 = vmatmul.msk.bf16.gmra.mxu2 %vm134_vm0, %v6879_v47 }
 0x280   :  { %5027 = vmatmul.msk.bf16.gmra.mxu3 %vm134_vm0, %v6879_v47 }
 0x282   :  { %v2146_v2 = vpop.f32.mrf.mxu2 }
 0x283   :  { %v2195_v7 = vpop.f32.mrf.mxu3  ;;  %v2274_v14 = vrot.slane %v2146_v2, 2 }
 0x284   :  { %v1886_v16 = vpop.f32.mrf.mxu0  ;;  %v2277_v29 = vrot.slane %v2195_v7, 2  ;;  %v5136_v7 = vld [vmem:[%s7899_s8 + $0x98] sm:$0xf0] }
 0x285   :  { %v2013_v1 = vrot.slane %v1886_v16, 1  ;;  %v1935_v52 = vpop.f32.mrf.mxu1  ;;  %v5216_v16 = vld [vmem:[%s7899_s8 + $0x74] sm:$0xf] }
 0x286   :  { %v2016_v4 = vrot.slane %v1935_v52, 1 }
 0x287   :  { %v2014_v44 = vsel %vm439_vm1, %v2012_v3, %v2013_v1  ;;  %v2080_v36 = vadd.f32 %v2013_v1, %v6628_v37 }
 0x288   :  { %v2017_v19 = vsel %vm439_vm1, %v2015_v11, %v2016_v4  ;;  %v2078_v30 = vadd.f32 %v2014_v44, %v6610_v62  ;;  %v2081_v13 = vadd.f32 %v2016_v4, %v6630_v24  ;;  %v5220_v24 = vld [vmem:[%s7899_s8 + $0x94] sm:$0xf] }
 0x289   :  { %v2079_v28 = vadd.f32 %v2017_v19, %v6613_v20  ;;  %v1669_v20 = vld [vmem:[%s7898_s7] sm:$0x3]  ;;  %v5139_v1 = vor.u32 %v5220_v24, %v5136_v7  ;;  %s4667_s7 = sshll.u32 %s7905_s14, 4  ;;  %s4668_s7 = int_to_ptr.hbm [resolvable:$true] %s4667_s7 }
 0x28a   :  { %v2148_v26 = vpop.f32.mrf.mxu2 }
 0x28b   :  { %v2275_v45 = vrot.slane %v2148_v26, 2  ;;  %v2197_v5 = vpop.f32.mrf.mxu3  ;;  %3845 = vmatpush.bf16.msra.mxu3 %v5139_v1 }
 0x28c   :  { %v2373_v34 = vpop.f32.mrf.mxu0  ;;  %v2278_v25 = vrot.slane %v2197_v5, 2  ;;  %v6936_v5 = vperm.slane %v1669_v20, 1 }
 0x28d   :  { %v2422_v53 = vpop.f32.mrf.mxu1  ;;  %v2276_v12 = vsel %vm1334_vm11, %v2274_v14, %v2275_v45  ;;  %v6898_v41 = vadd.f32 %v2275_v45, %v2080_v36  ;;  %v6934_v14 = vperm.slane %v1669_v20, 0 }
 0x28e   :  { %v6900_v11 = vadd.f32 %v2276_v12, %v2078_v30  ;;  %v2279_v2 = vsel %vm1334_vm11, %v2277_v29, %v2278_v25  ;;  %v6903_v37 = vadd.f32 %v2278_v25, %v2081_v13  ;;  %5044 = vmatmul.msk.bf16.vlgmr.msrb.gmra.mxu0 %vm134_vm0, %v6635_v56  ;;  %v2498_v52 = vrot.slane %v2422_v53, 3 }
 0x28f   :  { %v6907_v62 = vadd.f32 %v2279_v2, %v2079_v28  ;;  %5052 = vmatmul.msk.bf16.vlgmr.msrb.gmra.mxu1 %vm134_vm0, %v6635_v56  ;;  %5076 = vmatmul.msk.bf16.vlgmr.msrb.gmra.mxu2 %vm134_vm0, %v6635_v56  ;;  %v2495_v29 = vrot.slane %v2373_v34, 3 }
 0x290   :  { %5084 = vmatmul.msk.bf16.vlgmr.msrb.gmra.mxu3 %vm134_vm0, %v6635_v56  ;;  %v5104_v56 = vld [vmem:[%s7899_s8 + $0x78] sm:$0xf0] }
 0x291   :  { %v5107_v19 = vor.u32 %v5216_v16, %v5104_v56 }
 0x292   :  { %v6927_v3 = vpop.f32.mrf.mxu2 }
 0x293   :  { %v6932_v4 = vpop.f32.mrf.mxu3  ;;  %3583 = vmatpush.bf16.msra.mxu1 %v5107_v19 }
 0x294   :  { %v2375_v44 = vpop.f32.mrf.mxu0 }
 0x295   :  { %v2496_v26 = vrot.slane %v2375_v44, 3  ;;  %v2424_v36 = vpop.f32.mrf.mxu1 }
 0x296   :  { %v2499_v45 = vrot.slane %v2424_v36, 3 }
 0x297   :  { %v2497_v30 = vsel %vm2494_vm13, %v2495_v29, %v2496_v26  ;;  %v2577_v13 = vadd.f32 %v2496_v26, %v6657_v61 }
 0x298   :  { %v2575_v25 = vadd.f32 %v2497_v30, %v6659_v50  ;;  %v2500_v53 = vsel %vm2494_vm13, %v2498_v52, %v2499_v45  ;;  %v2578_v28 = vadd.f32 %v2499_v45, %v6662_v59 }
 0x299   :  { %v2614_v34 = vadd.f32 %v6934_v14, %v2577_v13  ;;  %v2576_v12 = vadd.f32 %v2500_v53, %v6671_v35 }
 0x29a   :  { %v2612_v2 = vadd.f32 %v6934_v14, %v2575_v25  ;;  %v2615_v20 = vadd.f32 %v6936_v5, %v2578_v28  ;;  %v6948_v7 = vpop.f32.mrf.mxu2 }
 0x29b   :  { %5367 = vtanh.f32 %v2614_v34  ;;  %v2613_v24 = vadd.f32 %v6936_v5, %v2576_v12  ;;  %v6950_v61 = vpop.f32.mrf.mxu3 }
 0x29c   :  { %5369 = vtanh.f32 %v2612_v2  ;;  %v2378_v50 = vpop.f32.mrf.mxu0 }
 0x29d   :  { %5371 = vtanh.f32 %v2613_v24  ;;  %v2427_v16 = vpop.f32.mrf.mxu1  ;;  %v2501_v13 = vrot.slane %v2378_v50, 3 }
 0x29e   :  { %5373 = vtanh.f32 %v2615_v20  ;;  %5045 = vmatmul.msk.bf16.gmra.mxu0 %vm134_vm0, %v6667_v21  ;;  %v2504_v26 = vrot.slane %v2427_v16, 3 }
 0x29f   :  { %5053 = vmatmul.msk.bf16.gmra.mxu1 %vm134_vm0, %v6667_v21  ;;  %5077 = vmatmul.msk.bf16.gmra.mxu2 %vm134_vm0, %v6667_v21 }
 0x2a0   :  { %5085 = vmatmul.msk.bf16.gmra.mxu3 %vm134_vm0, %v6667_v21 }
 0x2a1   :  { %v5368_v59 = vpop.eup %5367 }
 0x2a2   :  { %v5370_v35 = vpop.eup %5369  ;;  %v2676_v1 = vsel %vm2494_vm13, %v5368_v59, -inf  ;;  %v6961_v44 = vpop.f32.mrf.mxu2 }
 0x2a3   :  { %v5372_v56 = vpop.eup %5371  ;;  %v2677_v52 = vmax.f32 %v5370_v35, %v2676_v1  ;;  %v6964_v36 = vpop.f32.mrf.mxu3 }
 0x2a4   :  { %v5374_v19 = vpop.eup %5373  ;;  %v2684_v29 = vsel %vm629_vm2, %v5372_v56, -inf  ;;  %v2380_v45 = vpop.f32.mrf.mxu0 }
 0x2a5   :  { %v2686_v30 = vsel %vm2685_vm14, %v5374_v19, -inf  ;;  %v2502_v25 = vrot.slane %v2380_v45, 3  ;;  %v2429_v21 = vpop.f32.mrf.mxu1  ;;  %v2678_v1 = vrot.slane %v2677_v52, 4 }
 0x2a6   :  { %v2687_v53 = vmax.f32 %v2684_v29, %v2686_v30  ;;  %v2505_v28 = vrot.slane %v2429_v21, 3 }
 0x2a7   :  { %v2503_v34 = vsel %vm2494_vm13, %v2501_v13, %v2502_v25  ;;  %v2581_v12 = vadd.f32 %v2502_v25, %v6688_v40 }
 0x2a8   :  { %v2579_v2 = vadd.f32 %v2503_v34, %v6690_v17  ;;  %v2506_v20 = vsel %vm2494_vm13, %v2504_v26, %v2505_v28  ;;  %v2582_v24 = vadd.f32 %v2505_v28, %v6693_v15  ;;  %v2688_v29 = vrot.slane %v2687_v53, 4 }
 0x2a9   :  { %v2618_v16 = vadd.f32 %v6934_v14, %v2581_v12  ;;  %v2580_v59 = vadd.f32 %v2506_v20, %v6702_v32  ;;  %v2679_v26 = vmax.f32 %v2677_v52, %v2678_v1 }
 0x2aa   :  { %v2616_v50 = vadd.f32 %v6934_v14, %v2579_v2  ;;  %v2619_v35 = vadd.f32 %v6936_v5, %v2582_v24  ;;  %v6977_v19 = vpop.f32.mrf.mxu2  ;;  %v2689_v30 = vmax.f32 %v2687_v53, %v2688_v29 }
 0x2ab   :  { %5375 = vtanh.f32 %v2618_v16  ;;  %v2617_v56 = vadd.f32 %v6936_v5, %v2580_v59  ;;  %v6979_v40 = vpop.f32.mrf.mxu3  ;;  %v2680_v21 = vrot.slane %v2679_v26, 2 }
 0x2ac   :  { %5377 = vtanh.f32 %v2616_v50  ;;  %v2383_v17 = vpop.f32.mrf.mxu0 }
 0x2ad   :  { %5379 = vtanh.f32 %v2617_v56  ;;  %v2432_v15 = vpop.f32.mrf.mxu1  ;;  %v2681_v29 = vmax.f32 %v2679_v26, %v2680_v21 }
 0x2ae   :  { %5381 = vtanh.f32 %v2619_v35  ;;  %5046 = vmatmul.msk.bf16.gmra.mxu0 %vm134_vm0, %v6698_v48  ;;  %v2510_v2 = vrot.slane %v2432_v15, 3  ;;  %v2690_v35 = vrot.slane %v2689_v30, 2 }
 0x2af   :  { %5054 = vmatmul.msk.bf16.gmra.mxu1 %vm134_vm0, %v6698_v48  ;;  %5078 = vmatmul.msk.bf16.gmra.mxu2 %vm134_vm0, %v6698_v48 }
 0x2b0   :  { %5086 = vmatmul.msk.bf16.gmra.mxu3 %vm134_vm0, %v6698_v48  ;;  %v2507_v48 = vrot.slane %v2383_v17, 3 }
 0x2b1   :  { %v5376_v32 = vpop.eup %5375 }
 0x2b2   :  { %v5378_v45 = vpop.eup %5377  ;;  %v2694_v13 = vsel %vm2494_vm13, %v5376_v32, -inf  ;;  %v6990_v28 = vpop.f32.mrf.mxu2 }
 0x2b3   :  { %v5380_v25 = vpop.eup %5379  ;;  %v2695_v52 = vmax.f32 %v5378_v45, %v2694_v13  ;;  %7912 = vst [vmem:[#allocation7_spill] sm:$0xff] %v6990_v28  ;;  %v6993_v20 = vpop.f32.mrf.mxu3 }
 0x2b4   :  { %v5382_v34 = vpop.eup %5381  ;;  %v2702_v12 = vsel %vm629_vm2, %v5380_v25, -inf  ;;  %7913 = vst [vmem:[#allocation8_spill] sm:$0xff] %v6993_v20  ;;  %v2385_v24 = vpop.f32.mrf.mxu0 }
 0x2b5   :  { %v2696_v16 = vrot.slane %v2695_v52, 4  ;;  %v2703_v59 = vsel %vm2685_vm14, %v5382_v34, -inf  ;;  %v2508_v50 = vrot.slane %v2385_v24, 3  ;;  %v2434_v53 = vpop.f32.mrf.mxu1 }
 0x2b6   :  { %v2704_v1 = vmax.f32 %v2702_v12, %v2703_v59  ;;  %v2511_v56 = vrot.slane %v2434_v53, 3  ;;  %v2691_v12 = vmax.f32 %v2689_v30, %v2690_v35 }
 0x2b7   :  { %v2697_v32 = vmax.f32 %v2695_v52, %v2696_v16  ;;  %v2509_v45 = vsel %vm2494_vm13, %v2507_v48, %v2508_v50  ;;  %v2585_v13 = vadd.f32 %v2508_v50, %v6735_v22  ;;  %v2682_v52 = vrot.slane %v2681_v29, 1 }
 0x2b8   :  { %v2705_v25 = vrot.slane %v2704_v1, 4  ;;  %v2583_v15 = vadd.f32 %v2509_v45, %v6737_v9  ;;  %v2512_v20 = vsel %vm2494_vm13, %v2510_v2, %v2511_v56  ;;  %v2586_v28 = vadd.f32 %v2511_v56, %v6740_v46  ;;  %v5219_v56 = vld [vmem:[%s7899_s8 + $0x84] sm:$0xf0]  ;;  %v5094_v45 = vld [vmem:[%s7899_s8 + $0x60] sm:$0xf] }
 0x2b9   :  { %v2698_v34 = vrot.slane %v2697_v32, 2  ;;  %v2622_v17 = vadd.f32 %v6934_v14, %v2585_v13  ;;  %v2584_v24 = vadd.f32 %v2512_v20, %v6749_v39  ;;  %v2692_v30 = vrot.slane %v2691_v12, 1  ;;  %v5215_v13 = vld [vmem:[%s7899_s8 + $0x64] sm:$0xf0] }
 0x2ba   :  { %v2706_v59 = vmax.f32 %v2704_v1, %v2705_v25  ;;  %v2620_v26 = vadd.f32 %v6934_v14, %v2583_v15  ;;  %v2623_v21 = vadd.f32 %v6936_v5, %v2586_v28  ;;  %v7006_v16 = vpop.f32.mrf.mxu2  ;;  %v2683_v53 = vmax.f32 %v2681_v29, %v2682_v52  ;;  %v5126_v1 = vld [vmem:[%s7899_s8 + $0x80] sm:$0xf] }
 0x2bb   :  { %v2699_v22 = vmax.f32 %v2697_v32, %v2698_v34  ;;  %5383 = vtanh.f32 %v2622_v17  ;;  %v2621_v9 = vadd.f32 %v6936_v5, %v2584_v24  ;;  %v7008_v46 = vpop.f32.mrf.mxu3  ;;  %v5127_v32 = vor.u32 %v5219_v56, %v5126_v1 }
 0x2bc   :  { %v2707_v2 = vrot.slane %v2706_v59, 2  ;;  %5385 = vtanh.f32 %v2620_v26  ;;  %v2388_v48 = vpop.f32.mrf.mxu0  ;;  %v2693_v34 = vmax.f32 %v2691_v12, %v2692_v30 }
 0x2bd   :  { %v2700_v50 = vrot.slane %v2699_v22, 1  ;;  %5387 = vtanh.f32 %v2621_v9  ;;  %v2437_v39 = vpop.f32.mrf.mxu1  ;;  %3797 = vmatpush.bf16.msra.mxu2 %v5127_v32 }
 0x2be   :  { %v2708_v20 = vmax.f32 %v2706_v59, %v2707_v2  ;;  %5389 = vtanh.f32 %v2623_v21  ;;  %5047 = vmatmul.msk.bf16.gmra.mxu0 %vm134_vm0, %v6745_v57  ;;  %v5095_v59 = vor.u32 %v5215_v13, %v5094_v45  ;;  %v2516_v9 = vrot.slane %v2437_v39, 3 }
 0x2bf   :  { %v2701_v28 = vmax.f32 %v2699_v22, %v2700_v50  ;;  %5055 = vmatmul.msk.bf16.gmra.mxu1 %vm134_vm0, %v6745_v57  ;;  %5079 = vmatmul.msk.bf16.gmra.mxu2 %vm134_vm0, %v6745_v57 }
 0x2c0   :  { %v2709_v35 = vrot.slane %v2708_v20, 1  ;;  %5087 = vmatmul.msk.bf16.gmra.mxu3 %vm134_vm0, %v6745_v57  ;;  %3535 = vmatpush.bf16.msra.mxu0 %v5095_v59 }
 0x2c1   :  { %v5384_v29 = vpop.eup %5383  ;;  %v7031_v25 = vsel %vm4257_vm4, %v2701_v28, %v2683_v53 }
 0x2c2   :  { %v5386_v15 = vpop.eup %5385  ;;  %v2710_v17 = vmax.f32 %v2708_v20, %v2709_v35  ;;  %v2711_v24 = vsel %vm2494_vm13, %v5384_v29, -inf  ;;  %v7034_v21 = vpop.f32.mrf.mxu2  ;;  %v2513_v20 = vrot.slane %v2388_v48, 3 }
 0x2c3   :  { %v5388_v26 = vpop.eup %5387  ;;  %v2712_v57 = vmax.f32 %v5386_v15, %v2711_v24  ;;  %v7037_v2 = vpop.f32.mrf.mxu3 }
 0x2c4   :  { %v5390_v52 = vpop.eup %5389  ;;  %v2719_v22 = vsel %vm629_vm2, %v5388_v26, -inf  ;;  %v2390_v50 = vpop.f32.mrf.mxu0  ;;  %v4340_v53 = vsel %vm4257_vm4, %v2710_v17, %v2693_v34 }
 0x2c5   :  { %v2713_v12 = vrot.slane %v2712_v57, 4  ;;  %v2720_v30 = vsel %vm2685_vm14, %v5390_v52, -inf  ;;  %v2514_v28 = vrot.slane %v2390_v50, 3  ;;  %v2439_v35 = vpop.f32.mrf.mxu1  ;;  %v5128_v50 = vld [vmem:[%s7899_s8 + $0x88] sm:$0xf0] }
 0x2c6   :  { %v2721_v1 = vmax.f32 %v2719_v22, %v2720_v30  ;;  %v2517_v56 = vrot.slane %v2439_v35, 3  ;;  %v5096_v35 = vld [vmem:[%s7899_s8 + $0x68] sm:$0xf0] }
 0x2c7   :  { %v2714_v29 = vmax.f32 %v2712_v57, %v2713_v12  ;;  %v2515_v32 = vsel %vm2494_vm13, %v2513_v20, %v2514_v28  ;;  %v2589_v45 = vadd.f32 %v2514_v28, %v6770_v43  ;;  %v5214_v28 = vld [vmem:[%s7899_s8 + $0x64] sm:$0xf] }
 0x2c8   :  { %v2722_v39 = vrot.slane %v2721_v1, 4  ;;  %v2587_v13 = vadd.f32 %v2515_v32, %v6772_v31  ;;  %v2518_v15 = vsel %vm2494_vm13, %v2516_v9, %v2517_v56  ;;  %v2590_v34 = vadd.f32 %v2517_v56, %v6775_v33 }
 0x2c9   :  { %v2715_v17 = vrot.slane %v2714_v29, 2  ;;  %v2626_v24 = vadd.f32 %v6934_v14, %v2589_v45  ;;  %v2588_v48 = vadd.f32 %v2518_v15, %v6784_v8  ;;  %v5218_v8 = vld [vmem:[%s7899_s8 + $0x84] sm:$0xf]  ;;  %v5099_v56 = vor.u32 %v5214_v28, %v5096_v35 }
 0x2ca   :  { %v2723_v59 = vmax.f32 %v2721_v1, %v2722_v39  ;;  %v2624_v26 = vadd.f32 %v6934_v14, %v2587_v13  ;;  %v2627_v57 = vadd.f32 %v6936_v5, %v2590_v34  ;;  %v7051_v22 = vpop.f32.mrf.mxu2  ;;  %v5131_v20 = vor.u32 %v5218_v8, %v5128_v50 }
 0x2cb   :  { %v2716_v52 = vmax.f32 %v2714_v29, %v2715_v17  ;;  %5391 = vtanh.f32 %v2626_v24  ;;  %v2625_v43 = vadd.f32 %v6936_v5, %v2588_v48  ;;  %v7053_v9 = vpop.f32.mrf.mxu3  ;;  %3584 = vmatpush.bf16.msra.mxu1 %v5099_v56 }
 0x2cc   :  { %v2724_v31 = vrot.slane %v2723_v59, 2  ;;  %5393 = vtanh.f32 %v2624_v26  ;;  %v2393_v33 = vpop.f32.mrf.mxu0  ;;  %3846 = vmatpush.bf16.msra.mxu3 %v5131_v20 }
 0x2cd   :  { %v2717_v12 = vrot.slane %v2716_v52, 1  ;;  %5395 = vtanh.f32 %v2625_v43  ;;  %v2442_v30 = vpop.f32.mrf.mxu1  ;;  %v2519_v8 = vrot.slane %v2393_v33, 3 }
 0x2ce   :  { %v2725_v1 = vmax.f32 %v2723_v59, %v2724_v31  ;;  %5397 = vtanh.f32 %v2627_v57  ;;  %5048 = vmatmul.msk.bf16.gmra.mxu0 %vm134_vm0, %v6780_v54  ;;  %v2522_v57 = vrot.slane %v2442_v30, 3 }
 0x2cf   :  { %v2718_v29 = vmax.f32 %v2716_v52, %v2717_v12  ;;  %5056 = vmatmul.msk.bf16.gmra.mxu1 %vm134_vm0, %v6780_v54  ;;  %5080 = vmatmul.msk.bf16.gmra.mxu2 %vm134_vm0, %v6780_v54 }
 0x2d0   :  { %v2726_v32 = vrot.slane %v2725_v1, 1  ;;  %5088 = vmatmul.msk.bf16.gmra.mxu3 %vm134_vm0, %v6780_v54 }
 0x2d1   :  { %v5392_v45 = vpop.eup %5391  ;;  %v4334_v39 = vsel %vm4259_vm5, %v2718_v29, %v7031_v25 }
 0x2d2   :  { %v5394_v13 = vpop.eup %5393  ;;  %v2727_v15 = vmax.f32 %v2725_v1, %v2726_v32  ;;  %v2728_v34 = vsel %vm2494_vm13, %v5392_v45, -inf  ;;  %v7078_v48 = vpop.f32.mrf.mxu2 }
 0x2d3   :  { %v5396_v17 = vpop.eup %5395  ;;  %v2729_v24 = vmax.f32 %v5394_v13, %v2728_v34  ;;  %v7081_v52 = vpop.f32.mrf.mxu3 }
 0x2d4   :  { %v5398_v59 = vpop.eup %5397  ;;  %v2736_v26 = vsel %vm629_vm2, %v5396_v17, -inf  ;;  %v2395_v43 = vpop.f32.mrf.mxu0  ;;  %v4341_v54 = vsel %vm4259_vm5, %v2727_v15, %v4340_v53 }
 0x2d5   :  { %v2730_v31 = vrot.slane %v2729_v24, 4  ;;  %v2737_v25 = vsel %vm2685_vm14, %v5398_v59, -inf  ;;  %v2520_v50 = vrot.slane %v2395_v43, 3  ;;  %v2444_v12 = vpop.f32.mrf.mxu1 }
 0x2d6   :  { %v2738_v20 = vmax.f32 %v2736_v26, %v2737_v25  ;;  %v2523_v28 = vrot.slane %v2444_v12, 3 }
 0x2d7   :  { %v2731_v35 = vmax.f32 %v2729_v24, %v2730_v31  ;;  %v2521_v1 = vsel %vm2494_vm13, %v2519_v8, %v2520_v50  ;;  %v2593_v56 = vadd.f32 %v2520_v50, %v6799_v23 }
 0x2d8   :  { %v2739_v29 = vrot.slane %v2738_v20, 4  ;;  %v2591_v30 = vadd.f32 %v2521_v1, %v6801_v6  ;;  %v2524_v32 = vsel %vm2494_vm13, %v2522_v57, %v2523_v28  ;;  %v2594_v53 = vadd.f32 %v2523_v28, %v6804_v27 }
 0x2d9   :  { %v2732_v45 = vrot.slane %v2731_v35, 2  ;;  %v2630_v13 = vadd.f32 %v6934_v14, %v2593_v56  ;;  %v2592_v33 = vadd.f32 %v2524_v32, %v6813_v10 }
 0x2da   :  { %v2740_v15 = vmax.f32 %v2738_v20, %v2739_v29  ;;  %v2628_v34 = vadd.f32 %v6934_v14, %v2591_v30  ;;  %v2631_v17 = vadd.f32 %v6936_v5, %v2594_v53  ;;  %v7095_v59 = vpop.f32.mrf.mxu2 }
 0x2db   :  { %v2733_v24 = vmax.f32 %v2731_v35, %v2732_v45  ;;  %5399 = vtanh.f32 %v2630_v13  ;;  %v2629_v23 = vadd.f32 %v6936_v5, %v2592_v33  ;;  %v7097_v26 = vpop.f32.mrf.mxu3 }
 0x2dc   :  { %v2741_v6 = vrot.slane %v2740_v15, 2  ;;  %5401 = vtanh.f32 %v2628_v34  ;;  %v2398_v27 = vpop.f32.mrf.mxu0 }
 0x2dd   :  { %v2734_v57 = vrot.slane %v2733_v24, 1  ;;  %5403 = vtanh.f32 %v2629_v23  ;;  %v2447_v43 = vpop.f32.mrf.mxu1  ;;  %v2525_v33 = vrot.slane %v2398_v27, 3 }
 0x2de   :  { %v2742_v10 = vmax.f32 %v2740_v15, %v2741_v6  ;;  %5405 = vtanh.f32 %v2631_v17  ;;  %5049 = vmatmul.msk.bf16.gmra.mxu0 %vm134_vm0, %v6809_v58  ;;  %v2528_v32 = vrot.slane %v2447_v43, 3 }
 0x2df   :  { %v2735_v31 = vmax.f32 %v2733_v24, %v2734_v57  ;;  %5057 = vmatmul.msk.bf16.gmra.mxu1 %vm134_vm0, %v6809_v58  ;;  %5081 = vmatmul.msk.bf16.gmra.mxu2 %vm134_vm0, %v6809_v58 }
 0x2e0   :  { %v2743_v25 = vrot.slane %v2742_v10, 1  ;;  %5089 = vmatmul.msk.bf16.gmra.mxu3 %vm134_vm0, %v6809_v58 }
 0x2e1   :  { %v5400_v8 = vpop.eup %5399  ;;  %v4335_v50 = vsel %vm4261_vm6, %v2735_v31, %v4334_v39 }
 0x2e2   :  { %v5402_v12 = vpop.eup %5401  ;;  %v2745_v20 = vsel %vm2494_vm13, %v5400_v8, -inf  ;;  %v2744_v28 = vmax.f32 %v2742_v10, %v2743_v25  ;;  %v7109_v56 = vpop.f32.mrf.mxu2 }
 0x2e3   :  { %v5404_v35 = vpop.eup %5403  ;;  %v2746_v1 = vmax.f32 %v5402_v12, %v2745_v20  ;;  %v7112_v53 = vpop.f32.mrf.mxu3 }
 0x2e4   :  { %v5406_v29 = vpop.eup %5405  ;;  %v2753_v30 = vsel %vm629_vm2, %v5404_v35, -inf  ;;  %v2400_v45 = vpop.f32.mrf.mxu0  ;;  %v4342_v13 = vsel %vm4261_vm6, %v2744_v28, %v4341_v54 }
 0x2e5   :  { %v2747_v58 = vrot.slane %v2746_v1, 4  ;;  %v2754_v39 = vsel %vm2685_vm14, %v5406_v29, -inf  ;;  %v2526_v15 = vrot.slane %v2400_v45, 3  ;;  %v2449_v34 = vpop.f32.mrf.mxu1 }
 0x2e6   :  { %v2755_v17 = vmax.f32 %v2753_v30, %v2754_v39  ;;  %v2529_v24 = vrot.slane %v2449_v34, 3 }
 0x2e7   :  { %v2748_v23 = vmax.f32 %v2746_v1, %v2747_v58  ;;  %v2527_v6 = vsel %vm2494_vm13, %v2525_v33, %v2526_v15  ;;  %v2597_v57 = vadd.f32 %v2526_v15, %v6828_v55 }
 0x2e8   :  { %v2756_v10 = vrot.slane %v2755_v17, 4  ;;  %v2595_v43 = vadd.f32 %v2527_v6, %v6830_v42  ;;  %v2530_v31 = vsel %vm2494_vm13, %v2528_v32, %v2529_v24  ;;  %v2598_v54 = vadd.f32 %v2529_v24, %v6833_v49 }
 0x2e9   :  { %v2749_v25 = vrot.slane %v2748_v23, 2  ;;  %v2634_v8 = vadd.f32 %v6934_v14, %v2597_v57  ;;  %v2596_v27 = vadd.f32 %v2530_v31, %v6842_v60 }
 0x2ea   :  { %v2757_v12 = vmax.f32 %v2755_v17, %v2756_v10  ;;  %v2632_v20 = vadd.f32 %v6934_v14, %v2595_v43  ;;  %v2635_v28 = vadd.f32 %v6936_v5, %v2598_v54  ;;  %v7126_v35 = vpop.f32.mrf.mxu2 }
 0x2eb   :  { %5407 = vtanh.f32 %v2634_v8  ;;  %v2633_v55 = vadd.f32 %v6936_v5, %v2596_v27  ;;  %v2750_v42 = vmax.f32 %v2748_v23, %v2749_v25  ;;  %v7128_v29 = vpop.f32.mrf.mxu3 }
 0x2ec   :  { %v2758_v1 = vrot.slane %v2757_v12, 2  ;;  %5409 = vtanh.f32 %v2632_v20  ;;  %v2403_v49 = vpop.f32.mrf.mxu0 }
 0x2ed   :  { %5411 = vtanh.f32 %v2633_v55  ;;  %v2452_v30 = vpop.f32.mrf.mxu1  ;;  %v2751_v32 = vrot.slane %v2750_v42, 1  ;;  %v2531_v8 = vrot.slane %v2403_v49, 3 }
 0x2ee   :  { %5413 = vtanh.f32 %v2635_v28  ;;  %v2759_v60 = vmax.f32 %v2757_v12, %v2758_v1  ;;  %5050 = vmatmul.msk.bf16.gmra.mxu0 %vm134_vm0, %v6838_v63  ;;  %v2534_v43 = vrot.slane %v2452_v30, 3 }
 0x2ef   :  { %v2752_v45 = vmax.f32 %v2750_v42, %v2751_v32  ;;  %5058 = vmatmul.msk.bf16.gmra.mxu1 %vm134_vm0, %v6838_v63  ;;  %5082 = vmatmul.msk.bf16.gmra.mxu2 %vm134_vm0, %v6838_v63 }
 0x2f0   :  { %v2760_v58 = vrot.slane %v2759_v60, 1  ;;  %5090 = vmatmul.msk.bf16.gmra.mxu3 %vm134_vm0, %v6838_v63 }
 0x2f1   :  { %v5408_v39 = vpop.eup %5407  ;;  %v4336_v33 = vsel %vm4263_vm7, %v2752_v45, %v4335_v50 }
 0x2f2   :  { %v5410_v15 = vpop.eup %5409  ;;  %v2762_v34 = vsel %vm2494_vm13, %v5408_v39, -inf  ;;  %v2761_v17 = vmax.f32 %v2759_v60, %v2760_v58  ;;  %v7140_v6 = vpop.f32.mrf.mxu2 }
 0x2f3   :  { %v5412_v24 = vpop.eup %5411  ;;  %v2763_v23 = vmax.f32 %v5410_v15, %v2762_v34  ;;  %v7143_v31 = vpop.f32.mrf.mxu3 }
 0x2f4   :  { %v5414_v57 = vpop.eup %5413  ;;  %v2770_v10 = vsel %vm629_vm2, %v5412_v24, -inf  ;;  %v2405_v54 = vpop.f32.mrf.mxu0  ;;  %v4343_v25 = vsel %vm4263_vm7, %v2761_v17, %v4342_v13 }
 0x2f5   :  { %v2764_v63 = vrot.slane %v2763_v23, 4  ;;  %v2771_v50 = vsel %vm2685_vm14, %v5414_v57, -inf  ;;  %v2532_v27 = vrot.slane %v2405_v54, 3  ;;  %v2454_v12 = vpop.f32.mrf.mxu1 }
 0x2f6   :  { %v2772_v20 = vmax.f32 %v2770_v10, %v2771_v50  ;;  %v2535_v28 = vrot.slane %v2454_v12, 3 }
 0x2f7   :  { %v2765_v55 = vmax.f32 %v2763_v23, %v2764_v63  ;;  %v2533_v42 = vsel %vm2494_vm13, %v2531_v8, %v2532_v27  ;;  %v2601_v1 = vadd.f32 %v2532_v27, %v6869_v38 }
 0x2f8   :  { %v2773_v32 = vrot.slane %v2772_v20, 4  ;;  %v2599_v30 = vadd.f32 %v2533_v42, %v6871_v0  ;;  %v2536_v60 = vsel %vm2494_vm13, %v2534_v43, %v2535_v28  ;;  %v2602_v13 = vadd.f32 %v2535_v28, %v6874_v51 }
 0x2f9   :  { %v2638_v45 = vadd.f32 %v6934_v14, %v2601_v1  ;;  %v2600_v49 = vadd.f32 %v2536_v60, %v6883_v18  ;;  %v2766_v58 = vrot.slane %v2765_v55, 2 }
 0x2fa   :  { %v2774_v39 = vmax.f32 %v2772_v20, %v2773_v32  ;;  %v2636_v15 = vadd.f32 %v6934_v14, %v2599_v30  ;;  %v2639_v34 = vadd.f32 %v6936_v5, %v2602_v13  ;;  %v7157_v17 = vpop.f32.mrf.mxu2 }
 0x2fb   :  { %5415 = vtanh.f32 %v2638_v45  ;;  %v2637_v38 = vadd.f32 %v6936_v5, %v2600_v49  ;;  %v2767_v0 = vmax.f32 %v2765_v55, %v2766_v58  ;;  %v7159_v24 = vpop.f32.mrf.mxu3 }
 0x2fc   :  { %5417 = vtanh.f32 %v2636_v15  ;;  %v2408_v51 = vpop.f32.mrf.mxu0  ;;  %v2775_v23 = vrot.slane %v2774_v39, 2 }
 0x2fd   :  { %5419 = vtanh.f32 %v2637_v38  ;;  %v2457_v57 = vpop.f32.mrf.mxu1  ;;  %v2768_v18 = vrot.slane %v2767_v0, 1  ;;  %v2537_v45 = vrot.slane %v2408_v51, 3 }
 0x2fe   :  { %5421 = vtanh.f32 %v2639_v34  ;;  %v2776_v10 = vmax.f32 %v2774_v39, %v2775_v23  ;;  %5051 = vmatmul.msk.bf16.gmra.mxu0 %vm134_vm0, %v6879_v47  ;;  %v2540_v32 = vrot.slane %v2457_v57, 3 }
 0x2ff   :  { %v2769_v43 = vmax.f32 %v2767_v0, %v2768_v18  ;;  %5059 = vmatmul.msk.bf16.gmra.mxu1 %vm134_vm0, %v6879_v47  ;;  %5083 = vmatmul.msk.bf16.gmra.mxu2 %vm134_vm0, %v6879_v47 }
 0x300   :  { %v2777_v54 = vrot.slane %v2776_v10, 1  ;;  %5091 = vmatmul.msk.bf16.gmra.mxu3 %vm134_vm0, %v6879_v47 }
 0x301   :  { %v5416_v63 = vpop.eup %5415  ;;  %v4337_v50 = vsel %vm4265_vm8, %v2769_v43, %v4336_v33 }
 0x302   :  { %v5418_v8 = vpop.eup %5417  ;;  %v2779_v27 = vsel %vm2494_vm13, %v5416_v63, -inf  ;;  %v2778_v12 = vmax.f32 %v2776_v10, %v2777_v54  ;;  %v7171_v55 = vpop.f32.mrf.mxu2 }
 0x303   :  { %v5420_v20 = vpop.eup %5419  ;;  %v2780_v28 = vmax.f32 %v5418_v8, %v2779_v27  ;;  %v7174_v30 = vpop.f32.mrf.mxu3 }
 0x304   :  { %v5422_v42 = vpop.eup %5421  ;;  %v2787_v1 = vsel %vm629_vm2, %v5420_v20, -inf  ;;  %v2410_v60 = vpop.f32.mrf.mxu0  ;;  %v4344_v13 = vsel %vm4265_vm8, %v2778_v12, %v4343_v25 }
 0x305   :  { %v2781_v47 = vrot.slane %v2780_v28, 4  ;;  %v2788_v33 = vsel %vm2685_vm14, %v5422_v42, -inf  ;;  %v2538_v49 = vrot.slane %v2410_v60, 3  ;;  %v2459_v58 = vpop.f32.mrf.mxu1 }
 0x306   :  { %v2789_v39 = vmax.f32 %v2787_v1, %v2788_v33  ;;  %v2541_v15 = vrot.slane %v2459_v58, 3 }
 0x307   :  { %v2539_v34 = vsel %vm2494_vm13, %v2537_v45, %v2538_v49  ;;  %v2605_v38 = vadd.f32 %v2538_v49, %v6898_v41  ;;  %v2782_v0 = vmax.f32 %v2780_v28, %v2781_v47 }
 0x308   :  { %v2790_v23 = vrot.slane %v2789_v39, 4  ;;  %v2603_v57 = vadd.f32 %v2539_v34, %v6900_v11  ;;  %v2542_v18 = vsel %vm2494_vm13, %v2540_v32, %v2541_v15  ;;  %v2606_v25 = vadd.f32 %v2541_v15, %v6903_v37 }
 0x309   :  { %v2642_v10 = vadd.f32 %v6934_v14, %v2605_v38  ;;  %v2604_v51 = vadd.f32 %v2542_v18, %v6907_v62  ;;  %v2783_v43 = vrot.slane %v2782_v0, 2 }
 0x30a   :  { %v2640_v54 = vadd.f32 %v6934_v14, %v2603_v57  ;;  %v2643_v63 = vadd.f32 %v6936_v5, %v2606_v25  ;;  %v2791_v8 = vmax.f32 %v2789_v39, %v2790_v23  ;;  %v7188_v27 = vpop.f32.mrf.mxu2  ;;  %v5511_v14 = vld [vmem:[%s7891_s0] sm:$0xff] }
 0x30b   :  { %5423 = vtanh.f32 %v2642_v10  ;;  %v2641_v41 = vadd.f32 %v6936_v5, %v2604_v51  ;;  %v2784_v11 = vmax.f32 %v2782_v0, %v2783_v43  ;;  %v7190_v12 = vpop.f32.mrf.mxu3 }
 0x30c   :  { %5425 = vtanh.f32 %v2640_v54  ;;  %v3013_v37 = vpop.f32.mrf.mxu0  ;;  %v2792_v20 = vrot.slane %v2791_v8, 2 }
 0x30d   :  { %5427 = vtanh.f32 %v2641_v41  ;;  %v3062_v28 = vpop.f32.mrf.mxu1  ;;  %v2785_v62 = vrot.slane %v2784_v11, 1  ;;  %v3134_v25 = vrot.slane %v3013_v37, 1 }
 0x30e   :  { %5429 = vtanh.f32 %v2643_v63  ;;  %v2793_v42 = vmax.f32 %v2791_v8, %v2792_v20  ;;  %5108 = vmatmul.msk.bf16.vlgmr.msra.gmra.mxu0 %vm134_vm0, %v5511_v14  ;;  %v3137_v38 = vrot.slane %v3062_v28, 1 }
 0x30f   :  { %v2786_v5 = vmax.f32 %v2784_v11, %v2785_v62  ;;  %5116 = vmatmul.msk.bf16.vlgmr.msra.gmra.mxu1 %vm134_vm0, %v5511_v14  ;;  %5140 = vmatmul.msk.bf16.vlgmr.msra.gmra.mxu2 %vm134_vm0, %v5511_v14 }
 0x310   :  { %v2794_v1 = vrot.slane %v2793_v42, 1  ;;  %5148 = vmatmul.msk.bf16.vlgmr.msra.gmra.mxu3 %vm134_vm0, %v5511_v14 }
 0x311   :  { %v5424_v32 = vpop.eup %5423  ;;  %v4338_v60 = vsel %vm4267_vm9, %v2786_v5, %v4337_v50 }
 0x312   :  { %v5426_v47 = vpop.eup %5425  ;;  %v2796_v33 = vsel %vm2494_vm13, %v5424_v32, -inf  ;;  %v2795_v45 = vmax.f32 %v2793_v42, %v2794_v1  ;;  %v3275_v39 = vpop.f32.mrf.mxu2 }
 0x313   :  { %v5428_v49 = vpop.eup %5427  ;;  %v2797_v58 = vmax.f32 %v5426_v47, %v2796_v33  ;;  %v3324_v0 = vpop.f32.mrf.mxu3 }
 0x314   :  { %v5430_v15 = vpop.eup %5429  ;;  %v2804_v34 = vsel %vm629_vm2, %v5428_v49, -inf  ;;  %v3015_v23 = vpop.f32.mrf.mxu0  ;;  %v4345_v57 = vsel %vm4267_vm9, %v2795_v45, %v4344_v13  ;;  %v3399_v62 = vrot.slane %v3324_v0, 2  ;;  %v3396_v13 = vrot.slane %v3275_v39, 2 }
 0x315   :  { %v2805_v18 = vsel %vm2685_vm14, %v5430_v15, -inf  ;;  %v3135_v10 = vrot.slane %v3015_v23, 1  ;;  %v3064_v50 = vpop.f32.mrf.mxu1  ;;  %v2798_v51 = vrot.slane %v2797_v58, 4 }
 0x316   :  { %v2806_v43 = vmax.f32 %v2804_v34, %v2805_v18  ;;  %v3138_v54 = vrot.slane %v3064_v50, 1 }
 0x317   :  { %v3136_v63 = vsel %vm439_vm1, %v3134_v25, %v3135_v10  ;;  %v2799_v8 = vmax.f32 %v2797_v58, %v2798_v51  ;;  %v3216_v5 = vadd.f32 %v3135_v10, %v6948_v7 }
 0x318   :  { %v3139_v41 = vsel %vm439_vm1, %v3137_v38, %v3138_v54  ;;  %v2807_v11 = vrot.slane %v2806_v43, 4  ;;  %v3214_v33 = vadd.f32 %v3136_v63, %v6927_v3  ;;  %v3217_v45 = vadd.f32 %v3138_v54, %v6950_v61  ;;  %v5512_v3 = vld [vmem:[%s7891_s0 + $0x8] sm:$0xff] }
 0x319   :  { %v2800_v20 = vrot.slane %v2799_v8, 2  ;;  %v3215_v34 = vadd.f32 %v3139_v41, %v6932_v4 }
 0x31a   :  { %v2808_v28 = vmax.f32 %v2806_v43, %v2807_v11  ;;  %v3277_v42 = vpop.f32.mrf.mxu2 }
 0x31b   :  { %v2801_v14 = vmax.f32 %v2799_v8, %v2800_v20  ;;  %v3397_v37 = vrot.slane %v3277_v42, 2  ;;  %v3326_v1 = vpop.f32.mrf.mxu3 }
 0x31c   :  { %v3018_v32 = vpop.f32.mrf.mxu0  ;;  %v2809_v47 = vrot.slane %v2808_v28, 2  ;;  %v3400_v49 = vrot.slane %v3326_v1, 2 }
 0x31d   :  { %v3067_v58 = vpop.f32.mrf.mxu1  ;;  %v2802_v15 = vrot.slane %v2801_v14, 1  ;;  %v3398_v38 = vsel %vm1334_vm11, %v3396_v13, %v3397_v37  ;;  %v7211_v0 = vadd.f32 %v3397_v37, %v3216_v5  ;;  %v3140_v41 = vrot.slane %v3018_v32, 1 }
 0x31e   :  { %v2810_v39 = vmax.f32 %v2808_v28, %v2809_v47  ;;  %v7213_v23 = vadd.f32 %v3398_v38, %v3214_v33  ;;  %v3401_v7 = vsel %vm1334_vm11, %v3399_v62, %v3400_v49  ;;  %v7216_v18 = vadd.f32 %v3400_v49, %v3217_v45  ;;  %5109 = vmatmul.msk.bf16.gmra.mxu0 %vm134_vm0, %v5512_v3 }
 0x31f   :  { %v2803_v61 = vmax.f32 %v2801_v14, %v2802_v15  ;;  %v7222_v25 = vadd.f32 %v3401_v7, %v3215_v34  ;;  %5117 = vmatmul.msk.bf16.gmra.mxu1 %vm134_vm0, %v5512_v3  ;;  %5141 = vmatmul.msk.bf16.gmra.mxu2 %vm134_vm0, %v5512_v3  ;;  %v3143_v43 = vrot.slane %v3067_v58, 1 }
 0x320   :  { %v2811_v4 = vrot.slane %v2810_v39, 1  ;;  %5149 = vmatmul.msk.bf16.gmra.mxu3 %vm134_vm0, %v5512_v3 }
 0x321   :  { %v4339_v10 = vsel %vm4269_vm10, %v2803_v61, %v4338_v60 }
 0x322   :  { %v2812_v50 = vmax.f32 %v2810_v39, %v2811_v4  ;;  %v3280_v51 = vpop.f32.mrf.mxu2 }
 0x323   :  { %v3329_v54 = vpop.f32.mrf.mxu3  ;;  %v3402_v5 = vrot.slane %v3280_v51, 2 }
 0x324   :  { %v3020_v63 = vpop.f32.mrf.mxu0  ;;  %v4346_v8 = vsel %vm4269_vm10, %v2812_v50, %v4345_v57  ;;  %v3405_v13 = vrot.slane %v3329_v54, 2 }
 0x325   :  { %v3141_v11 = vrot.slane %v3020_v63, 1  ;;  %v3069_v20 = vpop.f32.mrf.mxu1  ;;  %v5232_v28 = vpack.i.bf16 %v4346_v8, %v4339_v10 }
 0x326   :  { %v3144_v62 = vrot.slane %v3069_v20, 1 }
 0x327   :  { %v3142_v42 = vsel %vm439_vm1, %v3140_v41, %v3141_v11  ;;  %5233 = vrot.lane.b32.xlu0 %v5232_v28, %s5546_s28  ;;  %v3220_v37 = vadd.f32 %v3141_v11, %v6977_v19 }
 0x328   :  { %v3145_v14 = vsel %vm439_vm1, %v3143_v43, %v3144_v62  ;;  %v3218_v57 = vadd.f32 %v3142_v42, %v6961_v44  ;;  %v3221_v32 = vadd.f32 %v3144_v62, %v6979_v40  ;;  %v5513_v44 = vld [vmem:[%s7891_s0 + $0x10] sm:$0xff]  ;;  %v7914_v42 = vld [vmem:[#allocation7_spill] sm:$0xff] }
 0x329   :  { %v3219_v58 = vadd.f32 %v3145_v14, %v6964_v36 }
 0x32a   :  { %v3282_v60 = vpop.f32.mrf.mxu2 }
 0x32b   :  { %v3403_v1 = vrot.slane %v3282_v60, 2  ;;  %v3331_v47 = vpop.f32.mrf.mxu3 }
 0x32c   :  { %v3023_v33 = vpop.f32.mrf.mxu0  ;;  %v3406_v45 = vrot.slane %v3331_v47, 2 }
 0x32d   :  { %v3072_v49 = vpop.f32.mrf.mxu1  ;;  %v3404_v15 = vsel %vm1334_vm11, %v3402_v5, %v3403_v1  ;;  %v7236_v34 = vadd.f32 %v3403_v1, %v3220_v37  ;;  %v3146_v4 = vrot.slane %v3023_v33, 1  ;;  %v7915_v37 = vld [vmem:[#allocation8_spill] sm:$0xff] }
 0x32e   :  { %v7238_v38 = vadd.f32 %v3404_v15, %v3218_v57  ;;  %v3407_v39 = vsel %vm1334_vm11, %v3405_v13, %v3406_v45  ;;  %v7241_v19 = vadd.f32 %v3406_v45, %v3221_v32  ;;  %5110 = vmatmul.msk.bf16.gmra.mxu0 %vm134_vm0, %v5513_v44  ;;  %v3149_v7 = vrot.slane %v3072_v49, 1  ;;  %v5514_v45 = vld [vmem:[%s7891_s0 + $0x18] sm:$0xff] }
 0x32f   :  { %v7247_v40 = vadd.f32 %v3407_v39, %v3219_v58  ;;  %5118 = vmatmul.msk.bf16.gmra.mxu1 %vm134_vm0, %v5513_v44  ;;  %5142 = vmatmul.msk.bf16.gmra.mxu2 %vm134_vm0, %v5513_v44 }
 0x330   :  { %5150 = vmatmul.msk.bf16.gmra.mxu3 %vm134_vm0, %v5513_v44 }
 0x332   :  { %v3285_v36 = vpop.f32.mrf.mxu2 }
 0x333   :  { %v3334_v3 = vpop.f32.mrf.mxu3  ;;  %v3408_v41 = vrot.slane %v3285_v36, 2 }
 0x334   :  { %v3025_v61 = vpop.f32.mrf.mxu0  ;;  %v3411_v63 = vrot.slane %v3334_v3, 2 }
 0x335   :  { %v3147_v10 = vrot.slane %v3025_v61, 1  ;;  %v3074_v50 = vpop.f32.mrf.mxu1 }
 0x336   :  { %v3150_v51 = vrot.slane %v3074_v50, 1 }
 0x337   :  { %v3148_v43 = vsel %vm439_vm1, %v3146_v4, %v3147_v10  ;;  %v3224_v11 = vadd.f32 %v3147_v10, %v7006_v16 }
 0x338   :  { %v3151_v54 = vsel %vm439_vm1, %v3149_v7, %v3150_v51  ;;  %v3222_v14 = vadd.f32 %v3148_v43, %v7914_v42  ;;  %v3225_v13 = vadd.f32 %v3150_v51, %v7008_v46 }
 0x339   :  { %v3223_v1 = vadd.f32 %v3151_v54, %v7915_v37 }
 0x33a   :  { %v3287_v8 = vpop.f32.mrf.mxu2 }
 0x33b   :  { %v3409_v20 = vrot.slane %v3287_v8, 2  ;;  %v3336_v28 = vpop.f32.mrf.mxu3 }
 0x33c   :  { %v3028_v62 = vpop.f32.mrf.mxu0  ;;  %v3412_v60 = vrot.slane %v3336_v28, 2 }
 0x33d   :  { %v3077_v5 = vpop.f32.mrf.mxu1  ;;  %v3410_v47 = vsel %vm1334_vm11, %v3408_v41, %v3409_v20  ;;  %v7259_v33 = vadd.f32 %v3409_v20, %v3224_v11  ;;  %v3152_v44 = vrot.slane %v3028_v62, 1 }
 0x33e   :  { %v7261_v57 = vadd.f32 %v3410_v47, %v3222_v14  ;;  %v3413_v32 = vsel %vm1334_vm11, %v3411_v63, %v3412_v60  ;;  %v7264_v16 = vadd.f32 %v3412_v60, %v3225_v13  ;;  %5111 = vmatmul.msk.bf16.gmra.mxu0 %vm134_vm0, %v5514_v45  ;;  %v3155_v58 = vrot.slane %v3077_v5, 1  ;;  %v4437_v5 = vld [vmem:[%s7901_s10 + $0xf8] sm:$0xff] }
 0x33f   :  { %v7270_v46 = vadd.f32 %v3413_v32, %v3223_v1  ;;  %5119 = vmatmul.msk.bf16.gmra.mxu1 %vm134_vm0, %v5514_v45  ;;  %5143 = vmatmul.msk.bf16.gmra.mxu2 %vm134_vm0, %v5514_v45 }
 0x340   :  { %5151 = vmatmul.msk.bf16.gmra.mxu3 %vm134_vm0, %v5514_v45  ;;  %4528 = vmatpush.msrb.mxu1 %v4437_v5  ;;  %v4420_v45 = vld [vmem:[%s7901_s10 + $0x70] sm:$0xff] }
 0x342   :  { %v3290_v49 = vpop.f32.mrf.mxu2 }
 0x343   :  { %v3339_v15 = vpop.f32.mrf.mxu3  ;;  %v3414_v51 = vrot.slane %v3290_v49, 2  ;;  %v4436_v49 = vld [vmem:[%s7901_s10 + $0xf0] sm:$0xff] }
 0x344   :  { %v3030_v39 = vpop.f32.mrf.mxu0  ;;  %v3417_v10 = vrot.slane %v3339_v15, 2  ;;  %4529 = vmatpush.msrb.mxu1 %v4436_v49  ;;  %v4435_v15 = vld [vmem:[%s7901_s10 + $0xe8] sm:$0xff] }
 0x345   :  { %v3153_v36 = vrot.slane %v3030_v39, 1  ;;  %v3079_v7 = vpop.f32.mrf.mxu1  ;;  %v4418_v39 = vld [vmem:[%s7901_s10 + $0x60] sm:$0xff] }
 0x346   :  { %v3156_v3 = vrot.slane %v3079_v7, 1  ;;  %4530 = vmatpush.msrb.mxu1 %v4435_v15  ;;  %v4433_v7 = vld [vmem:[%s7901_s10 + $0xd8] sm:$0xff] }
 0x347   :  { %v3154_v61 = vsel %vm439_vm1, %v3152_v44, %v3153_v36  ;;  %v3228_v43 = vadd.f32 %v3153_v36, %v7051_v22  ;;  %v4434_v44 = vld [vmem:[%s7901_s10 + $0xe0] sm:$0xff]  ;;  %v4417_v36 = vld [vmem:[%s7901_s10 + $0x58] sm:$0xff] }
 0x348   :  { %v3157_v4 = vsel %vm439_vm1, %v3155_v58, %v3156_v3  ;;  %v3226_v41 = vadd.f32 %v3154_v61, %v7034_v21  ;;  %v3229_v11 = vadd.f32 %v3156_v3, %v7053_v9  ;;  %v5515_v21 = vld [vmem:[%s7891_s0 + $0x20] sm:$0xff]  ;;  %v4419_v58 = vld [vmem:[%s7901_s10 + $0x68] sm:$0xff]  ;;  %4531 = vmatpush.msrb.mxu1 %v4434_v44  ;;  %v4412_v44 = vld [vmem:[%s7901_s10 + $0x30] sm:$0xff] }
 0x349   :  { %v3227_v62 = vadd.f32 %v3157_v4, %v7037_v2  ;;  %v4421_v2 = vld [vmem:[%s7901_s10 + $0x78] sm:$0xff] }
 0x34a   :  { %v3292_v50 = vpop.f32.mrf.mxu2  ;;  %4508 = vmatpush.msrb.mxu0 %v4421_v2  ;;  %4532 = vmatpush.msrb.mxu1 %v4433_v7  ;;  %v4451_v2 = vld [vmem:[%s7901_s10 + $0x168] sm:$0xff]  ;;  %v4450_v7 = vld [vmem:[%s7901_s10 + $0x160] sm:$0xff] }
 0x34b   :  { %v3415_v54 = vrot.slane %v3292_v50, 2  ;;  %v3341_v63 = vpop.f32.mrf.mxu3  ;;  %v4416_v50 = vld [vmem:[%s7901_s10 + $0x50] sm:$0xff] }
 0x34c   :  { %v7278_v8 = vpop.f32.mrf.mxu0  ;;  %v3418_v20 = vrot.slane %v3341_v63, 2  ;;  %4509 = vmatpush.msrb.mxu0 %v4420_v45  ;;  %v4431_v63 = vld [vmem:[%s7901_s10 + $0xc8] sm:$0xff] }
 0x34d   :  { %v7282_v28 = vpop.f32.mrf.mxu1  ;;  %v3416_v42 = vsel %vm1334_vm11, %v3414_v51, %v3415_v54  ;;  %v7286_v14 = vadd.f32 %v3415_v54, %v3228_v43  ;;  %v4432_v51 = vld [vmem:[%s7901_s10 + $0xd0] sm:$0xff]  ;;  %v5516_v43 = vld [vmem:[%s7891_s0 + $0x28] sm:$0xff] }
 0x34e   :  { %v7288_v13 = vadd.f32 %v3416_v42, %v3226_v41  ;;  %v3419_v22 = vsel %vm1334_vm11, %v3417_v10, %v3418_v20  ;;  %v7291_v60 = vadd.f32 %v3418_v20, %v3229_v11  ;;  %5112 = vmatmul.msk.bf16.gmra.mxu0 %vm134_vm0, %v5515_v21  ;;  %4533 = vmatpush.msrb.mxu1 %v4432_v51  ;;  %v4415_v54 = vld [vmem:[%s7901_s10 + $0x48] sm:$0xff]  ;;  %v4453_v41 = vld [vmem:[%s7901_s10 + $0x178] sm:$0xff]  ;;  %v4414_v11 = vld [vmem:[%s7901_s10 + $0x40] sm:$0xff] }
 0x34f   :  { %v7297_v9 = vadd.f32 %v3419_v22, %v3227_v62  ;;  %5120 = vmatmul.msk.bf16.gmra.mxu1 %vm134_vm0, %v5515_v21  ;;  %5144 = vmatmul.msk.bf16.gmra.mxu2 %vm134_vm0, %v5515_v21  ;;  %v4430_v20 = vld [vmem:[%s7901_s10 + $0xc0] sm:$0xff]  ;;  %v4452_v62 = vld [vmem:[%s7901_s10 + $0x170] sm:$0xff]  ;;  %v4413_v42 = vld [vmem:[%s7901_s10 + $0x38] sm:$0xff] }
 0x350   :  { %5152 = vmatmul.msk.bf16.gmra.mxu3 %vm134_vm0, %v5515_v21  ;;  %4510 = vmatpush.msrb.mxu0 %v4419_v58  ;;  %v4429_v21 = vld [vmem:[%s7901_s10 + $0xb8] sm:$0xff]  ;;  %v4427_v51 = vld [vmem:[%s7901_s10 + $0xa8] sm:$0xff] }
 0x351   :  { %4534 = vmatpush.msrb.mxu1 %v4431_v63  ;;  %4548 = vmatpush.msrb.mxu2 %v4453_v41  ;;  %v4410_v63 = vld [vmem:[%s7901_s10 + $0x20] sm:$0xff] }
 0x352   :  { %v7308_v37 = vpop.f32.mrf.mxu2  ;;  %4511 = vmatpush.msrb.mxu0 %v4418_v39  ;;  %v4426_v41 = vld [vmem:[%s7901_s10 + $0xa0] sm:$0xff] }
 0x353   :  { %v7310_v1 = vpop.f32.mrf.mxu3  ;;  %4535 = vmatpush.msrb.mxu1 %v4430_v20  ;;  %4549 = vmatpush.msrb.mxu2 %v4452_v62  ;;  %v4409_v20 = vld [vmem:[%s7901_s10 + $0x18] sm:$0xff] }
 0x354   :  { %v7312_v47 = vpop.f32.mrf.mxu0  ;;  %4512 = vmatpush.msrb.mxu0 %v4417_v36  ;;  %v4428_v36 = vld [vmem:[%s7901_s10 + $0xb0] sm:$0xff] }
 0x355   :  { %v7314_v32 = vpop.f32.mrf.mxu1  ;;  %4536 = vmatpush.msrb.mxu1 %v4429_v21  ;;  %4550 = vmatpush.msrb.mxu2 %v4451_v2  ;;  %v4425_v21 = vld [vmem:[%s7901_s10 + $0x98] sm:$0xff]  ;;  %v4447_v2 = vld [vmem:[%s7901_s10 + $0x148] sm:$0xff] }
 0x356   :  { %4513 = vmatpush.msrb.mxu0 %v4416_v50  ;;  %v4411_v50 = vld [vmem:[%s7901_s10 + $0x28] sm:$0xff] }
 0x357   :  { %4537 = vmatpush.msrb.mxu1 %v4428_v36  ;;  %4551 = vmatpush.msrb.mxu2 %v4450_v7 }
 0x358   :  { %4514 = vmatpush.msrb.mxu0 %v4415_v54 }
 0x359   :  { %4538 = vmatpush.msrb.mxu1 %v4427_v51 }
 0x35a   :  { %v7340_v3 = vpop.f32.mrf.mxu2  ;;  %4515 = vmatpush.msrb.mxu0 %v4414_v11  ;;  %v4448_v11 = vld [vmem:[%s7901_s10 + $0x150] sm:$0xff] }
 0x35b   :  { %v7342_v61 = vpop.f32.mrf.mxu3  ;;  %4539 = vmatpush.msrb.mxu1 %v4426_v41  ;;  %v4423_v41 = vld [vmem:[%s7901_s10 + $0x88] sm:$0xff] }
 0x35c   :  { %v3038_v4 = vpop.f32.mrf.mxu0  ;;  %4516 = vmatpush.msrb.mxu0 %v4413_v42 }
 0x35d   :  { %v3087_v10 = vpop.f32.mrf.mxu1  ;;  %v3164_v58 = vrot.slane %v3038_v4, 1  ;;  %4540 = vmatpush.msrb.mxu1 %v4425_v21  ;;  %v4444_v21 = vld [vmem:[%s7901_s10 + $0x130] sm:$0xff] }
 0x35e   :  { %5113 = vmatmul.msk.bf16.gmra.mxu0 %vm134_vm0, %v5516_v43  ;;  %v3167_v5 = vrot.slane %v3087_v10, 1 }
 0x35f   :  { %5121 = vmatmul.msk.bf16.gmra.mxu1 %vm134_vm0, %v5516_v43  ;;  %5145 = vmatmul.msk.bf16.gmra.mxu2 %vm134_vm0, %v5516_v43 }
 0x360   :  { %5153 = vmatmul.msk.bf16.gmra.mxu3 %vm134_vm0, %v5516_v43  ;;  %4517 = vmatpush.msrb.mxu0 %v4412_v44  ;;  %v4449_v43 = vld [vmem:[%s7901_s10 + $0x158] sm:$0xff] }
 0x361   :  { %4552 = vmatpush.msrb.mxu2 %v4449_v43 }
 0x362   :  { %v3300_v22 = vpop.f32.mrf.mxu2  ;;  %4518 = vmatpush.msrb.mxu0 %v4411_v50 }
 0x363   :  { %v3349_v45 = vpop.f32.mrf.mxu3  ;;  %4553 = vmatpush.msrb.mxu2 %v4448_v11  ;;  %v4445_v11 = vld [vmem:[%s7901_s10 + $0x138] sm:$0xff] }
 0x364   :  { %v3040_v49 = vpop.f32.mrf.mxu0  ;;  %v3429_v62 = vrot.slane %v3349_v45, 2  ;;  %4519 = vmatpush.msrb.mxu0 %v4410_v63 }
 0x365   :  { %v3165_v15 = vrot.slane %v3040_v49, 1  ;;  %v3089_v39 = vpop.f32.mrf.mxu1  ;;  %4554 = vmatpush.msrb.mxu2 %v4447_v2 }
 0x366   :  { %v3168_v10 = vrot.slane %v3089_v39, 1  ;;  %4520 = vmatpush.msrb.mxu0 %v4409_v20  ;;  %v4406_v20 = vld [vmem:[%s7901_s10] sm:$0xff] }
 0x367   :  { %v3166_v4 = vsel %vm439_vm1, %v3164_v58, %v3165_v15  ;;  %v3236_v49 = vadd.f32 %v3165_v15, %v7126_v35  ;;  %v4408_v35 = vld [vmem:[%s7901_s10 + $0x10] sm:$0xff] }
 0x368   :  { %v3169_v54 = vsel %vm439_vm1, %v3167_v5, %v3168_v10  ;;  %v3426_v5 = vrot.slane %v3300_v22, 2  ;;  %v3234_v45 = vadd.f32 %v3166_v4, %v7109_v56  ;;  %v3237_v36 = vadd.f32 %v3168_v10, %v7128_v29  ;;  %v4424_v15 = vld [vmem:[%s7901_s10 + $0x90] sm:$0xff]  ;;  %v4446_v10 = vld [vmem:[%s7901_s10 + $0x140] sm:$0xff]  ;;  %4521 = vmatpush.msrb.mxu0 %v4408_v35 }
 0x369   :  { %v3235_v51 = vadd.f32 %v3169_v54, %v7112_v53  ;;  %v5517_v53 = vld [vmem:[%s7891_s0 + $0x30] sm:$0xff]  ;;  %v4407_v54 = vld [vmem:[%s7901_s10 + $0x8] sm:$0xff]  ;;  %4541 = vmatpush.msrb.mxu1 %v4424_v15  ;;  %4555 = vmatpush.msrb.mxu2 %v4446_v10 }
 0x36a   :  { %v3302_v42 = vpop.f32.mrf.mxu2  ;;  %4522 = vmatpush.msrb.mxu0 %v4407_v54 }
 0x36b   :  { %v3427_v58 = vrot.slane %v3302_v42, 2  ;;  %v3351_v39 = vpop.f32.mrf.mxu3  ;;  %v4422_v42 = vld [vmem:[%s7901_s10 + $0x80] sm:$0xff]  ;;  %4542 = vmatpush.msrb.mxu1 %v4423_v41  ;;  %4556 = vmatpush.msrb.mxu2 %v4445_v11 }
 0x36c   :  { %v3043_v44 = vpop.f32.mrf.mxu0  ;;  %v3430_v7 = vrot.slane %v3351_v39, 2  ;;  %4523 = vmatpush.msrb.mxu0 %v4406_v20 }
 0x36d   :  { %v3092_v50 = vpop.f32.mrf.mxu1  ;;  %v3428_v43 = vsel %vm1334_vm11, %v3426_v5, %v3427_v58  ;;  %v7427_v63 = vadd.f32 %v3427_v58, %v3236_v49  ;;  %v3170_v58 = vrot.slane %v3043_v44, 1  ;;  %4543 = vmatpush.msrb.mxu1 %v4422_v42  ;;  %4557 = vmatpush.msrb.mxu2 %v4444_v21  ;;  %v4441_v44 = vld [vmem:[%s7901_s10 + $0x118] sm:$0xff] }
 0x36e   :  { %v7432_v22 = vadd.f32 %v3428_v43, %v3234_v45  ;;  %v3431_v56 = vsel %vm1334_vm11, %v3429_v62, %v3430_v7  ;;  %v7435_v29 = vadd.f32 %v3430_v7, %v3237_v36  ;;  %5114 = vmatmul.msk.bf16.gmra.mxu0 %vm134_vm0, %v5517_v53  ;;  %v3173_v2 = vrot.slane %v3092_v50, 1  ;;  %v4443_v36 = vld [vmem:[%s7901_s10 + $0x128] sm:$0xff]  ;;  %v4442_v50 = vld [vmem:[%s7901_s10 + $0x120] sm:$0xff] }
 0x36f   :  { %v7447_v4 = vadd.f32 %v3431_v56, %v3235_v51  ;;  %5122 = vmatmul.msk.bf16.gmra.mxu1 %vm134_vm0, %v5517_v53  ;;  %5146 = vmatmul.msk.bf16.gmra.mxu2 %vm134_vm0, %v5517_v53 }
 0x370   :  { %5154 = vmatmul.msk.bf16.gmra.mxu3 %vm134_vm0, %v5517_v53  ;;  %4558 = vmatpush.msrb.mxu2 %v4443_v36  ;;  %v4440_v53 = vld [vmem:[%s7901_s10 + $0x110] sm:$0xff] }
 0x372   :  { %v3305_v62 = vpop.f32.mrf.mxu2  ;;  %4559 = vmatpush.msrb.mxu2 %v4442_v50 }
 0x373   :  { %v3354_v5 = vpop.f32.mrf.mxu3  ;;  %v3432_v15 = vrot.slane %v3305_v62, 2 }
 0x374   :  { %v3045_v49 = vpop.f32.mrf.mxu0  ;;  %v3435_v35 = vrot.slane %v3354_v5, 2  ;;  %4560 = vmatpush.msrb.mxu2 %v4441_v44 }
 0x375   :  { %v3171_v39 = vrot.slane %v3045_v49, 1  ;;  %v3094_v45 = vpop.f32.mrf.mxu1 }
 0x376   :  { %v3174_v7 = vrot.slane %v3094_v45, 1  ;;  %4561 = vmatpush.msrb.mxu2 %v4440_v53  ;;  %v4438_v45 = vld [vmem:[%s7901_s10 + $0x100] sm:$0xff] }
 0x377   :  { %v3172_v51 = vsel %vm439_vm1, %v3170_v58, %v3171_v39  ;;  %v3240_v10 = vadd.f32 %v3171_v39, %v7157_v17  ;;  %v4439_v17 = vld [vmem:[%s7901_s10 + $0x108] sm:$0xff] }
 0x378   :  { %v3175_v43 = vsel %vm439_vm1, %v3173_v2, %v3174_v7  ;;  %v3238_v20 = vadd.f32 %v3172_v51, %v7140_v6  ;;  %v3241_v42 = vadd.f32 %v3174_v7, %v7159_v24  ;;  %v5518_v24 = vld [vmem:[%s7891_s0 + $0x38] sm:$0xff]  ;;  %4562 = vmatpush.msrb.mxu2 %v4439_v17 }
 0x379   :  { %v3239_v5 = vadd.f32 %v3175_v43, %v7143_v31 }
 0x37a   :  { %v3307_v56 = vpop.f32.mrf.mxu2  ;;  %4563 = vmatpush.msrb.mxu2 %v4438_v45 }
 0x37b   :  { %v3433_v54 = vrot.slane %v3307_v56, 2  ;;  %v3356_v41 = vpop.f32.mrf.mxu3 }
 0x37c   :  { %v3048_v11 = vpop.f32.mrf.mxu0  ;;  %v3436_v21 = vrot.slane %v3356_v41, 2 }
 0x37d   :  { %v3097_v2 = vpop.f32.mrf.mxu1  ;;  %v3434_v49 = vsel %vm1334_vm11, %v3432_v15, %v3433_v54  ;;  %v7489_v58 = vadd.f32 %v3433_v54, %v3240_v10  ;;  %v3176_v43 = vrot.slane %v3048_v11, 1  ;;  %v5229_v15 = vpop.permute.xlu0 %5228 }
 0x37e   :  { %v7494_v62 = vadd.f32 %v3434_v49, %v3238_v20  ;;  %v3437_v39 = vsel %vm1334_vm11, %v3435_v35, %v3436_v21  ;;  %v7497_v6 = vadd.f32 %v3436_v21, %v3241_v42  ;;  %5115 = vmatmul.msk.bf16.gmra.mxu0 %vm134_vm0, %v5518_v24  ;;  %v3179_v7 = vrot.slane %v3097_v2, 1 }
 0x37f   :  { %v7503_v31 = vadd.f32 %v3437_v39, %v3239_v5  ;;  %5123 = vmatmul.msk.bf16.gmra.mxu1 %vm134_vm0, %v5518_v24  ;;  %5147 = vmatmul.msk.bf16.gmra.mxu2 %vm134_vm0, %v5518_v24  ;;  %v5230_v54 = vunpack.i.l.bf16 %v5229_v15 }
 0x380   :  { %5155 = vmatmul.msk.bf16.gmra.mxu3 %vm134_vm0, %v5518_v24 }
 0x382   :  { %v3310_v36 = vpop.f32.mrf.mxu2 }
 0x383   :  { %v3359_v51 = vpop.f32.mrf.mxu3  ;;  %v3438_v42 = vrot.slane %v3310_v36, 2 }
 0x384   :  { %v3050_v50 = vpop.f32.mrf.mxu0  ;;  %v3441_v41 = vrot.slane %v3359_v51, 2 }
 0x385   :  { %v3177_v44 = vrot.slane %v3050_v50, 1  ;;  %v3099_v35 = vpop.f32.mrf.mxu1 }
 0x386   :  { %v3180_v56 = vrot.slane %v3099_v35, 1 }
 0x387   :  { %v3178_v53 = vsel %vm439_vm1, %v3176_v43, %v3177_v44  ;;  %v3244_v21 = vadd.f32 %v3177_v44, %v7188_v27  ;;  %v7916_v43 = vld [vmem:[#allocation5_spill] sm:$0xff]  ;;  %v7917_v44 = vld [vmem:[#allocation6_spill] sm:$0xff] }
 0x388   :  { %v3181_v10 = vsel %vm439_vm1, %v3179_v7, %v3180_v56  ;;  %v3242_v17 = vadd.f32 %v3178_v53, %v7171_v55  ;;  %v3245_v11 = vadd.f32 %v3180_v56, %v7190_v12  ;;  %v4402_v55 = vsel %vm629_vm2, %v7917_v44, %v5230_v54 }
 0x389   :  { %v3243_v45 = vadd.f32 %v3181_v10, %v7174_v30 }
 0x38a   :  { %v3312_v20 = vpop.f32.mrf.mxu2 }
 0x38b   :  { %v3439_v5 = vrot.slane %v3312_v20, 2  ;;  %v3361_v49 = vpop.f32.mrf.mxu3 }
 0x38c   :  { %v3537_v2 = vpop.f32.mrf.mxu0  ;;  %v3442_v39 = vrot.slane %v3361_v49, 2 }
 0x38d   :  { %v3586_v24 = vpop.f32.mrf.mxu1  ;;  %v3440_v50 = vsel %vm1334_vm11, %v3438_v42, %v3439_v5  ;;  %v7518_v7 = vadd.f32 %v3439_v5, %v3244_v21  ;;  %v3658_v10 = vrot.slane %v3537_v2, 3  ;;  %v5231_v5 = vunpack.i.h.bf16 %v5229_v15 }
 0x38e   :  { %v7520_v51 = vadd.f32 %v3440_v50, %v3242_v17  ;;  %v3443_v36 = vsel %vm1334_vm11, %v3441_v41, %v3442_v39  ;;  %v7523_v27 = vadd.f32 %v3442_v39, %v3245_v11  ;;  %4524 = vmatmul.f32.vlgmr.msrb.gmra.mxu0 %v7916_v43  ;;  %v3661_v30 = vrot.slane %v3586_v24, 3  ;;  %v2833_v24 = vld [vmem:[%s7900_s9] sm:$0x3] }
 0x38f   :  { %v7528_v12 = vadd.f32 %v3443_v36, %v3243_v45  ;;  %4544 = vmatmul.f32.vlgmr.msrb.gmra.mxu1 %v4402_v55  ;;  %v4314_v36 = vsel %vm629_vm2, %v5230_v54, %v5231_v5 }
 0x392   :  { %v3799_v35 = vpop.f32.mrf.mxu2 }
 0x393   :  { %v3848_v56 = vpop.f32.mrf.mxu3  ;;  %v3921_v44 = vrot.slane %v3799_v35, 4 }
 0x394   :  { %v3539_v53 = vpop.f32.mrf.mxu0  ;;  %v3924_v43 = vrot.slane %v3848_v56, 4 }
 0x395   :  { %v3659_v20 = vrot.slane %v3539_v53, 3  ;;  %v3588_v42 = vpop.f32.mrf.mxu1 }
 0x396   :  { %v3662_v21 = vrot.slane %v3588_v42, 3 }
 0x397   :  { %v3660_v41 = vsel %vm2494_vm13, %v3658_v10, %v3659_v20  ;;  %v3740_v49 = vadd.f32 %v3659_v20, %v7211_v0 }
 0x398   :  { %v3738_v17 = vadd.f32 %v3660_v41, %v7213_v23  ;;  %v3663_v11 = vsel %vm2494_vm13, %v3661_v30, %v3662_v21  ;;  %v3741_v39 = vadd.f32 %v3662_v21, %v7216_v18  ;;  %v7540_v23 = vperm.slane %v2833_v24, 0 }
 0x399   :  { %v3739_v2 = vadd.f32 %v3663_v11, %v7222_v25  ;;  %v5234_v45 = vpop.permute.xlu0 %5233  ;;  %v7544_v25 = vperm.slane %v2833_v24, 1 }
 0x39a   :  { %v5236_v50 = vunpack.i.h.bf16 %v5234_v45  ;;  %v5235_v15 = vunpack.i.l.bf16 %v5234_v45  ;;  %v3801_v0 = vpop.f32.mrf.mxu2 }
 0x39b   :  { %v3922_v18 = vrot.slane %v3801_v0, 4  ;;  %v3850_v30 = vpop.f32.mrf.mxu3 }
 0x39c   :  { %v4403_v55 = vsel %vm4351_vm15, %v4314_v36, %v5235_v15  ;;  %v3542_v53 = vpop.f32.mrf.mxu0  ;;  %v7542_v10 = vsel %vm4351_vm15, %v5235_v15, %v5236_v50  ;;  %v3925_v20 = vrot.slane %v3850_v30, 4 }
 0x39d   :  { %4564 = vmatmul.f32.vlgmr.msrb.gmra.mxu2 %v4403_v55  ;;  %v3591_v42 = vpop.f32.mrf.mxu1  ;;  %v3923_v21 = vsel %vm3920_vm3, %v3921_v44, %v3922_v18  ;;  %v4003_v54 = vadd.f32 %v3922_v18, %v3740_v49 }
 0x39e   :  { %v4001_v56 = vadd.f32 %v3923_v21, %v3738_v17  ;;  %v3926_v5 = vsel %vm3920_vm3, %v3924_v43, %v3925_v20  ;;  %v4004_v41 = vadd.f32 %v3925_v20, %v3741_v39  ;;  %v3667_v36 = vrot.slane %v3591_v42, 3 }
 0x39f   :  { %v4040_v35 = vadd.f32 %v7540_v23, %v4003_v54  ;;  %v4002_v11 = vadd.f32 %v3926_v5, %v3739_v2  ;;  %v3664_v17 = vrot.slane %v3542_v53, 3 }
 0x3a0   :  { %v4038_v45 = vadd.f32 %v7540_v23, %v4001_v56  ;;  %v4041_v50 = vadd.f32 %v7544_v25, %v4004_v41 }
 0x3a1   :  { %5431 = vtanh.f32 %v4040_v35  ;;  %v4039_v24 = vadd.f32 %v7544_v25, %v4002_v11 }
 0x3a2   :  { %5433 = vtanh.f32 %v4038_v45  ;;  %v3804_v15 = vpop.f32.mrf.mxu2 }
 0x3a3   :  { %5435 = vtanh.f32 %v4039_v24  ;;  %v3853_v0 = vpop.f32.mrf.mxu3 }
 0x3a4   :  { %v3544_v49 = vpop.f32.mrf.mxu0  ;;  %5437 = vtanh.f32 %v4041_v50  ;;  %v3930_v11 = vrot.slane %v3853_v0, 4 }
 0x3a5   :  { %v3665_v43 = vrot.slane %v3544_v49, 3  ;;  %v3593_v39 = vpop.f32.mrf.mxu1 }
 0x3a6   :  { %v3668_v44 = vrot.slane %v3593_v39, 3 }
 0x3a7   :  { %v3666_v2 = vsel %vm2494_vm13, %v3664_v17, %v3665_v43  ;;  %v3744_v55 = vadd.f32 %v3665_v43, %v7236_v34  ;;  %v5432_v18 = vpop.eup %5431 }
 0x3a8   :  { %v3742_v30 = vadd.f32 %v3666_v2, %v7238_v38  ;;  %v3669_v20 = vsel %vm2494_vm13, %v3667_v36, %v3668_v44  ;;  %v3745_v21 = vadd.f32 %v3668_v44, %v7241_v19  ;;  %v5434_v54 = vpop.eup %5433  ;;  %v4102_v42 = vsel %vm3920_vm3, %v5432_v18, -inf }
 0x3a9   :  { %v3743_v53 = vadd.f32 %v3669_v20, %v7247_v40  ;;  %v5436_v56 = vpop.eup %5435  ;;  %v4103_v5 = vmax.f32 %v5434_v54, %v4102_v42  ;;  %v3927_v38 = vrot.slane %v3804_v15, 4 }
 0x3aa   :  { %v5438_v41 = vpop.eup %5437  ;;  %v4110_v35 = vsel %vm629_vm2, %v5436_v56, -inf  ;;  %v3806_v34 = vpop.f32.mrf.mxu2 }
 0x3ab   :  { %v4112_v45 = vsel %vm4111_vm12, %v5438_v41, -inf  ;;  %v3928_v50 = vrot.slane %v3806_v34, 4  ;;  %v3855_v24 = vpop.f32.mrf.mxu3  ;;  %v4104_v54 = vrot.slane %v4103_v5, 4 }
 0x3ac   :  { %v3547_v36 = vpop.f32.mrf.mxu0  ;;  %v4113_v19 = vmax.f32 %v4110_v35, %v4112_v45  ;;  %v3931_v49 = vrot.slane %v3855_v24, 4 }
 0x3ad   :  { %v3596_v17 = vpop.f32.mrf.mxu1  ;;  %v3929_v43 = vsel %vm3920_vm3, %v3927_v38, %v3928_v50  ;;  %v4007_v39 = vadd.f32 %v3928_v50, %v3744_v55 }
 0x3ae   :  { %v4005_v40 = vadd.f32 %v3929_v43, %v3742_v30  ;;  %v3932_v44 = vsel %vm3920_vm3, %v3930_v11, %v3931_v49  ;;  %v4008_v2 = vadd.f32 %v3931_v49, %v3745_v21  ;;  %v4114_v56 = vrot.slane %v4113_v19, 4 }
 0x3af   :  { %v4044_v18 = vadd.f32 %v7540_v23, %v4007_v39  ;;  %v4006_v0 = vadd.f32 %v3932_v44, %v3743_v53  ;;  %v3673_v55 = vrot.slane %v3596_v17, 3  ;;  %v3670_v21 = vrot.slane %v3547_v36, 3 }
 0x3b0   :  { %v4042_v20 = vadd.f32 %v7540_v23, %v4005_v40  ;;  %v4045_v15 = vadd.f32 %v7544_v25, %v4008_v2  ;;  %v4105_v53 = vmax.f32 %v4103_v5, %v4104_v54  ;;  %v4115_v38 = vmax.f32 %v4113_v19, %v4114_v56 }
 0x3b1   :  { %5439 = vtanh.f32 %v4044_v18  ;;  %v4043_v42 = vadd.f32 %v7544_v25, %v4006_v0 }
 0x3b2   :  { %5441 = vtanh.f32 %v4042_v20  ;;  %v3809_v41 = vpop.f32.mrf.mxu2  ;;  %v4106_v5 = vrot.slane %v4105_v53, 2  ;;  %v4116_v0 = vrot.slane %v4115_v38, 2 }
 0x3b3   :  { %5443 = vtanh.f32 %v4043_v42  ;;  %v3858_v30 = vpop.f32.mrf.mxu3  ;;  %v3933_v42 = vrot.slane %v3809_v41, 4 }
 0x3b4   :  { %v3549_v35 = vpop.f32.mrf.mxu0  ;;  %5445 = vtanh.f32 %v4045_v15 }
 0x3b5   :  { %v3671_v11 = vrot.slane %v3549_v35, 3  ;;  %v3598_v34 = vpop.f32.mrf.mxu1 }
 0x3b6   :  { %v3674_v45 = vrot.slane %v3598_v34, 3 }
 0x3b7   :  { %v3672_v50 = vsel %vm2494_vm13, %v3670_v21, %v3671_v11  ;;  %v3748_v24 = vadd.f32 %v3671_v11, %v7259_v33  ;;  %v5440_v49 = vpop.eup %5439  ;;  %v3936_v33 = vrot.slane %v3858_v30, 4 }
 0x3b8   :  { %v3746_v43 = vadd.f32 %v3672_v50, %v7261_v57  ;;  %v3675_v39 = vsel %vm2494_vm13, %v3673_v55, %v3674_v45  ;;  %v3749_v17 = vadd.f32 %v3674_v45, %v7264_v16  ;;  %v5442_v40 = vpop.eup %5441  ;;  %v4120_v44 = vsel %vm3920_vm3, %v5440_v49, -inf }
 0x3b9   :  { %v3747_v36 = vadd.f32 %v3675_v39, %v7270_v46  ;;  %v5444_v2 = vpop.eup %5443  ;;  %v4121_v18 = vmax.f32 %v5442_v40, %v4120_v44  ;;  %v4107_v46 = vmax.f32 %v4105_v53, %v4106_v5  ;;  %v4117_v44 = vmax.f32 %v4115_v38, %v4116_v0 }
 0x3ba   :  { %v5446_v19 = vpop.eup %5445  ;;  %v4128_v20 = vsel %vm629_vm2, %v5444_v2, -inf  ;;  %v3811_v15 = vpop.f32.mrf.mxu2 }
 0x3bb   :  { %v4122_v54 = vrot.slane %v4121_v18, 4  ;;  %v4129_v57 = vsel %vm4111_vm12, %v5446_v19, -inf  ;;  %v3934_v56 = vrot.slane %v3811_v15, 4  ;;  %v3860_v16 = vpop.f32.mrf.mxu3  ;;  %v4108_v53 = vrot.slane %v4107_v46, 1 }
 0x3bc   :  { %v3552_v55 = vpop.f32.mrf.mxu0  ;;  %v4130_v35 = vmax.f32 %v4128_v20, %v4129_v57  ;;  %v3937_v21 = vrot.slane %v3860_v16, 4 }
 0x3bd   :  { %v3601_v11 = vpop.f32.mrf.mxu1  ;;  %v4123_v34 = vmax.f32 %v4121_v18, %v4122_v54  ;;  %v3935_v45 = vsel %vm3920_vm3, %v3933_v42, %v3934_v56  ;;  %v4011_v50 = vadd.f32 %v3934_v56, %v3748_v24  ;;  %v3676_v42 = vrot.slane %v3552_v55, 3 }
 0x3be   :  { %v4131_v49 = vrot.slane %v4130_v35, 4  ;;  %v4009_v39 = vadd.f32 %v3935_v45, %v3746_v43  ;;  %v3938_v30 = vsel %vm3920_vm3, %v3936_v33, %v3937_v21  ;;  %v4012_v40 = vadd.f32 %v3937_v21, %v3749_v17 }
 0x3bf   :  { %v4124_v2 = vrot.slane %v4123_v34, 2  ;;  %v4048_v41 = vadd.f32 %v7540_v23, %v4011_v50  ;;  %v4010_v19 = vadd.f32 %v3938_v30, %v3747_v36  ;;  %v4118_v33 = vrot.slane %v4117_v44, 1 }
 0x3c0   :  { %v4132_v15 = vmax.f32 %v4130_v35, %v4131_v49  ;;  %v4046_v20 = vadd.f32 %v7540_v23, %v4009_v39  ;;  %v4049_v57 = vadd.f32 %v7544_v25, %v4012_v40  ;;  %v3679_v38 = vrot.slane %v3601_v11, 3 }
 0x3c1   :  { %v4125_v5 = vmax.f32 %v4123_v34, %v4124_v2  ;;  %5447 = vtanh.f32 %v4048_v41  ;;  %v4047_v24 = vadd.f32 %v7544_v25, %v4010_v19  ;;  %v4109_v21 = vmax.f32 %v4107_v46, %v4108_v53 }
 0x3c2   :  { %v4133_v18 = vrot.slane %v4132_v15, 2  ;;  %5449 = vtanh.f32 %v4046_v20  ;;  %v3814_v43 = vpop.f32.mrf.mxu2  ;;  %v4119_v2 = vmax.f32 %v4117_v44, %v4118_v33 }
 0x3c3   :  { %v4126_v17 = vrot.slane %v4125_v5, 1  ;;  %5451 = vtanh.f32 %v4047_v24  ;;  %v3863_v0 = vpop.f32.mrf.mxu3 }
 0x3c4   :  { %v3554_v54 = vpop.f32.mrf.mxu0  ;;  %v4134_v36 = vmax.f32 %v4132_v15, %v4133_v18  ;;  %5453 = vtanh.f32 %v4049_v57  ;;  %v3158_v15 = vrot.slane %v7278_v8, 1  ;;  %v3159_v8 = vrot.slane %v7312_v47, 1 }
 0x3c5   :  { %v3677_v56 = vrot.slane %v3554_v54, 3  ;;  %v3603_v16 = vpop.f32.mrf.mxu1  ;;  %v4127_v34 = vmax.f32 %v4125_v5, %v4126_v17  ;;  %v3942_v5 = vrot.slane %v3863_v0, 4 }
 0x3c6   :  { %v3680_v35 = vrot.slane %v3603_v16, 3  ;;  %v4135_v45 = vrot.slane %v4134_v36, 1  ;;  %v3161_v16 = vrot.slane %v7282_v28, 1 }
 0x3c7   :  { %v3678_v50 = vsel %vm2494_vm13, %v3676_v42, %v3677_v56  ;;  %v5448_v49 = vpop.eup %5447  ;;  %v7586_v11 = vsel %vm4257_vm4, %v4127_v34, %v4109_v21  ;;  %v3752_v33 = vadd.f32 %v3677_v56, %v7286_v14 }
 0x3c8   :  { %v3750_v39 = vadd.f32 %v3678_v50, %v7288_v13  ;;  %v3681_v30 = vsel %vm2494_vm13, %v3679_v38, %v3680_v35  ;;  %v5450_v40 = vpop.eup %5449  ;;  %v4136_v41 = vmax.f32 %v4134_v36, %v4135_v45  ;;  %v4137_v55 = vsel %vm3920_vm3, %v5448_v49, -inf }
 0x3c9   :  { %v3751_v19 = vadd.f32 %v3681_v30, %v7297_v9  ;;  %v5452_v46 = vpop.eup %5451  ;;  %v4138_v20 = vmax.f32 %v5450_v40, %v4137_v55  ;;  %v3939_v13 = vrot.slane %v3814_v43, 4  ;;  %v3753_v42 = vadd.f32 %v3680_v35, %v7291_v60 }
 0x3ca   :  { %v5454_v57 = vpop.eup %5453  ;;  %v4145_v53 = vsel %vm629_vm2, %v5452_v46, -inf  ;;  %v3816_v24 = vpop.f32.mrf.mxu2  ;;  %v7593_v18 = vsel %vm4257_vm4, %v4136_v41, %v4119_v2  ;;  %v3162_v30 = vrot.slane %v7314_v32, 1  ;;  %v3160_v35 = vsel %vm439_vm1, %v3158_v15, %v3159_v8 }
 0x3cb   :  { %v4139_v17 = vrot.slane %v4138_v20, 4  ;;  %v4146_v44 = vsel %vm4111_vm12, %v5454_v57, -inf  ;;  %v3940_v38 = vrot.slane %v3816_v24, 4  ;;  %v3865_v9 = vpop.f32.mrf.mxu3  ;;  %v3421_v55 = vrot.slane %v7340_v3, 2 }
 0x3cc   :  { %v7597_v54 = vpop.f32.mrf.mxu0  ;;  %v4147_v36 = vmax.f32 %v4145_v53, %v4146_v44  ;;  %v3943_v43 = vrot.slane %v3865_v9, 4  ;;  %v3424_v32 = vrot.slane %v7342_v61, 2  ;;  %v3420_v15 = vrot.slane %v7308_v37, 2 }
 0x3cd   :  { %v7601_v0 = vpop.f32.mrf.mxu1  ;;  %v4140_v21 = vmax.f32 %v4138_v20, %v4139_v17  ;;  %v3941_v34 = vsel %vm3920_vm3, %v3939_v13, %v3940_v38  ;;  %v4015_v45 = vadd.f32 %v3940_v38, %v3752_v33  ;;  %v3423_v20 = vrot.slane %v7310_v1, 2 }
 0x3ce   :  { %v4148_v50 = vrot.slane %v4147_v36, 4  ;;  %v4013_v14 = vadd.f32 %v3941_v34, %v3750_v39  ;;  %v3944_v56 = vsel %vm3920_vm3, %v3942_v5, %v3943_v43  ;;  %v4016_v49 = vadd.f32 %v3943_v43, %v3753_v42 }
 0x3cf   :  { %v4141_v47 = vrot.slane %v4140_v21, 2  ;;  %v4052_v40 = vadd.f32 %v7540_v23, %v4015_v45  ;;  %v4014_v60 = vadd.f32 %v3944_v56, %v3751_v19  ;;  %v3232_v53 = vadd.f32 %v3159_v8, %v7095_v59 }
 0x3d0   :  { %v4149_v2 = vmax.f32 %v4147_v36, %v4148_v50  ;;  %v4050_v28 = vadd.f32 %v7540_v23, %v4013_v14  ;;  %v4053_v41 = vadd.f32 %v7544_v25, %v4016_v49  ;;  %v3230_v3 = vadd.f32 %v3160_v35, %v7078_v48 }
 0x3d1   :  { %v4142_v46 = vmax.f32 %v4140_v21, %v4141_v47  ;;  %5455 = vtanh.f32 %v4052_v40  ;;  %v4051_v39 = vadd.f32 %v7544_v25, %v4014_v60  ;;  %v3163_v17 = vsel %vm439_vm1, %v3161_v16, %v3162_v30 }
 0x3d2   :  { %v4150_v57 = vrot.slane %v4149_v2, 2  ;;  %5457 = vtanh.f32 %v4050_v28  ;;  %v3819_v19 = vpop.f32.mrf.mxu2  ;;  %v3233_v61 = vadd.f32 %v3162_v30, %v7097_v26  ;;  %v3422_v33 = vsel %vm1334_vm11, %v3420_v15, %v3421_v55 }
 0x3d3   :  { %5459 = vtanh.f32 %v4051_v39  ;;  %v3868_v13 = vpop.f32.mrf.mxu3  ;;  %v4143_v24 = vrot.slane %v4142_v46, 1  ;;  %v3425_v37 = vsel %vm1334_vm11, %v3423_v20, %v3424_v32  ;;  %v3685_v8 = vrot.slane %v7601_v0, 3 }
 0x3d4   :  { %v3559_v5 = vpop.f32.mrf.mxu0  ;;  %v4151_v44 = vmax.f32 %v4149_v2, %v4150_v57  ;;  %5461 = vtanh.f32 %v4053_v41  ;;  %v3231_v48 = vadd.f32 %v3163_v17, %v7081_v52  ;;  %v3494_v43 = vadd.f32 %v3421_v55, %v3232_v53 }
 0x3d5   :  { %v3608_v1 = vpop.f32.mrf.mxu1  ;;  %v3683_v38 = vrot.slane %v3559_v5, 3  ;;  %v4144_v9 = vmax.f32 %v4142_v46, %v4143_v24  ;;  %v3682_v16 = vrot.slane %v7597_v54, 3  ;;  %v3492_v34 = vadd.f32 %v3422_v33, %v3230_v3 }
 0x3d6   :  { %v4152_v59 = vrot.slane %v4151_v44, 1  ;;  %v3686_v36 = vrot.slane %v3608_v1, 3  ;;  %v3495_v45 = vadd.f32 %v3424_v32, %v3233_v61  ;;  %v3493_v49 = vadd.f32 %v3425_v37, %v3231_v48 }
 0x3d7   :  { %v5456_v42 = vpop.eup %5455  ;;  %v7627_v21 = vsel %vm4259_vm5, %v4144_v9, %v7586_v11  ;;  %v3945_v30 = vrot.slane %v3819_v19, 4  ;;  %v3684_v47 = vsel %vm2494_vm13, %v3682_v16, %v3683_v38  ;;  %v3948_v54 = vrot.slane %v3868_v13, 4 }
 0x3d8   :  { %v5458_v26 = vpop.eup %5457  ;;  %v4154_v50 = vsel %vm3920_vm3, %v5456_v42, -inf  ;;  %v4153_v14 = vmax.f32 %v4151_v44, %v4152_v59  ;;  %v3687_v60 = vsel %vm2494_vm13, %v3685_v8, %v3686_v36  ;;  %v3756_v41 = vadd.f32 %v3683_v38, %v3494_v43 }
 0x3d9   :  { %v5460_v56 = vpop.eup %5459  ;;  %v4155_v0 = vmax.f32 %v5458_v26, %v4154_v50  ;;  %v3754_v32 = vadd.f32 %v3684_v47, %v3492_v34  ;;  %v3757_v57 = vadd.f32 %v3686_v36, %v3495_v45  ;;  %v3755_v13 = vadd.f32 %v3687_v60, %v3493_v49 }
 0x3da   :  { %v5462_v52 = vpop.eup %5461  ;;  %v4162_v40 = vsel %vm629_vm2, %v5460_v56, -inf  ;;  %v3821_v11 = vpop.f32.mrf.mxu2  ;;  %v4379_v35 = vsel %vm4259_vm5, %v4153_v14, %v7593_v18  ;;  %vm4399_vm1 = vcmask 719872   ;;  %vm4389_vm4 = vcmask 539648  }
 0x3db   :  { %v4156_v2 = vrot.slane %v4155_v0, 4  ;;  %v4163_v28 = vsel %vm4111_vm12, %v5462_v52, -inf  ;;  %v3946_v55 = vrot.slane %v3821_v11, 4  ;;  %v3870_v46 = vpop.f32.mrf.mxu3 }
 0x3dc   :  { %v3562_v39 = vpop.f32.mrf.mxu0  ;;  %v4164_v20 = vmax.f32 %v4162_v40, %v4163_v28  ;;  %v3949_v19 = vrot.slane %v3870_v46, 4 }
 0x3dd   :  { %v3611_v15 = vpop.f32.mrf.mxu1  ;;  %v4157_v53 = vmax.f32 %v4155_v0, %v4156_v2  ;;  %v3947_v5 = vsel %vm3920_vm3, %v3945_v30, %v3946_v55  ;;  %v4019_v24 = vadd.f32 %v3946_v55, %v3756_v41  ;;  %v3688_v30 = vrot.slane %v3562_v39, 3 }
 0x3de   :  { %v4165_v3 = vrot.slane %v4164_v20, 4  ;;  %v4017_v17 = vadd.f32 %v3947_v5, %v3754_v32  ;;  %v3950_v18 = vsel %vm3920_vm3, %v3948_v54, %v3949_v19  ;;  %v4020_v44 = vadd.f32 %v3949_v19, %v3757_v57 }
 0x3df   :  { %v4158_v1 = vrot.slane %v4157_v53, 2  ;;  %v4056_v61 = vadd.f32 %v7540_v23, %v4019_v24  ;;  %v4018_v33 = vadd.f32 %v3950_v18, %v3755_v13  ;;  %v3691_v14 = vrot.slane %v3611_v15, 3 }
 0x3e0   :  { %v4166_v38 = vmax.f32 %v4164_v20, %v4165_v3  ;;  %v4054_v9 = vadd.f32 %v7540_v23, %v4017_v17  ;;  %v4057_v37 = vadd.f32 %v7544_v25, %v4020_v44 }
 0x3e1   :  { %5463 = vtanh.f32 %v4056_v61  ;;  %v4055_v59 = vadd.f32 %v7544_v25, %v4018_v33  ;;  %v4159_v8 = vmax.f32 %v4157_v53, %v4158_v1 }
 0x3e2   :  { %v4167_v36 = vrot.slane %v4166_v38, 2  ;;  %5465 = vtanh.f32 %v4054_v9  ;;  %v3824_v42 = vpop.f32.mrf.mxu2 }
 0x3e3   :  { %5467 = vtanh.f32 %v4055_v59  ;;  %v3873_v48 = vpop.f32.mrf.mxu3  ;;  %v4160_v16 = vrot.slane %v4159_v8, 1  ;;  %v3951_v2 = vrot.slane %v3824_v42, 4 }
 0x3e4   :  { %v3564_v43 = vpop.f32.mrf.mxu0  ;;  %v4168_v26 = vmax.f32 %v4166_v38, %v4167_v36  ;;  %5469 = vtanh.f32 %v4057_v37  ;;  %v3954_v46 = vrot.slane %v3873_v48, 4 }
 0x3e5   :  { %v3613_v34 = vpop.f32.mrf.mxu1  ;;  %v3689_v45 = vrot.slane %v3564_v43, 3  ;;  %v4161_v50 = vmax.f32 %v4159_v8, %v4160_v16 }
 0x3e6   :  { %v3692_v56 = vrot.slane %v3613_v34, 3  ;;  %v4169_v49 = vrot.slane %v4168_v26, 1 }
 0x3e7   :  { %v5464_v0 = vpop.eup %5463  ;;  %v7644_v47 = vsel %vm4261_vm6, %v4161_v50, %v7627_v21  ;;  %v3690_v28 = vsel %vm2494_vm13, %v3688_v30, %v3689_v45  ;;  %v3760_v19 = vadd.f32 %v3689_v45, %v7427_v63 }
 0x3e8   :  { %v5466_v52 = vpop.eup %5465  ;;  %v4171_v40 = vsel %vm3920_vm3, %v5464_v0, -inf  ;;  %v4170_v54 = vmax.f32 %v4168_v26, %v4169_v49  ;;  %v3693_v20 = vsel %vm2494_vm13, %v3691_v14, %v3692_v56  ;;  %v3758_v24 = vadd.f32 %v3690_v28, %v7432_v22 }
 0x3e9   :  { %v5468_v60 = vpop.eup %5467  ;;  %v4172_v11 = vmax.f32 %v5466_v52, %v4171_v40  ;;  %v3761_v3 = vadd.f32 %v3692_v56, %v7435_v29  ;;  %v3759_v1 = vadd.f32 %v3693_v20, %v7447_v4 }
 0x3ea   :  { %v5470_v41 = vpop.eup %5469  ;;  %v4179_v55 = vsel %vm629_vm2, %v5468_v60, -inf  ;;  %v3826_v39 = vpop.f32.mrf.mxu2  ;;  %v4380_v32 = vsel %vm4261_vm6, %v4170_v54, %v4379_v35 }
 0x3eb   :  { %v4173_v21 = vrot.slane %v4172_v11, 4  ;;  %v4180_v57 = vsel %vm4111_vm12, %v5470_v41, -inf  ;;  %v3952_v15 = vrot.slane %v3826_v39, 4  ;;  %v3875_v53 = vpop.f32.mrf.mxu3 }
 0x3ec   :  { %v3567_v13 = vpop.f32.mrf.mxu0  ;;  %v4181_v5 = vmax.f32 %v4179_v55, %v4180_v57  ;;  %v3955_v17 = vrot.slane %v3875_v53, 4 }
 0x3ed   :  { %v3616_v18 = vpop.f32.mrf.mxu1  ;;  %v4174_v44 = vmax.f32 %v4172_v11, %v4173_v21  ;;  %v3953_v35 = vsel %vm3920_vm3, %v3951_v2, %v3952_v15  ;;  %v4023_v61 = vadd.f32 %v3952_v15, %v3760_v19  ;;  %v3694_v30 = vrot.slane %v3567_v13, 3 }
 0x3ee   :  { %v4182_v33 = vrot.slane %v4181_v5, 4  ;;  %v4021_v38 = vadd.f32 %v3953_v35, %v3758_v24  ;;  %v3956_v63 = vsel %vm3920_vm3, %v3954_v46, %v3955_v17  ;;  %v4024_v9 = vadd.f32 %v3955_v17, %v3761_v3  ;;  %v4469_v3 = vld [vmem:[%s7901_s10 + $0x1f8] sm:$0xff] }
 0x3ef   :  { %v4060_v37 = vadd.f32 %v7540_v23, %v4023_v61  ;;  %v4022_v59 = vadd.f32 %v3956_v63, %v3759_v1  ;;  %v4175_v4 = vrot.slane %v4174_v44, 2  ;;  %v3697_v14 = vrot.slane %v3616_v18, 3  ;;  %4568 = vmatpush.msrb.mxu3 %v4469_v3 }
 0x3f0   :  { %v4183_v8 = vmax.f32 %v4181_v5, %v4182_v33  ;;  %v4058_v22 = vadd.f32 %v7540_v23, %v4021_v38  ;;  %v4061_v29 = vadd.f32 %v7544_v25, %v4024_v9 }
 0x3f1   :  { %5471 = vtanh.f32 %v4060_v37  ;;  %v4059_v36 = vadd.f32 %v7544_v25, %v4022_v59  ;;  %v4176_v50 = vmax.f32 %v4174_v44, %v4175_v4 }
 0x3f2   :  { %5473 = vtanh.f32 %v4058_v22  ;;  %v3829_v42 = vpop.f32.mrf.mxu2  ;;  %v4184_v48 = vrot.slane %v4183_v8, 2 }
 0x3f3   :  { %5475 = vtanh.f32 %v4059_v36  ;;  %v3878_v43 = vpop.f32.mrf.mxu3  ;;  %v3957_v2 = vrot.slane %v3829_v42, 4  ;;  %v4177_v41 = vrot.slane %v4176_v50, 1 }
 0x3f4   :  { %v3569_v16 = vpop.f32.mrf.mxu0  ;;  %5477 = vtanh.f32 %v4061_v29  ;;  %v4185_v34 = vmax.f32 %v4183_v8, %v4184_v48  ;;  %v3960_v20 = vrot.slane %v3878_v43, 4 }
 0x3f5   :  { %v3618_v26 = vpop.f32.mrf.mxu1  ;;  %v3695_v45 = vrot.slane %v3569_v16, 3  ;;  %v4178_v48 = vmax.f32 %v4176_v50, %v4177_v41 }
 0x3f6   :  { %v3698_v56 = vrot.slane %v3618_v26, 3  ;;  %v4186_v49 = vrot.slane %v4185_v34, 1 }
 0x3f7   :  { %v5472_v0 = vpop.eup %5471  ;;  %v3696_v28 = vsel %vm2494_vm13, %v3694_v30, %v3695_v45  ;;  %v3764_v53 = vadd.f32 %v3695_v45, %v7489_v58 }
 0x3f8   :  { %v5474_v52 = vpop.eup %5473  ;;  %v4188_v40 = vsel %vm3920_vm3, %v5472_v0, -inf  ;;  %v4187_v54 = vmax.f32 %v4185_v34, %v4186_v49  ;;  %v3699_v39 = vsel %vm2494_vm13, %v3697_v14, %v3698_v56  ;;  %v3762_v18 = vadd.f32 %v3696_v28, %v7494_v62  ;;  %v4467_v28 = vld [vmem:[%s7901_s10 + $0x1e8] sm:$0xff] }
 0x3f9   :  { %v5476_v60 = vpop.eup %5475  ;;  %v4189_v11 = vmax.f32 %v5474_v52, %v4188_v40  ;;  %v3765_v44 = vadd.f32 %v3698_v56, %v7497_v6  ;;  %v3763_v35 = vadd.f32 %v3699_v39, %v7503_v31  ;;  %v4468_v31 = vld [vmem:[%s7901_s10 + $0x1f0] sm:$0xff]  ;;  %v4374_v52 = vsel %vm4263_vm7, %v4178_v48, %v7644_v47  ;;  %v4499_v48 = vld [vmem:[%s7901_s10 + $0x2e8] sm:$0xff] }
 0x3fa   :  { %v5478_v55 = vpop.eup %5477  ;;  %v4196_v46 = vsel %vm629_vm2, %v5476_v60, -inf  ;;  %v3831_v21 = vpop.f32.mrf.mxu2  ;;  %v7667_v57 = vsel %vm4263_vm7, %v4187_v54, %v4380_v32  ;;  %4569 = vmatpush.msrb.mxu3 %v4468_v31 }
 0x3fb   :  { %v4190_v19 = vrot.slane %v4189_v11, 4  ;;  %v4197_v15 = vsel %vm4111_vm12, %v5478_v55, -inf  ;;  %v3958_v13 = vrot.slane %v3831_v21, 4  ;;  %v3880_v5 = vpop.f32.mrf.mxu3 }
 0x3fc   :  { %v3572_v24 = vpop.f32.mrf.mxu0  ;;  %v4198_v17 = vmax.f32 %v4196_v46, %v4197_v15  ;;  %v3961_v1 = vrot.slane %v3880_v5, 4  ;;  %4570 = vmatpush.msrb.mxu3 %v4467_v28  ;;  %v4497_v28 = vld [vmem:[%s7901_s10 + $0x2d8] sm:$0xff] }
 0x3fd   :  { %v3621_v32 = vpop.f32.mrf.mxu1  ;;  %v3959_v61 = vsel %vm3920_vm3, %v3957_v2, %v3958_v13  ;;  %v4027_v58 = vadd.f32 %v3958_v13, %v3764_v53  ;;  %v4191_v33 = vmax.f32 %v4189_v11, %v4190_v19  ;;  %v3700_v60 = vrot.slane %v3572_v24, 3 }
 0x3fe   :  { %v4199_v38 = vrot.slane %v4198_v17, 4  ;;  %v4025_v63 = vadd.f32 %v3959_v61, %v3762_v18  ;;  %v3962_v9 = vsel %vm3920_vm3, %v3960_v20, %v3961_v1  ;;  %v4028_v37 = vadd.f32 %v3961_v1, %v3765_v44 }
 0x3ff   :  { %v4064_v59 = vadd.f32 %v7540_v23, %v4027_v58  ;;  %v4026_v8 = vadd.f32 %v3962_v9, %v3763_v35  ;;  %v4192_v62 = vrot.slane %v4191_v33, 2  ;;  %v3703_v0 = vrot.slane %v3621_v32, 3 }
 0x400   :  { %v4062_v6 = vadd.f32 %v7540_v23, %v4025_v63  ;;  %v4065_v22 = vadd.f32 %v7544_v25, %v4028_v37  ;;  %v4200_v29 = vmax.f32 %v4198_v17, %v4199_v38 }
 0x401   :  { %5479 = vtanh.f32 %v4064_v59  ;;  %v4063_v36 = vadd.f32 %v7544_v25, %v4026_v8  ;;  %v4193_v4 = vmax.f32 %v4191_v33, %v4192_v62  ;;  %v4239_v62 = vld [vmem:[%s7892_s1] sm:$0xff] }
 0x402   :  { %5481 = vtanh.f32 %v4062_v6  ;;  %v3834_v42 = vpop.f32.mrf.mxu2  ;;  %v4201_v43 = vrot.slane %v4200_v29, 2  ;;  %v4465_v6 = vld [vmem:[%s7901_s10 + $0x1d8] sm:$0xff]  ;;  %4395 = vrot.lane.b32.xlu2 %v4239_v62, %s5547_s16 }
 0x403   :  { %5483 = vtanh.f32 %v4063_v36  ;;  %v3883_v16 = vpop.f32.mrf.mxu3  ;;  %v4194_v34 = vrot.slane %v4193_v4, 1  ;;  %v3963_v20 = vrot.slane %v3834_v42, 4  ;;  %v4500_v42 = vld [vmem:[%s7901_s10 + $0x2f0] sm:$0xff] }
 0x404   :  { %v3574_v26 = vpop.f32.mrf.mxu0  ;;  %5485 = vtanh.f32 %v4065_v22  ;;  %v4202_v14 = vmax.f32 %v4200_v29, %v4201_v43  ;;  %v3966_v19 = vrot.slane %v3883_v16, 4  ;;  %4609 = vmatpush.msra.mxu1 %v4500_v42 }
 0x405   :  { %v3623_v45 = vpop.f32.mrf.mxu1  ;;  %v3701_v56 = vrot.slane %v3574_v26, 3  ;;  %v4195_v49 = vmax.f32 %v4193_v4, %v4194_v34  ;;  %v4485_v26 = vld [vmem:[%s7901_s10 + $0x278] sm:$0xff]  ;;  %v4484_v34 = vld [vmem:[%s7901_s10 + $0x270] sm:$0xff] }
 0x406   :  { %v3704_v30 = vrot.slane %v3623_v45, 3  ;;  %v4203_v40 = vrot.slane %v4202_v14, 1  ;;  %v4240_v45 = vld [vmem:[%s7892_s1 + $0x8] sm:$0xff]  ;;  %4588 = vmatpush.msra.mxu0 %v4485_v26  ;;  %4610 = vmatpush.msra.mxu1 %v4499_v48  ;;  %v4474_v48 = vld [vmem:[%s7901_s10 + $0x220] sm:$0xff]  ;;  %v4473_v26 = vld [vmem:[%s7901_s10 + $0x218] sm:$0xff] }
 0x407   :  { %v5480_v54 = vpop.eup %5479  ;;  %v7689_v50 = vsel %vm4265_vm8, %v4195_v49, %v4374_v52  ;;  %v3702_v39 = vsel %vm2494_vm13, %v3700_v60, %v3701_v56  ;;  %v3768_v24 = vadd.f32 %v3701_v56, %v7518_v7  ;;  %v4483_v52 = vld [vmem:[%s7901_s10 + $0x268] sm:$0xff]  ;;  %v4461_v60 = vld [vmem:[%s7901_s10 + $0x1b8] sm:$0xff] }
 0x408   :  { %v5482_v11 = vpop.eup %5481  ;;  %v4205_v2 = vsel %vm3920_vm3, %v5480_v54, -inf  ;;  %v4204_v41 = vmax.f32 %v4202_v14, %v4203_v40  ;;  %v3705_v15 = vsel %vm2494_vm13, %v3703_v0, %v3704_v30  ;;  %v3766_v1 = vadd.f32 %v3702_v39, %v7520_v51  ;;  %v4462_v14 = vld [vmem:[%s7901_s10 + $0x1c0] sm:$0xff]  ;;  %4589 = vmatpush.msra.mxu0 %v4484_v34 }
 0x409   :  { %v5484_v55 = vpop.eup %5483  ;;  %v4206_v46 = vmax.f32 %v5482_v11, %v4205_v2  ;;  %v3769_v32 = vadd.f32 %v3704_v30, %v7523_v27  ;;  %v3767_v61 = vadd.f32 %v3705_v15, %v7528_v12  ;;  %v4466_v12 = vld [vmem:[%s7901_s10 + $0x1e0] sm:$0xff]  ;;  %v4481_v15 = vld [vmem:[%s7901_s10 + $0x258] sm:$0xff] }
 0x40a   :  { %v5486_v47 = vpop.eup %5485  ;;  %v4213_v21 = vsel %vm629_vm2, %v5484_v55, -inf  ;;  %v3836_v53 = vpop.f32.mrf.mxu2  ;;  %v7700_v13 = vsel %vm4265_vm8, %v4204_v41, %v7667_v57  ;;  %4571 = vmatpush.msrb.mxu3 %v4466_v12  ;;  %v4498_v30 = vld [vmem:[%s7901_s10 + $0x2e0] sm:$0xff]  ;;  %4397 = vrot.lane.b32.xlu2 %v4240_v45, %s5547_s16 }
 0x40b   :  { %v4214_v5 = vsel %vm4111_vm12, %v5486_v47, -inf  ;;  %v3964_v3 = vrot.slane %v3836_v53, 4  ;;  %v3885_v17 = vpop.f32.mrf.mxu3  ;;  %v4207_v18 = vrot.slane %v4206_v46, 4  ;;  %v4482_v41 = vld [vmem:[%s7901_s10 + $0x260] sm:$0xff]  ;;  %4611 = vmatpush.msra.mxu1 %v4498_v30  ;;  %4590 = vmatpush.msra.mxu0 %v4483_v52 }
 0x40c   :  { %v4215_v44 = vmax.f32 %v4213_v21, %v4214_v5  ;;  %v3967_v35 = vrot.slane %v3885_v17, 4  ;;  %4572 = vmatpush.msrb.mxu3 %v4465_v6  ;;  %v4459_v5 = vld [vmem:[%s7901_s10 + $0x1a8] sm:$0xff]  ;;  %v4486_v45 = vld [vmem:[%s7901_s10 + $0x280] sm:$0xff] }
 0x40d   :  { %v3965_v58 = vsel %vm3920_vm3, %v3963_v20, %v3964_v3  ;;  %v4031_v33 = vadd.f32 %v3964_v3, %v3768_v24  ;;  %v4208_v57 = vmax.f32 %v4206_v46, %v4207_v18  ;;  %v4460_v20 = vld [vmem:[%s7901_s10 + $0x1b0] sm:$0xff]  ;;  %4612 = vmatpush.msra.mxu1 %v4497_v28  ;;  %4591 = vmatpush.msra.mxu0 %v4482_v41  ;;  %v4458_v18 = vld [vmem:[%s7901_s10 + $0x1a0] sm:$0xff]  ;;  %v4525_v28 = vpop.f32.mrf.mxu0 }
 0x40e   :  { %v4029_v38 = vadd.f32 %v3965_v58, %v3766_v1  ;;  %v3968_v63 = vsel %vm3920_vm3, %v3966_v19, %v3967_v35  ;;  %v4032_v9 = vadd.f32 %v3967_v35, %v3769_v32  ;;  %v4216_v8 = vrot.slane %v4215_v44, 4  ;;  %v4496_v19 = vld [vmem:[%s7901_s10 + $0x2d0] sm:$0xff]  ;;  %v4494_v1 = vld [vmem:[%s7901_s10 + $0x2c0] sm:$0xff]  ;;  %v4479_v32 = vld [vmem:[%s7901_s10 + $0x248] sm:$0xff] }
 0x40f   :  { %v4068_v7 = vadd.f32 %v7540_v23, %v4031_v33  ;;  %v4030_v37 = vadd.f32 %v3968_v63, %v3767_v61  ;;  %v4209_v59 = vrot.slane %v4208_v57, 2  ;;  %v4480_v3 = vld [vmem:[%s7901_s10 + $0x250] sm:$0xff]  ;;  %4613 = vmatpush.msra.mxu1 %v4496_v19  ;;  %4592 = vmatpush.msra.mxu0 %v4481_v15  ;;  %v4457_v61 = vld [vmem:[%s7901_s10 + $0x198] sm:$0xff] }
 0x410   :  { %v4066_v51 = vadd.f32 %v7540_v23, %v4029_v38  ;;  %v4069_v27 = vadd.f32 %v7544_v25, %v4032_v9  ;;  %v4217_v29 = vmax.f32 %v4215_v44, %v4216_v8  ;;  %v4464_v23 = vld [vmem:[%s7901_s10 + $0x1d0] sm:$0xff]  ;;  %v4493_v33 = vld [vmem:[%s7901_s10 + $0x2b8] sm:$0xff] }
 0x411   :  { %5487 = vtanh.f32 %v4068_v7  ;;  %v4067_v22 = vadd.f32 %v7544_v25, %v4030_v37  ;;  %v4210_v31 = vmax.f32 %v4208_v57, %v4209_v59  ;;  %v4463_v25 = vld [vmem:[%s7901_s10 + $0x1c8] sm:$0xff]  ;;  %4573 = vmatpush.msrb.mxu3 %v4464_v23  ;;  %4593 = vmatpush.msra.mxu0 %v4480_v3  ;;  %v4478_v57 = vld [vmem:[%s7901_s10 + $0x240] sm:$0xff]  ;;  %v4456_v63 = vld [vmem:[%s7901_s10 + $0x190] sm:$0xff] }
 0x412   :  { %5489 = vtanh.f32 %v4066_v51  ;;  %v4218_v4 = vrot.slane %v4217_v29, 2  ;;  %v4492_v7 = vld [vmem:[%s7901_s10 + $0x2b0] sm:$0xff]  ;;  %v4455_v59 = vld [vmem:[%s7901_s10 + $0x188] sm:$0xff] }
 0x413   :  { %5491 = vtanh.f32 %v4067_v22  ;;  %v4211_v36 = vrot.slane %v4210_v31, 1  ;;  %4574 = vmatpush.msrb.mxu3 %v4463_v25  ;;  %4594 = vmatpush.msra.mxu0 %v4479_v32  ;;  %v4491_v51 = vld [vmem:[%s7901_s10 + $0x2a8] sm:$0xff]  ;;  %v4454_v22 = vld [vmem:[%s7901_s10 + $0x180] sm:$0xff]  ;;  %v4476_v23 = vld [vmem:[%s7901_s10 + $0x230] sm:$0xff] }
 0x414   :  { %5493 = vtanh.f32 %v4069_v27  ;;  %v4219_v16 = vmax.f32 %v4217_v29, %v4218_v4  ;;  %v4490_v29 = vld [vmem:[%s7901_s10 + $0x2a0] sm:$0xff]  ;;  %v4475_v4 = vld [vmem:[%s7901_s10 + $0x228] sm:$0xff]  ;;  %v4488_v25 = vld [vmem:[%s7901_s10 + $0x290] sm:$0xff] }
 0x415   :  { %v4212_v43 = vmax.f32 %v4210_v31, %v4211_v36  ;;  %4575 = vmatpush.msrb.mxu3 %v4462_v14  ;;  %4595 = vmatpush.msra.mxu0 %v4478_v57  ;;  %v4477_v31 = vld [vmem:[%s7901_s10 + $0x238] sm:$0xff]  ;;  %v4472_v14 = vld [vmem:[%s7901_s10 + $0x210] sm:$0xff] }
 0x416   :  { %v4220_v0 = vrot.slane %v4219_v16, 1  ;;  %v4489_v36 = vld [vmem:[%s7901_s10 + $0x298] sm:$0xff] }
 0x417   :  { %v5488_v56 = vpop.eup %5487  ;;  %v7749_v49 = vsel %vm4267_vm9, %v4212_v43, %v7689_v50  ;;  %4576 = vmatpush.msrb.mxu3 %v4461_v60  ;;  %4596 = vmatpush.msra.mxu0 %v4477_v31  ;;  %v4487_v43 = vld [vmem:[%s7901_s10 + $0x288] sm:$0xff]  ;;  %v4631_v60 = vld [vmem:[%s7903_s12 + $0x18] sm:$0xff] }
 0x418   :  { %v5490_v40 = vpop.eup %5489  ;;  %v4222_v54 = vsel %vm3920_vm3, %v5488_v56, -inf  ;;  %v4221_v2 = vmax.f32 %v4219_v16, %v4220_v0  ;;  %v4471_v56 = vld [vmem:[%s7901_s10 + $0x208] sm:$0xff]  ;;  %4651 = vmatpush.msra.mxu2 %v4631_v60 }
 0x419   :  { %v5492_v50 = vpop.eup %5491  ;;  %v4223_v11 = vmax.f32 %v5490_v40, %v4222_v54  ;;  %4577 = vmatpush.msrb.mxu3 %v4460_v20  ;;  %4597 = vmatpush.msra.mxu0 %v4476_v23 }
 0x41a   :  { %v5494_v55 = vpop.eup %5493  ;;  %v4230_v46 = vsel %vm629_vm2, %v5492_v50, -inf  ;;  %v4383_v21 = vsel %vm4267_vm9, %v4221_v2, %v7700_v13  ;;  %v4495_v13 = vld [vmem:[%s7901_s10 + $0x2c8] sm:$0xff]  ;;  %vm4505_vm2 = vcmask 982016   ;;  %v4630_v50 = vld [vmem:[%s7903_s12 + $0x10] sm:$0xff]  ;;  %v5237_v2 = vld [vmem:[%s7902_s11] ss:$0 sm:$0xff] }
 0x41b   :  { %v4231_v39 = vsel %vm4111_vm12, %v5494_v55, -inf  ;;  %v4224_v47 = vrot.slane %v4223_v11, 4  ;;  %4578 = vmatpush.msrb.mxu3 %v4459_v5  ;;  %4614 = vmatpush.msra.mxu1 %v4495_v13  ;;  %v4526_v41 = vadd.f32 %v5237_v2, %v4525_v28  ;;  %v4545_v55 = vpop.f32.mrf.mxu1  ;;  %s4665_s11 = sshll.u32 %s5549_s29, 4  ;;  %s4666_s11 = int_to_ptr.vmem [resolvable:$true] %s4665_s11 }
 0x41c   :  { %v4232_v53 = vmax.f32 %v4230_v46, %v4231_v39  ;;  %4598 = vmatpush.msra.mxu0 %v4475_v4  ;;  %4652 = vmatpush.msra.mxu2 %v4630_v50 }
 0x41d   :  { %v4225_v24 = vmax.f32 %v4223_v11, %v4224_v47  ;;  %4579 = vmatpush.msrb.mxu3 %v4458_v18  ;;  %4615 = vmatpush.msra.mxu1 %v4494_v1  ;;  %v4628_v11 = vld [vmem:[%s7903_s12] sm:$0xff]  ;;  %v4546_v20 = vadd.f32 %v4545_v55, %v4526_v41 }
 0x41e   :  { %v4233_v17 = vrot.slane %v4232_v53, 4  ;;  %4599 = vmatpush.msra.mxu0 %v4474_v48 }
 0x41f   :  { %v4226_v44 = vrot.slane %v4225_v24, 2  ;;  %4580 = vmatpush.msrb.mxu3 %v4457_v61  ;;  %4616 = vmatpush.msra.mxu1 %v4493_v33 }
 0x420   :  { %v4234_v35 = vmax.f32 %v4232_v53, %v4233_v17  ;;  %4600 = vmatpush.msra.mxu0 %v4473_v26  ;;  %v4565_v46 = vpop.f32.mrf.mxu2 }
 0x421   :  { %v4227_v58 = vmax.f32 %v4225_v24, %v4226_v44  ;;  %4581 = vmatpush.msrb.mxu3 %v4456_v63  ;;  %4617 = vmatpush.msra.mxu1 %v4492_v7  ;;  %v4566_v39 = vadd.f32 %v4565_v46, %v4546_v20  ;;  %v5238_v24 = vld [vmem:[%s7904_s13] ss:$0 sm:$0xff] }
 0x422   :  { %v4235_v38 = vrot.slane %v4234_v35, 2  ;;  %4601 = vmatpush.msra.mxu0 %v4472_v14 }
 0x423   :  { %v4228_v9 = vrot.slane %v4227_v58, 1  ;;  %4582 = vmatpush.msrb.mxu3 %v4455_v59  ;;  %4618 = vmatpush.msra.mxu1 %v4491_v51 }
 0x424   :  { %v4236_v37 = vmax.f32 %v4234_v35, %v4235_v38  ;;  %4602 = vmatpush.msra.mxu0 %v4471_v56 }
 0x425   :  { %v4229_v8 = vmax.f32 %v4227_v58, %v4228_v9  ;;  %4583 = vmatpush.msrb.mxu3 %v4454_v22  ;;  %4619 = vmatpush.msra.mxu1 %v4490_v29 }
 0x426   :  { %v4237_v27 = vrot.slane %v4236_v37, 1 }
 0x427   :  { %v4377_v12 = vsel %vm4269_vm10, %v4229_v8, %v7749_v49  ;;  %4620 = vmatpush.msra.mxu1 %v4489_v36  ;;  %v4470_v49 = vld [vmem:[%s7901_s10 + $0x200] sm:$0xff] }
 0x428   :  { %4385 = vrot.lane.b32.xlu1 %v4377_v12, %s5548_s22  ;;  %v4238_v62 = vmax.f32 %v4236_v37, %v4237_v27  ;;  %4603 = vmatpush.msra.mxu0 %v4470_v49 }
 0x429   :  { %4621 = vmatpush.msra.mxu1 %v4488_v25 }
 0x42a   :  { %v4384_v6 = vsel %vm4269_vm10, %v4238_v62, %v4383_v21 }
 0x42b   :  { %4622 = vmatpush.msra.mxu1 %v4487_v43 }
 0x42d   :  { %4623 = vmatpush.msra.mxu1 %v4486_v45 }
 0x430   :  { %4387 = vrot.lane.b32.xlu1 %v4384_v6, %s5548_s22 }
 0x45c   :  { %v4396_v42 = vpop.permute.xlu2 %4395 }
 0x464   :  { %v4398_v16 = vpop.permute.xlu2 %4397 }
 0x465   :  { %v4400_v34 = vsel %vm4399_vm1, %v4396_v42, %v4398_v16 }
 0x466   :  { %5156 = vmatmul.msk.f32.vlgmr.msra.gmra.mxu1 %vm4505_vm2, %v4400_v34 }
 0x49a   :  { %v4386_v0 = vpop.permute.xlu1 %4385 }
 0x49b   :  { %v4404_v30 = vsel %vm4389_vm4, %v7542_v10, %v4386_v0  ;;  %v4629_v10 = vld [vmem:[%s7903_s12 + $0x8] sm:$0xff] }
 0x49c   :  { %4584 = vmatmul.f32.vlgmr.msrb.gmra.mxu3 %v4404_v30  ;;  %4653 = vmatpush.msra.mxu2 %v4629_v10 }
 0x49e   :  { %4654 = vmatpush.msra.mxu2 %v4628_v11 }
 0x4a2   :  { %v4388_v52 = vpop.permute.xlu1 %4387 }
 0x4a3   :  { %v4390_v40 = vsel %vm4389_vm4, %v4386_v0, %v4388_v52 }
 0x4a4   :  { %v4405_v54 = vsel %vm4399_vm1, %v4390_v40, %v4396_v42 }
 0x4a5   :  { %4604 = vmatmul.f32.vlgmr.msra.gmra.mxu0 %v4405_v54 }
 0x4e3   :  { %v4625_v53 = vpop.f32.mrf.mxu1 }
 0x51f   :  { %v4585_v47 = vpop.f32.mrf.mxu3 }
 0x520   :  { %v4586_v21 = vadd.f32 %v4585_v47, %v4566_v39 }
 0x522   :  { %v4605_v19 = vpop.f32.mrf.mxu0 }
 0x523   :  { %v4606_v15 = vadd.f32 %v4605_v19, %v4586_v21 }
 0x525   :  { %v4626_v5 = vadd.f32 %v4625_v53, %v4606_v15 }
 0x527   :  { %5157 = vmatmul.msk.f32.vlgmr.msra.gmra.mxu2 %vm134_vm0, %v4626_v5 }
 0x5aa   :  { %v4656_v13 = vpop.f32.mrf.mxu2 }
 0x5ab   :  { %v4657_v3 = vadd.f32 %v5238_v24, %v4656_v13 }
 0x5ad   :  { %4659 = vst.msk [vmem:[#allocation2] sm:$0xff] %vm134_vm0, %v4657_v3 }
 0x5ae   :  { %4670 = dma.vmem_to_hbm [thread:$0]  %s4666_s11, 128, %s4668_s7, [#allocation3]  }
 0x5af   :  { %5543 = dma.done.wait [#allocation3], 128  }
 0x5b0   :  { %5544 = vsyncadd [#allocation3], 4294967168 }
 0x5b1   :  { %4675 = vsyncpa [#allocation3], 1 }

</bundles_post_ra>
